<compile_context>
chip_gen: v6e
topology: v6e:2x2x1
jax: 0.10.0
libtpu: 0.0.40
codegen_flags: <defaults>
</compile_context>

<pallas_src>
import jax
import jax.numpy as jnp
from jax.experimental import pallas as pl
from jax.experimental.pallas import tpu as pltpu


# ----------------------------- Pallas kernels --------------------------------

def _tap_offsets(dilations):
    """Tap (dy, dx) offsets: tap 0 = the 1x1 branch, then 9 per dilated branch."""
    offs = [(0, 0)]
    for d in dilations:
        for t in range(9):
            ky, kx = divmod(t, 3)
            offs.append(((ky - 1) * d, (kx - 1) * d))
    return tuple(offs)


def _make_fused_kernel(offsets, dmax, tile_h, W):
    """Branch weights pre-multiplied by their red_conv row-block: one matmul per tap."""
    ntap = len(offsets)

    def kernel(x_ref, wt_ref, pr_ref, out_ref):
        # x_ref  : (Hp, Wp, C)       zero-padded activations, this batch element
        # wt_ref : (ntap, C, OUT_P)  composite tap weights (BN scales + red_conv folded)
        # pr_ref : (1, OUT_P)        pool branch + all folded BN shifts (per batch)
        # out_ref: (tile_h, W, OUT_P)
        C = x_ref.shape[-1]
        OUT_P = out_ref.shape[-1]
        TP = tile_h * W
        f32 = jnp.float32

        h0 = pl.multiple_of(pl.program_id(1) * tile_h, tile_h)

        def tap(dy, dx):
            # Shifted (tile_h, W, C) window of the padded slab -> (TP, C).
            # W is kept a multiple of 8 so this reshape stays tile-aligned.
            return x_ref[pl.ds(dmax + h0 + dy, tile_h),
                         pl.ds(dmax + dx, W), :].reshape(TP, C)

        acc = jnp.dot(tap(*offsets[0]), wt_ref[0], preferred_element_type=f32)
        for i in range(1, ntap):
            acc += jnp.dot(tap(*offsets[i]), wt_ref[i], preferred_element_type=f32)

        out = acc + pr_ref[...]
        out_ref[...] = out.reshape(tile_h, W, OUT_P).astype(out_ref.dtype)

    return kernel


def _make_unfused_kernel(dilations, dmax, tile_h, W):
    """Two-stage path: branch -> hidden (Hc), then per-branch red_conv row-block."""

    def kernel(x_ref, w0_ref, w1_ref, w2_ref, w3_ref,
               wr0_ref, wr1_ref, wr2_ref, wr3_ref, pr_ref, out_ref):
        # x_ref        : (Hp, Wp, C)   zero-padded activations, this batch element
        # w0_ref       : (C, Hc)       1x1 branch weight   (map_bn scale folded)
        # w{1,2,3}_ref : (9, C, Hc)    dilated 3x3 taps     (map_bn scale folded)
        # wr{0..3}_ref : (Hc, OUT_P)   red_conv row-blocks  (red_bn scale folded)
        # pr_ref       : (1, OUT_P)    pool branch + all BN shifts (per batch)
        # out_ref      : (tile_h, W, OUT_P)
        C = x_ref.shape[-1]
        OUT_P = out_ref.shape[-1]
        TP = tile_h * W
        f32 = jnp.float32

        h0 = pl.multiple_of(pl.program_id(1) * tile_h, tile_h)

        def tap(dy, dx):
            return x_ref[pl.ds(dmax + h0 + dy, tile_h),
                         pl.ds(dmax + dx, W), :].reshape(TP, C)

        # --- branch 0: 1x1 conv, then its row-block of red_conv ---------------
        b = jnp.dot(tap(0, 0), w0_ref[...], preferred_element_type=f32)
        acc = jnp.dot(b, wr0_ref[...], preferred_element_type=f32)

        # --- branches 1..3: dilated 3x3 conv as 9 shifted matmuls -------------
        for w_ref, wr_ref, d in ((w1_ref, wr1_ref, dilations[0]),
                                 (w2_ref, wr2_ref, dilations[1]),
                                 (w3_ref, wr3_ref, dilations[2])):
            b = jnp.dot(tap(-d, -d), w_ref[0], preferred_element_type=f32)
            for t in range(1, 9):
                ky, kx = divmod(t, 3)
                b += jnp.dot(tap((ky - 1) * d, (kx - 1) * d), w_ref[t],
                             preferred_element_type=f32)
            acc += jnp.dot(b, wr_ref[...], preferred_element_type=f32)

        # --- epilogue: add pool branch + folded BN shifts, lane-dense store ---
        out = acc + pr_ref[...]
        out_ref[...] = out.reshape(tile_h, W, OUT_P).astype(out_ref.dtype)

    return kernel


# ----------------------------- glue / wrapper --------------------------------

def _w1x1(w):          # (Cout, Cin, 1, 1) -> (Cin, Cout)
    return jnp.transpose(w[:, :, 0, 0], (1, 0))


def _w3x3_taps(w):     # (Cout, Cin, 3, 3) -> (9, Cin, Cout), tap index = ky*3+kx
    cout, cin = w.shape[0], w.shape[1]
    return jnp.transpose(w, (2, 3, 1, 0)).reshape(9, cin, cout)


def _pick_tile_h(H, W, target_rows=512):
    th = max(1, min(H, target_rows // max(W, 1)))
    while H % th:
        th -= 1
    return th


def deeplab_head_forward(params, x_nchw, *, tile_h=None,
                         compute_dtype=jnp.float32, fuse_reduction=None):
    """x_nchw: (N, C, H, W) float32 -> (N, out_channels, H, W) float32."""
    N, C, H, W = x_nchw.shape
    dils = tuple(params['dilations'])
    dmax = max(dils)
    Hc = params['w_map0'].shape[0]
    OUT = params['w_red'].shape[0]
    OUT_P = ((OUT + 127) // 128) * 128            # lane-dense output width
    if tile_h is None:
        tile_h = _pick_tile_h(H, W)
    assert H % tile_h == 0, "tile_h must divide H"

    # MXU lanes are 128 wide: intermediates narrower than 128 still cost 128 lanes.
    hc_eff = max(Hc, 128)
    if fuse_reduction is None:
        fuse_reduction = 28 * C * OUT_P <= 28 * C * hc_eff + 4 * hc_eff * OUT_P

    x = jnp.transpose(x_nchw, (0, 2, 3, 1)).astype(jnp.float32)   # NHWC

    # ---- fold eval-mode BatchNorms into weights (done once, in f32) ----------
    mbn_s, mbn_b = params['map_bn_scale'], params['map_bn_shift']
    rbn_s, rbn_b = params['red_bn_scale'], params['red_bn_shift']
    gbn_s, gbn_b = params['gp_bn_scale'], params['gp_bn_shift']

    wred = _w1x1(params['w_red']) * rbn_s[None, :]        # (4*Hc, OUT), red_bn scale folded
    bias = mbn_b @ wred + rbn_b                           # (OUT,)  map_bn shift pushed through
    wred_p = jnp.pad(wred, ((0, 0), (0, OUT_P - OUT)))    # (4*Hc, OUT_P) lane-dense

    w0 = _w1x1(params['w_map0']) * mbn_s[None, 0:Hc]                        # (C, Hc)
    w3x3 = [_w3x3_taps(params['w_map%d' % k]) * mbn_s[None, None, k * Hc:(k + 1) * Hc]
            for k in (1, 2, 3)]                                             # 3 x (9, C, Hc)

    # ---- global pooling branch in plain JAX (tiny, but needs all of HW) ------
    pool = jnp.mean(x, axis=(1, 2))                                    # (N, C)
    pg = pool @ _w1x1(params['w_gp'])
    pg = pg * gbn_s[None, :] + gbn_b[None, :]
    pr = (pg @ _w1x1(params['w_pool_red'])) * rbn_s[None, :] + bias[None, :]
    pr = jnp.pad(pr, ((0, 0), (0, OUT_P - OUT))).reshape(N, 1, OUT_P)
    pr = pr.astype(jnp.float32)

    # ---- pad activations once; zero pad == conv padding=dilation -------------
    xp = jnp.pad(x, ((0, 0), (dmax, dmax), (dmax, dmax), (0, 0)))
    Hp, Wp = H + 2 * dmax, W + 2 * dmax

    cdt = compute_dtype
    xp = xp.astype(cdt)

    HT = H // tile_h

    def _const(shape):
        nd = len(shape)
        return pl.BlockSpec(shape, lambda n, t, _nd=nd: (0,) * _nd)

    # Padded activation slab: grid-invariant over the spatial axis
    # (fetched once per batch element, no re-DMA across tiles).
    x_spec = pl.BlockSpec((None, Hp, Wp, C), lambda n, t: (n, 0, 0, 0))
    pr_spec = pl.BlockSpec((None, 1, OUT_P), lambda n, t: (n, 0, 0))
    out_spec = pl.BlockSpec((None, tile_h, W, OUT_P), lambda n, t: (n, t, 0, 0))

    if fuse_reduction:
        offsets = _tap_offsets(dils)
        wt = jnp.concatenate(
            [(w0 @ wred_p[0:Hc, :])[None]]
            + [jnp.einsum('tch,ho->tco', w3x3[k], wred_p[(k + 1) * Hc:(k + 2) * Hc, :])
               for k in range(3)],
            axis=0).astype(cdt)                                     # (28, C, OUT_P)
        kernel = _make_fused_kernel(offsets, dmax, tile_h, W)
        operands = (xp, wt, pr)
        in_specs = [x_spec, _const(tuple(wt.shape)), pr_spec]
        flops = int(2 * N * H * W * len(offsets) * C * OUT_P)
        w_bytes = int(wt.size * wt.dtype.itemsize)
    else:
        w0c = w0.astype(cdt)
        w1, w2, w3b = (w.astype(cdt) for w in w3x3)
        wr_blocks = [wred_p[i * Hc:(i + 1) * Hc, :].astype(cdt) for i in range(4)]
        kernel = _make_unfused_kernel(dils, dmax, tile_h, W)
        operands = (xp, w0c, w1, w2, w3b, *wr_blocks, pr)
        in_specs = ([x_spec, _const(tuple(w0c.shape)), _const(tuple(w1.shape)),
                     _const(tuple(w2.shape)), _const(tuple(w3b.shape))]
                    + [_const(tuple(w.shape)) for w in wr_blocks] + [pr_spec])
        flops = int(2 * N * H * W * (28 * C * Hc + 4 * Hc * OUT_P))
        w_bytes = int(sum(w.size * w.dtype.itemsize
                          for w in (w0c, w1, w2, w3b, *wr_blocks)))

    bytes_accessed = int(xp.size * xp.dtype.itemsize + w_bytes
                         + N * H * W * OUT_P * 4)

    out = pl.pallas_call(
        kernel,
        out_shape=jax.ShapeDtypeStruct((N, H, W, OUT_P), jnp.float32),
        grid_spec=pltpu.PrefetchScalarGridSpec(
            num_scalar_prefetch=0,
            grid=(N, HT),
            in_specs=in_specs,
            out_specs=out_spec,
        ),
        compiler_params=pltpu.CompilerParams(
            dimension_semantics=("parallel", "parallel"),
            vmem_limit_bytes=48 * 1024 * 1024,
        ),
        cost_estimate=pl.CostEstimate(flops=flops, transcendentals=0,
                                      bytes_accessed=bytes_accessed),
    )(*operands)

    out = out[..., :OUT]                                     # drop lane padding
    return jnp.transpose(out, (0, 3, 1, 2))                  # back to NCHW


# ----------------------------- parameter init --------------------------------

def _xavier_normal(key, shape, fan_in, fan_out, gain=1.0):
    std = gain * (2.0 / (fan_in + fan_out)) ** 0.5
    return std * jax.random.normal(key, shape, dtype=jnp.float32)


def _bn_affine(num_features, eps=1e-5):
    gamma = jnp.ones((num_features,), jnp.float32)
    beta = jnp.zeros((num_features,), jnp.float32)
    running_mean = jnp.zeros((num_features,), jnp.float32)
    running_var = jnp.ones((num_features,), jnp.float32)
    scale = gamma / jnp.sqrt(running_var + eps)
    shift = beta - running_mean * scale
    return scale, shift


def init_deeplab_head_params(key, in_channels, out_channels,
                             hidden_channels=256, out_stride=16):
    if out_stride == 16:
        dilations = (6, 12, 18)
    elif out_stride == 8:
        dilations = (12, 24, 32)
    else:
        raise ValueError("out_stride must be 8 or 16")
    C, Hc, OUT = in_channels, hidden_channels, out_channels
    ks = jax.random.split(key, 7)
    # gain = calculate_gain('linear') = 1.0 (plain BatchNorm2d has no .activation)
    p = {
        'dilations': dilations,
        'w_map0': _xavier_normal(ks[0], (Hc, C, 1, 1), C, Hc),
        'w_map1': _xavier_normal(ks[1], (Hc, C, 3, 3), 9 * C, 9 * Hc),
        'w_map2': _xavier_normal(ks[2], (Hc, C, 3, 3), 9 * C, 9 * Hc),
        'w_map3': _xavier_normal(ks[3], (Hc, C, 3, 3), 9 * C, 9 * Hc),
        'w_gp': _xavier_normal(ks[4], (Hc, C, 1, 1), C, Hc),
        'w_red': _xavier_normal(ks[5], (OUT, 4 * Hc, 1, 1), 4 * Hc, OUT),
        'w_pool_red': _xavier_normal(ks[6], (OUT, Hc, 1, 1), Hc, OUT),
    }
    p['map_bn_scale'], p['map_bn_shift'] = _bn_affine(4 * Hc)
    p['gp_bn_scale'], p['gp_bn_shift'] = _bn_affine(Hc)
    p['red_bn_scale'], p['red_bn_shift'] = _bn_affine(OUT)
    return p


# ----------------------------- pure-JAX reference ----------------------------

def _conv_ref(x_nhwc, w_torch, dilation=1, padding=0):
    w = jnp.transpose(w_torch, (2, 3, 1, 0))  # HWIO
    return jax.lax.conv_general_dilated(
        x_nhwc, w, window_strides=(1, 1),
        padding=((padding, padding), (padding, padding)),
        rhs_dilation=(dilation, dilation),
        dimension_numbers=('NHWC', 'HWIO', 'NHWC'))


def deeplab_head_reference(params, x_nchw):
    d = params['dilations']
    x = jnp.transpose(x_nchw, (0, 2, 3, 1))
    maps = jnp.concatenate([
        _conv_ref(x, params['w_map0']),
        _conv_ref(x, params['w_map1'], d[0], d[0]),
        _conv_ref(x, params['w_map2'], d[1], d[1]),
        _conv_ref(x, params['w_map3'], d[2], d[2]),
    ], axis=-1)
    maps = maps * params['map_bn_scale'] + params['map_bn_shift']
    red = _conv_ref(maps, params['w_red'])
    pool = jnp.mean(x, axis=(1, 2), keepdims=True)
    pg = _conv_ref(pool, params['w_gp'])
    pg = pg * params['gp_bn_scale'] + params['gp_bn_shift']
    pr = _conv_ref(pg, params['w_pool_red'])
    out = red + pr
    out = out * params['red_bn_scale'] + params['red_bn_shift']
    return jnp.transpose(out, (0, 3, 1, 2))


# ----------------------------------- main ------------------------------------

if __name__ == "__main__":
    key = jax.random.PRNGKey(0)
    k_x, k_p = jax.random.split(key)

    N, C_in, H, W = 2, 4, 16, 16
    hidden, out_channels = 32, 8

    x = jax.random.normal(k_x, (N, C_in, H, W), dtype=jnp.float32)
    params = init_deeplab_head_params(k_p, C_in, out_channels,
                                      hidden_channels=hidden, out_stride=16)

    ref = jax.block_until_ready(deeplab_head_reference(params, x))

    # f32, fused-reduction path (the auto-selected path at these sizes).
    out_f = jax.block_until_ready(
        deeplab_head_forward(params, x, tile_h=8, fuse_reduction=True))
    assert out_f.shape == (N, out_channels, H, W)
    err_f = float(jnp.max(jnp.abs(out_f - ref)))
    if not err_f < 2e-3:
        raise AssertionError(f"fused f32 Pallas kernel mismatch, max|diff|={err_f}")

    # f32, two-stage (unfused) path — kept for configs where OUT >> hidden.
    out_u = jax.block_until_ready(
        deeplab_head_forward(params, x, tile_h=8, fuse_reduction=False))
    err_u = float(jnp.max(jnp.abs(out_u - ref)))
    if not err_u < 2e-3:
        raise AssertionError(f"unfused f32 Pallas kernel mismatch, max|diff|={err_u}")

    # bf16 compute path (MXU-rate dtype on v6e/v7x; f32 accumulation), auto-select.
    out_bf16 = jax.block_until_ready(
        deeplab_head_forward(params, x, tile_h=8, compute_dtype=jnp.bfloat16))
    err_b = float(jnp.max(jnp.abs(out_bf16 - ref)))
    if not err_b < 1e-1:
        raise AssertionError(f"bf16 Pallas kernel mismatch, max|diff|={err_b}")

    print("KERNEL_OK")
</pallas_src>

<mosaic_0001>
module attributes {stable_mosaic.version = 11 : i64} {
  func.func @kernel(%arg0: i32, %arg1: i32, %arg2: memref<1x52x52x4xf32, #tpu.memory_space<vmem>>, %arg3: memref<28x4x128xf32, #tpu.memory_space<vmem>>, %arg4: memref<1x1x128xf32, #tpu.memory_space<vmem>>, %arg5: memref<1x8x16x128xf32, #tpu.memory_space<vmem>>) attributes {dimension_semantics = [#tpu.dimension_semantics<parallel>, #tpu.dimension_semantics<parallel>], iteration_bounds = array<i64: 2, 2>, scalar_prefetch = 0 : i64, scratch_operands = 0 : i64, tpu.core_type = #tpu.core_type<tc>, window_params = [{transform_indices = @transform_0, window_bounds = array<i64: 1, 52, 52, 4>}, {pipeline_mode = #tpu.pipeline_mode<synchronous>, transform_indices = @transform_1, window_bounds = array<i64: 28, 4, 128>}, {transform_indices = @transform_2, window_bounds = array<i64: 1, 1, 128>}, {transform_indices = @transform_3, window_bounds = array<i64: 1, 8, 16, 128>}]} {
    %c8_i32 = arith.constant 8 : i32
    %0 = arith.muli %arg1, %c8_i32 : i32
    %1 = tpu.assume_multiple %0, 8 : i32
    %c18_i32 = arith.constant 18 : i32
    %2 = arith.addi %c18_i32, %1 : i32
    %c0_i32 = arith.constant 0 : i32
    %3 = arith.addi %2, %c0_i32 : i32
    %c0 = arith.constant 0 : index
    %4 = arith.index_cast %3 : i32 to index
    %c18 = arith.constant 18 : index
    %c0_0 = arith.constant 0 : index
    %5 = vector.load %arg2[%c0, %4, %c18, %c0_0] : memref<1x52x52x4xf32, #tpu.memory_space<vmem>>, vector<1x8x16x4xf32>
    %6 = vector.shape_cast %5 : vector<1x8x16x4xf32> to vector<8x16x4xf32>
    %7 = vector.shape_cast %6 : vector<8x16x4xf32> to vector<128x4xf32>
    %c0_1 = arith.constant 0 : index
    %c0_2 = arith.constant 0 : index
    %c0_3 = arith.constant 0 : index
    %8 = vector.load %arg3[%c0_1, %c0_2, %c0_3] : memref<28x4x128xf32, #tpu.memory_space<vmem>>, vector<1x4x128xf32>
    %9 = vector.shape_cast %8 : vector<1x4x128xf32> to vector<4x128xf32>
    %cst = arith.constant dense<0.000000e+00> : vector<128x128xf32>
    %10 = tpu.matmul %7, %9, %cst {dimension_numbers = #tpu.dot_dimension_numbers<[1], [0], [0], [1], [0, 0, 1, 1], [], []>} : vector<128x4xf32>, vector<4x128xf32>, vector<128x128xf32> -> vector<128x128xf32>
    %c18_i32_4 = arith.constant 18 : i32
    %11 = arith.addi %c18_i32_4, %1 : i32
    %c-6_i32 = arith.constant -6 : i32
    %12 = arith.addi %11, %c-6_i32 : i32
    %c0_5 = arith.constant 0 : index
    %13 = arith.index_cast %12 : i32 to index
    %c12 = arith.constant 12 : index
    %c0_6 = arith.constant 0 : index
    %14 = vector.load %arg2[%c0_5, %13, %c12, %c0_6] : memref<1x52x52x4xf32, #tpu.memory_space<vmem>>, vector<1x8x16x4xf32>
    %15 = vector.shape_cast %14 : vector<1x8x16x4xf32> to vector<8x16x4xf32>
    %16 = vector.shape_cast %15 : vector<8x16x4xf32> to vector<128x4xf32>
    %c1 = arith.constant 1 : index
    %c0_7 = arith.constant 0 : index
    %c0_8 = arith.constant 0 : index
    %17 = vector.load %arg3[%c1, %c0_7, %c0_8] : memref<28x4x128xf32, #tpu.memory_space<vmem>>, vector<1x4x128xf32>
    %18 = vector.shape_cast %17 : vector<1x4x128xf32> to vector<4x128xf32>
    %cst_9 = arith.constant dense<0.000000e+00> : vector<128x128xf32>
    %19 = tpu.matmul %16, %18, %cst_9 {dimension_numbers = #tpu.dot_dimension_numbers<[1], [0], [0], [1], [0, 0, 1, 1], [], []>} : vector<128x4xf32>, vector<4x128xf32>, vector<128x128xf32> -> vector<128x128xf32>
    %20 = arith.addf %10, %19 : vector<128x128xf32>
    %c18_i32_10 = arith.constant 18 : i32
    %21 = arith.addi %c18_i32_10, %1 : i32
    %c-6_i32_11 = arith.constant -6 : i32
    %22 = arith.addi %21, %c-6_i32_11 : i32
    %c0_12 = arith.constant 0 : index
    %23 = arith.index_cast %22 : i32 to index
    %c18_13 = arith.constant 18 : index
    %c0_14 = arith.constant 0 : index
    %24 = vector.load %arg2[%c0_12, %23, %c18_13, %c0_14] : memref<1x52x52x4xf32, #tpu.memory_space<vmem>>, vector<1x8x16x4xf32>
    %25 = vector.shape_cast %24 : vector<1x8x16x4xf32> to vector<8x16x4xf32>
    %26 = vector.shape_cast %25 : vector<8x16x4xf32> to vector<128x4xf32>
    %c2 = arith.constant 2 : index
    %c0_15 = arith.constant 0 : index
    %c0_16 = arith.constant 0 : index
    %27 = vector.load %arg3[%c2, %c0_15, %c0_16] : memref<28x4x128xf32, #tpu.memory_space<vmem>>, vector<1x4x128xf32>
    %28 = vector.shape_cast %27 : vector<1x4x128xf32> to vector<4x128xf32>
    %cst_17 = arith.constant dense<0.000000e+00> : vector<128x128xf32>
    %29 = tpu.matmul %26, %28, %cst_17 {dimension_numbers = #tpu.dot_dimension_numbers<[1], [0], [0], [1], [0, 0, 1, 1], [], []>} : vector<128x4xf32>, vector<4x128xf32>, vector<128x128xf32> -> vector<128x128xf32>
    %30 = arith.addf %20, %29 : vector<128x128xf32>
    %c18_i32_18 = arith.constant 18 : i32
    %31 = arith.addi %c18_i32_18, %1 : i32
    %c-6_i32_19 = arith.constant -6 : i32
    %32 = arith.addi %31, %c-6_i32_19 : i32
    %c0_20 = arith.constant 0 : index
    %33 = arith.index_cast %32 : i32 to index
    %c24 = arith.constant 24 : index
    %c0_21 = arith.constant 0 : index
    %34 = vector.load %arg2[%c0_20, %33, %c24, %c0_21] : memref<1x52x52x4xf32, #tpu.memory_space<vmem>>, vector<1x8x16x4xf32>
    %35 = vector.shape_cast %34 : vector<1x8x16x4xf32> to vector<8x16x4xf32>
    %36 = vector.shape_cast %35 : vector<8x16x4xf32> to vector<128x4xf32>
    %c3 = arith.constant 3 : index
    %c0_22 = arith.constant 0 : index
    %c0_23 = arith.constant 0 : index
    %37 = vector.load %arg3[%c3, %c0_22, %c0_23] : memref<28x4x128xf32, #tpu.memory_space<vmem>>, vector<1x4x128xf32>
    %38 = vector.shape_cast %37 : vector<1x4x128xf32> to vector<4x128xf32>
    %cst_24 = arith.constant dense<0.000000e+00> : vector<128x128xf32>
    %39 = tpu.matmul %36, %38, %cst_24 {dimension_numbers = #tpu.dot_dimension_numbers<[1], [0], [0], [1], [0, 0, 1, 1], [], []>} : vector<128x4xf32>, vector<4x128xf32>, vector<128x128xf32> -> vector<128x128xf32>
    %40 = arith.addf %30, %39 : vector<128x128xf32>
    %c18_i32_25 = arith.constant 18 : i32
    %41 = arith.addi %c18_i32_25, %1 : i32
    %c0_i32_26 = arith.constant 0 : i32
    %42 = arith.addi %41, %c0_i32_26 : i32
    %c0_27 = arith.constant 0 : index
    %43 = arith.index_cast %42 : i32 to index
    %c12_28 = arith.constant 12 : index
    %c0_29 = arith.constant 0 : index
    %44 = vector.load %arg2[%c0_27, %43, %c12_28, %c0_29] : memref<1x52x52x4xf32, #tpu.memory_space<vmem>>, vector<1x8x16x4xf32>
    %45 = vector.shape_cast %44 : vector<1x8x16x4xf32> to vector<8x16x4xf32>
    %46 = vector.shape_cast %45 : vector<8x16x4xf32> to vector<128x4xf32>
    %c4 = arith.constant 4 : index
    %c0_30 = arith.constant 0 : index
    %c0_31 = arith.constant 0 : index
    %47 = vector.load %arg3[%c4, %c0_30, %c0_31] : memref<28x4x128xf32, #tpu.memory_space<vmem>>, vector<1x4x128xf32>
    %48 = vector.shape_cast %47 : vector<1x4x128xf32> to vector<4x128xf32>
    %cst_32 = arith.constant dense<0.000000e+00> : vector<128x128xf32>
    %49 = tpu.matmul %46, %48, %cst_32 {dimension_numbers = #tpu.dot_dimension_numbers<[1], [0], [0], [1], [0, 0, 1, 1], [], []>} : vector<128x4xf32>, vector<4x128xf32>, vector<128x128xf32> -> vector<128x128xf32>
    %50 = arith.addf %40, %49 : vector<128x128xf32>
    %c18_i32_33 = arith.constant 18 : i32
    %51 = arith.addi %c18_i32_33, %1 : i32
    %c0_i32_34 = arith.constant 0 : i32
    %52 = arith.addi %51, %c0_i32_34 : i32
    %c0_35 = arith.constant 0 : index
    %53 = arith.index_cast %52 : i32 to index
    %c18_36 = arith.constant 18 : index
    %c0_37 = arith.constant 0 : index
    %54 = vector.load %arg2[%c0_35, %53, %c18_36, %c0_37] : memref<1x52x52x4xf32, #tpu.memory_space<vmem>>, vector<1x8x16x4xf32>
    %55 = vector.shape_cast %54 : vector<1x8x16x4xf32> to vector<8x16x4xf32>
    %56 = vector.shape_cast %55 : vector<8x16x4xf32> to vector<128x4xf32>
    %c5 = arith.constant 5 : index
    %c0_38 = arith.constant 0 : index
    %c0_39 = arith.constant 0 : index
    %57 = vector.load %arg3[%c5, %c0_38, %c0_39] : memref<28x4x128xf32, #tpu.memory_space<vmem>>, vector<1x4x128xf32>
    %58 = vector.shape_cast %57 : vector<1x4x128xf32> to vector<4x128xf32>
    %cst_40 = arith.constant dense<0.000000e+00> : vector<128x128xf32>
    %59 = tpu.matmul %56, %58, %cst_40 {dimension_numbers = #tpu.dot_dimension_numbers<[1], [0], [0], [1], [0, 0, 1, 1], [], []>} : vector<128x4xf32>, vector<4x128xf32>, vector<128x128xf32> -> vector<128x128xf32>
    %60 = arith.addf %50, %59 : vector<128x128xf32>
    %c18_i32_41 = arith.constant 18 : i32
    %61 = arith.addi %c18_i32_41, %1 : i32
    %c0_i32_42 = arith.constant 0 : i32
    %62 = arith.addi %61, %c0_i32_42 : i32
    %c0_43 = arith.constant 0 : index
    %63 = arith.index_cast %62 : i32 to index
    %c24_44 = arith.constant 24 : index
    %c0_45 = arith.constant 0 : index
    %64 = vector.load %arg2[%c0_43, %63, %c24_44, %c0_45] : memref<1x52x52x4xf32, #tpu.memory_space<vmem>>, vector<1x8x16x4xf32>
    %65 = vector.shape_cast %64 : vector<1x8x16x4xf32> to vector<8x16x4xf32>
    %66 = vector.shape_cast %65 : vector<8x16x4xf32> to vector<128x4xf32>
    %c6 = arith.constant 6 : index
    %c0_46 = arith.constant 0 : index
    %c0_47 = arith.constant 0 : index
    %67 = vector.load %arg3[%c6, %c0_46, %c0_47] : memref<28x4x128xf32, #tpu.memory_space<vmem>>, vector<1x4x128xf32>
    %68 = vector.shape_cast %67 : vector<1x4x128xf32> to vector<4x128xf32>
    %cst_48 = arith.constant dense<0.000000e+00> : vector<128x128xf32>
    %69 = tpu.matmul %66, %68, %cst_48 {dimension_numbers = #tpu.dot_dimension_numbers<[1], [0], [0], [1], [0, 0, 1, 1], [], []>} : vector<128x4xf32>, vector<4x128xf32>, vector<128x128xf32> -> vector<128x128xf32>
    %70 = arith.addf %60, %69 : vector<128x128xf32>
    %c18_i32_49 = arith.constant 18 : i32
    %71 = arith.addi %c18_i32_49, %1 : i32
    %c6_i32 = arith.constant 6 : i32
    %72 = arith.addi %71, %c6_i32 : i32
    %c0_50 = arith.constant 0 : index
    %73 = arith.index_cast %72 : i32 to index
    %c12_51 = arith.constant 12 : index
    %c0_52 = arith.constant 0 : index
    %74 = vector.load %arg2[%c0_50, %73, %c12_51, %c0_52] : memref<1x52x52x4xf32, #tpu.memory_space<vmem>>, vector<1x8x16x4xf32>
    %75 = vector.shape_cast %74 : vector<1x8x16x4xf32> to vector<8x16x4xf32>
    %76 = vector.shape_cast %75 : vector<8x16x4xf32> to vector<128x4xf32>
    %c7 = arith.constant 7 : index
    %c0_53 = arith.constant 0 : index
    %c0_54 = arith.constant 0 : index
    %77 = vector.load %arg3[%c7, %c0_53, %c0_54] : memref<28x4x128xf32, #tpu.memory_space<vmem>>, vector<1x4x128xf32>
    %78 = vector.shape_cast %77 : vector<1x4x128xf32> to vector<4x128xf32>
    %cst_55 = arith.constant dense<0.000000e+00> : vector<128x128xf32>
    %79 = tpu.matmul %76, %78, %cst_55 {dimension_numbers = #tpu.dot_dimension_numbers<[1], [0], [0], [1], [0, 0, 1, 1], [], []>} : vector<128x4xf32>, vector<4x128xf32>, vector<128x128xf32> -> vector<128x128xf32>
    %80 = arith.addf %70, %79 : vector<128x128xf32>
    %c18_i32_56 = arith.constant 18 : i32
    %81 = arith.addi %c18_i32_56, %1 : i32
    %c6_i32_57 = arith.constant 6 : i32
    %82 = arith.addi %81, %c6_i32_57 : i32
    %c0_58 = arith.constant 0 : index
    %83 = arith.index_cast %82 : i32 to index
    %c18_59 = arith.constant 18 : index
    %c0_60 = arith.constant 0 : index
    %84 = vector.load %arg2[%c0_58, %83, %c18_59, %c0_60] : memref<1x52x52x4xf32, #tpu.memory_space<vmem>>, vector<1x8x16x4xf32>
    %85 = vector.shape_cast %84 : vector<1x8x16x4xf32> to vector<8x16x4xf32>
    %86 = vector.shape_cast %85 : vector<8x16x4xf32> to vector<128x4xf32>
    %c8 = arith.constant 8 : index
    %c0_61 = arith.constant 0 : index
    %c0_62 = arith.constant 0 : index
    %87 = vector.load %arg3[%c8, %c0_61, %c0_62] : memref<28x4x128xf32, #tpu.memory_space<vmem>>, vector<1x4x128xf32>
    %88 = vector.shape_cast %87 : vector<1x4x128xf32> to vector<4x128xf32>
    %cst_63 = arith.constant dense<0.000000e+00> : vector<128x128xf32>
    %89 = tpu.matmul %86, %88, %cst_63 {dimension_numbers = #tpu.dot_dimension_numbers<[1], [0], [0], [1], [0, 0, 1, 1], [], []>} : vector<128x4xf32>, vector<4x128xf32>, vector<128x128xf32> -> vector<128x128xf32>
    %90 = arith.addf %80, %89 : vector<128x128xf32>
    %c18_i32_64 = arith.constant 18 : i32
    %91 = arith.addi %c18_i32_64, %1 : i32
    %c6_i32_65 = arith.constant 6 : i32
    %92 = arith.addi %91, %c6_i32_65 : i32
    %c0_66 = arith.constant 0 : index
    %93 = arith.index_cast %92 : i32 to index
    %c24_67 = arith.constant 24 : index
    %c0_68 = arith.constant 0 : index
    %94 = vector.load %arg2[%c0_66, %93, %c24_67, %c0_68] : memref<1x52x52x4xf32, #tpu.memory_space<vmem>>, vector<1x8x16x4xf32>
    %95 = vector.shape_cast %94 : vector<1x8x16x4xf32> to vector<8x16x4xf32>
    %96 = vector.shape_cast %95 : vector<8x16x4xf32> to vector<128x4xf32>
    %c9 = arith.constant 9 : index
    %c0_69 = arith.constant 0 : index
    %c0_70 = arith.constant 0 : index
    %97 = vector.load %arg3[%c9, %c0_69, %c0_70] : memref<28x4x128xf32, #tpu.memory_space<vmem>>, vector<1x4x128xf32>
    %98 = vector.shape_cast %97 : vector<1x4x128xf32> to vector<4x128xf32>
    %cst_71 = arith.constant dense<0.000000e+00> : vector<128x128xf32>
    %99 = tpu.matmul %96, %98, %cst_71 {dimension_numbers = #tpu.dot_dimension_numbers<[1], [0], [0], [1], [0, 0, 1, 1], [], []>} : vector<128x4xf32>, vector<4x128xf32>, vector<128x128xf32> -> vector<128x128xf32>
    %100 = arith.addf %90, %99 : vector<128x128xf32>
    %c18_i32_72 = arith.constant 18 : i32
    %101 = arith.addi %c18_i32_72, %1 : i32
    %c-12_i32 = arith.constant -12 : i32
    %102 = arith.addi %101, %c-12_i32 : i32
    %c0_73 = arith.constant 0 : index
    %103 = arith.index_cast %102 : i32 to index
    %c6_74 = arith.constant 6 : index
    %c0_75 = arith.constant 0 : index
    %104 = vector.load %arg2[%c0_73, %103, %c6_74, %c0_75] : memref<1x52x52x4xf32, #tpu.memory_space<vmem>>, vector<1x8x16x4xf32>
    %105 = vector.shape_cast %104 : vector<1x8x16x4xf32> to vector<8x16x4xf32>
    %106 = vector.shape_cast %105 : vector<8x16x4xf32> to vector<128x4xf32>
    %c10 = arith.constant 10 : index
    %c0_76 = arith.constant 0 : index
    %c0_77 = arith.constant 0 : index
    %107 = vector.load %arg3[%c10, %c0_76, %c0_77] : memref<28x4x128xf32, #tpu.memory_space<vmem>>, vector<1x4x128xf32>
    %108 = vector.shape_cast %107 : vector<1x4x128xf32> to vector<4x128xf32>
    %cst_78 = arith.constant dense<0.000000e+00> : vector<128x128xf32>
    %109 = tpu.matmul %106, %108, %cst_78 {dimension_numbers = #tpu.dot_dimension_numbers<[1], [0], [0], [1], [0, 0, 1, 1], [], []>} : vector<128x4xf32>, vector<4x128xf32>, vector<128x128xf32> -> vector<128x128xf32>
    %110 = arith.addf %100, %109 : vector<128x128xf32>
    %c18_i32_79 = arith.constant 18 : i32
    %111 = arith.addi %c18_i32_79, %1 : i32
    %c-12_i32_80 = arith.constant -12 : i32
    %112 = arith.addi %111, %c-12_i32_80 : i32
    %c0_81 = arith.constant 0 : index
    %113 = arith.index_cast %112 : i32 to index
    %c18_82 = arith.constant 18 : index
    %c0_83 = arith.constant 0 : index
    %114 = vector.load %arg2[%c0_81, %113, %c18_82, %c0_83] : memref<1x52x52x4xf32, #tpu.memory_space<vmem>>, vector<1x8x16x4xf32>
    %115 = vector.shape_cast %114 : vector<1x8x16x4xf32> to vector<8x16x4xf32>
    %116 = vector.shape_cast %115 : vector<8x16x4xf32> to vector<128x4xf32>
    %c11 = arith.constant 11 : index
    %c0_84 = arith.constant 0 : index
    %c0_85 = arith.constant 0 : index
    %117 = vector.load %arg3[%c11, %c0_84, %c0_85] : memref<28x4x128xf32, #tpu.memory_space<vmem>>, vector<1x4x128xf32>
    %118 = vector.shape_cast %117 : vector<1x4x128xf32> to vector<4x128xf32>
    %cst_86 = arith.constant dense<0.000000e+00> : vector<128x128xf32>
    %119 = tpu.matmul %116, %118, %cst_86 {dimension_numbers = #tpu.dot_dimension_numbers<[1], [0], [0], [1], [0, 0, 1, 1], [], []>} : vector<128x4xf32>, vector<4x128xf32>, vector<128x128xf32> -> vector<128x128xf32>
    %120 = arith.addf %110, %119 : vector<128x128xf32>
    %c18_i32_87 = arith.constant 18 : i32
    %121 = arith.addi %c18_i32_87, %1 : i32
    %c-12_i32_88 = arith.constant -12 : i32
    %122 = arith.addi %121, %c-12_i32_88 : i32
    %c0_89 = arith.constant 0 : index
    %123 = arith.index_cast %122 : i32 to index
    %c30 = arith.constant 30 : index
    %c0_90 = arith.constant 0 : index
    %124 = vector.load %arg2[%c0_89, %123, %c30, %c0_90] : memref<1x52x52x4xf32, #tpu.memory_space<vmem>>, vector<1x8x16x4xf32>
    %125 = vector.shape_cast %124 : vector<1x8x16x4xf32> to vector<8x16x4xf32>
    %126 = vector.shape_cast %125 : vector<8x16x4xf32> to vector<128x4xf32>
    %c12_91 = arith.constant 12 : index
    %c0_92 = arith.constant 0 : index
    %c0_93 = arith.constant 0 : index
    %127 = vector.load %arg3[%c12_91, %c0_92, %c0_93] : memref<28x4x128xf32, #tpu.memory_space<vmem>>, vector<1x4x128xf32>
    %128 = vector.shape_cast %127 : vector<1x4x128xf32> to vector<4x128xf32>
    %cst_94 = arith.constant dense<0.000000e+00> : vector<128x128xf32>
    %129 = tpu.matmul %126, %128, %cst_94 {dimension_numbers = #tpu.dot_dimension_numbers<[1], [0], [0], [1], [0, 0, 1, 1], [], []>} : vector<128x4xf32>, vector<4x128xf32>, vector<128x128xf32> -> vector<128x128xf32>
    %130 = arith.addf %120, %129 : vector<128x128xf32>
    %c18_i32_95 = arith.constant 18 : i32
    %131 = arith.addi %c18_i32_95, %1 : i32
    %c0_i32_96 = arith.constant 0 : i32
    %132 = arith.addi %131, %c0_i32_96 : i32
    %c0_97 = arith.constant 0 : index
    %133 = arith.index_cast %132 : i32 to index
    %c6_98 = arith.constant 6 : index
    %c0_99 = arith.constant 0 : index
    %134 = vector.load %arg2[%c0_97, %133, %c6_98, %c0_99] : memref<1x52x52x4xf32, #tpu.memory_space<vmem>>, vector<1x8x16x4xf32>
    %135 = vector.shape_cast %134 : vector<1x8x16x4xf32> to vector<8x16x4xf32>
    %136 = vector.shape_cast %135 : vector<8x16x4xf32> to vector<128x4xf32>
    %c13 = arith.constant 13 : index
    %c0_100 = arith.constant 0 : index
    %c0_101 = arith.constant 0 : index
    %137 = vector.load %arg3[%c13, %c0_100, %c0_101] : memref<28x4x128xf32, #tpu.memory_space<vmem>>, vector<1x4x128xf32>
    %138 = vector.shape_cast %137 : vector<1x4x128xf32> to vector<4x128xf32>
    %cst_102 = arith.constant dense<0.000000e+00> : vector<128x128xf32>
    %139 = tpu.matmul %136, %138, %cst_102 {dimension_numbers = #tpu.dot_dimension_numbers<[1], [0], [0], [1], [0, 0, 1, 1], [], []>} : vector<128x4xf32>, vector<4x128xf32>, vector<128x128xf32> -> vector<128x128xf32>
    %140 = arith.addf %130, %139 : vector<128x128xf32>
    %c18_i32_103 = arith.constant 18 : i32
    %141 = arith.addi %c18_i32_103, %1 : i32
    %c0_i32_104 = arith.constant 0 : i32
    %142 = arith.addi %141, %c0_i32_104 : i32
    %c0_105 = arith.constant 0 : index
    %143 = arith.index_cast %142 : i32 to index
    %c18_106 = arith.constant 18 : index
    %c0_107 = arith.constant 0 : index
    %144 = vector.load %arg2[%c0_105, %143, %c18_106, %c0_107] : memref<1x52x52x4xf32, #tpu.memory_space<vmem>>, vector<1x8x16x4xf32>
    %145 = vector.shape_cast %144 : vector<1x8x16x4xf32> to vector<8x16x4xf32>
    %146 = vector.shape_cast %145 : vector<8x16x4xf32> to vector<128x4xf32>
    %c14 = arith.constant 14 : index
    %c0_108 = arith.constant 0 : index
    %c0_109 = arith.constant 0 : index
    %147 = vector.load %arg3[%c14, %c0_108, %c0_109] : memref<28x4x128xf32, #tpu.memory_space<vmem>>, vector<1x4x128xf32>
    %148 = vector.shape_cast %147 : vector<1x4x128xf32> to vector<4x128xf32>
    %cst_110 = arith.constant dense<0.000000e+00> : vector<128x128xf32>
    %149 = tpu.matmul %146, %148, %cst_110 {dimension_numbers = #tpu.dot_dimension_numbers<[1], [0], [0], [1], [0, 0, 1, 1], [], []>} : vector<128x4xf32>, vector<4x128xf32>, vector<128x128xf32> -> vector<128x128xf32>
    %150 = arith.addf %140, %149 : vector<128x128xf32>
    %c18_i32_111 = arith.constant 18 : i32
    %151 = arith.addi %c18_i32_111, %1 : i32
    %c0_i32_112 = arith.constant 0 : i32
    %152 = arith.addi %151, %c0_i32_112 : i32
    %c0_113 = arith.constant 0 : index
    %153 = arith.index_cast %152 : i32 to index
    %c30_114 = arith.constant 30 : index
    %c0_115 = arith.constant 0 : index
    %154 = vector.load %arg2[%c0_113, %153, %c30_114, %c0_115] : memref<1x52x52x4xf32, #tpu.memory_space<vmem>>, vector<1x8x16x4xf32>
    %155 = vector.shape_cast %154 : vector<1x8x16x4xf32> to vector<8x16x4xf32>
    %156 = vector.shape_cast %155 : vector<8x16x4xf32> to vector<128x4xf32>
    %c15 = arith.constant 15 : index
    %c0_116 = arith.constant 0 : index
    %c0_117 = arith.constant 0 : index
    %157 = vector.load %arg3[%c15, %c0_116, %c0_117] : memref<28x4x128xf32, #tpu.memory_space<vmem>>, vector<1x4x128xf32>
    %158 = vector.shape_cast %157 : vector<1x4x128xf32> to vector<4x128xf32>
    %cst_118 = arith.constant dense<0.000000e+00> : vector<128x128xf32>
    %159 = tpu.matmul %156, %158, %cst_118 {dimension_numbers = #tpu.dot_dimension_numbers<[1], [0], [0], [1], [0, 0, 1, 1], [], []>} : vector<128x4xf32>, vector<4x128xf32>, vector<128x128xf32> -> vector<128x128xf32>
    %160 = arith.addf %150, %159 : vector<128x128xf32>
    %c18_i32_119 = arith.constant 18 : i32
    %161 = arith.addi %c18_i32_119, %1 : i32
    %c12_i32 = arith.constant 12 : i32
    %162 = arith.addi %161, %c12_i32 : i32
    %c0_120 = arith.constant 0 : index
    %163 = arith.index_cast %162 : i32 to index
    %c6_121 = arith.constant 6 : index
    %c0_122 = arith.constant 0 : index
    %164 = vector.load %arg2[%c0_120, %163, %c6_121, %c0_122] : memref<1x52x52x4xf32, #tpu.memory_space<vmem>>, vector<1x8x16x4xf32>
    %165 = vector.shape_cast %164 : vector<1x8x16x4xf32> to vector<8x16x4xf32>
    %166 = vector.shape_cast %165 : vector<8x16x4xf32> to vector<128x4xf32>
    %c16 = arith.constant 16 : index
    %c0_123 = arith.constant 0 : index
    %c0_124 = arith.constant 0 : index
    %167 = vector.load %arg3[%c16, %c0_123, %c0_124] : memref<28x4x128xf32, #tpu.memory_space<vmem>>, vector<1x4x128xf32>
    %168 = vector.shape_cast %167 : vector<1x4x128xf32> to vector<4x128xf32>
    %cst_125 = arith.constant dense<0.000000e+00> : vector<128x128xf32>
    %169 = tpu.matmul %166, %168, %cst_125 {dimension_numbers = #tpu.dot_dimension_numbers<[1], [0], [0], [1], [0, 0, 1, 1], [], []>} : vector<128x4xf32>, vector<4x128xf32>, vector<128x128xf32> -> vector<128x128xf32>
    %170 = arith.addf %160, %169 : vector<128x128xf32>
    %c18_i32_126 = arith.constant 18 : i32
    %171 = arith.addi %c18_i32_126, %1 : i32
    %c12_i32_127 = arith.constant 12 : i32
    %172 = arith.addi %171, %c12_i32_127 : i32
    %c0_128 = arith.constant 0 : index
    %173 = arith.index_cast %172 : i32 to index
    %c18_129 = arith.constant 18 : index
    %c0_130 = arith.constant 0 : index
    %174 = vector.load %arg2[%c0_128, %173, %c18_129, %c0_130] : memref<1x52x52x4xf32, #tpu.memory_space<vmem>>, vector<1x8x16x4xf32>
    %175 = vector.shape_cast %174 : vector<1x8x16x4xf32> to vector<8x16x4xf32>
    %176 = vector.shape_cast %175 : vector<8x16x4xf32> to vector<128x4xf32>
    %c17 = arith.constant 17 : index
    %c0_131 = arith.constant 0 : index
    %c0_132 = arith.constant 0 : index
    %177 = vector.load %arg3[%c17, %c0_131, %c0_132] : memref<28x4x128xf32, #tpu.memory_space<vmem>>, vector<1x4x128xf32>
    %178 = vector.shape_cast %177 : vector<1x4x128xf32> to vector<4x128xf32>
    %cst_133 = arith.constant dense<0.000000e+00> : vector<128x128xf32>
    %179 = tpu.matmul %176, %178, %cst_133 {dimension_numbers = #tpu.dot_dimension_numbers<[1], [0], [0], [1], [0, 0, 1, 1], [], []>} : vector<128x4xf32>, vector<4x128xf32>, vector<128x128xf32> -> vector<128x128xf32>
    %180 = arith.addf %170, %179 : vector<128x128xf32>
    %c18_i32_134 = arith.constant 18 : i32
    %181 = arith.addi %c18_i32_134, %1 : i32
    %c12_i32_135 = arith.constant 12 : i32
    %182 = arith.addi %181, %c12_i32_135 : i32
    %c0_136 = arith.constant 0 : index
    %183 = arith.index_cast %182 : i32 to index
    %c30_137 = arith.constant 30 : index
    %c0_138 = arith.constant 0 : index
    %184 = vector.load %arg2[%c0_136, %183, %c30_137, %c0_138] : memref<1x52x52x4xf32, #tpu.memory_space<vmem>>, vector<1x8x16x4xf32>
    %185 = vector.shape_cast %184 : vector<1x8x16x4xf32> to vector<8x16x4xf32>
    %186 = vector.shape_cast %185 : vector<8x16x4xf32> to vector<128x4xf32>
    %c18_139 = arith.constant 18 : index
    %c0_140 = arith.constant 0 : index
    %c0_141 = arith.constant 0 : index
    %187 = vector.load %arg3[%c18_139, %c0_140, %c0_141] : memref<28x4x128xf32, #tpu.memory_space<vmem>>, vector<1x4x128xf32>
    %188 = vector.shape_cast %187 : vector<1x4x128xf32> to vector<4x128xf32>
    %cst_142 = arith.constant dense<0.000000e+00> : vector<128x128xf32>
    %189 = tpu.matmul %186, %188, %cst_142 {dimension_numbers = #tpu.dot_dimension_numbers<[1], [0], [0], [1], [0, 0, 1, 1], [], []>} : vector<128x4xf32>, vector<4x128xf32>, vector<128x128xf32> -> vector<128x128xf32>
    %190 = arith.addf %180, %189 : vector<128x128xf32>
    %c18_i32_143 = arith.constant 18 : i32
    %191 = arith.addi %c18_i32_143, %1 : i32
    %c-18_i32 = arith.constant -18 : i32
    %192 = arith.addi %191, %c-18_i32 : i32
    %c0_144 = arith.constant 0 : index
    %193 = arith.index_cast %192 : i32 to index
    %c0_145 = arith.constant 0 : index
    %c0_146 = arith.constant 0 : index
    %194 = vector.load %arg2[%c0_144, %193, %c0_145, %c0_146] : memref<1x52x52x4xf32, #tpu.memory_space<vmem>>, vector<1x8x16x4xf32>
    %195 = vector.shape_cast %194 : vector<1x8x16x4xf32> to vector<8x16x4xf32>
    %196 = vector.shape_cast %195 : vector<8x16x4xf32> to vector<128x4xf32>
    %c19 = arith.constant 19 : index
    %c0_147 = arith.constant 0 : index
    %c0_148 = arith.constant 0 : index
    %197 = vector.load %arg3[%c19, %c0_147, %c0_148] : memref<28x4x128xf32, #tpu.memory_space<vmem>>, vector<1x4x128xf32>
    %198 = vector.shape_cast %197 : vector<1x4x128xf32> to vector<4x128xf32>
    %cst_149 = arith.constant dense<0.000000e+00> : vector<128x128xf32>
    %199 = tpu.matmul %196, %198, %cst_149 {dimension_numbers = #tpu.dot_dimension_numbers<[1], [0], [0], [1], [0, 0, 1, 1], [], []>} : vector<128x4xf32>, vector<4x128xf32>, vector<128x128xf32> -> vector<128x128xf32>
    %200 = arith.addf %190, %199 : vector<128x128xf32>
    %c18_i32_150 = arith.constant 18 : i32
    %201 = arith.addi %c18_i32_150, %1 : i32
    %c-18_i32_151 = arith.constant -18 : i32
    %202 = arith.addi %201, %c-18_i32_151 : i32
    %c0_152 = arith.constant 0 : index
    %203 = arith.index_cast %202 : i32 to index
    %c18_153 = arith.constant 18 : index
    %c0_154 = arith.constant 0 : index
    %204 = vector.load %arg2[%c0_152, %203, %c18_153, %c0_154] : memref<1x52x52x4xf32, #tpu.memory_space<vmem>>, vector<1x8x16x4xf32>
    %205 = vector.shape_cast %204 : vector<1x8x16x4xf32> to vector<8x16x4xf32>
    %206 = vector.shape_cast %205 : vector<8x16x4xf32> to vector<128x4xf32>
    %c20 = arith.constant 20 : index
    %c0_155 = arith.constant 0 : index
    %c0_156 = arith.constant 0 : index
    %207 = vector.load %arg3[%c20, %c0_155, %c0_156] : memref<28x4x128xf32, #tpu.memory_space<vmem>>, vector<1x4x128xf32>
    %208 = vector.shape_cast %207 : vector<1x4x128xf32> to vector<4x128xf32>
    %cst_157 = arith.constant dense<0.000000e+00> : vector<128x128xf32>
    %209 = tpu.matmul %206, %208, %cst_157 {dimension_numbers = #tpu.dot_dimension_numbers<[1], [0], [0], [1], [0, 0, 1, 1], [], []>} : vector<128x4xf32>, vector<4x128xf32>, vector<128x128xf32> -> vector<128x128xf32>
    %210 = arith.addf %200, %209 : vector<128x128xf32>
    %c18_i32_158 = arith.constant 18 : i32
    %211 = arith.addi %c18_i32_158, %1 : i32
    %c-18_i32_159 = arith.constant -18 : i32
    %212 = arith.addi %211, %c-18_i32_159 : i32
    %c0_160 = arith.constant 0 : index
    %213 = arith.index_cast %212 : i32 to index
    %c36 = arith.constant 36 : index
    %c0_161 = arith.constant 0 : index
    %214 = vector.load %arg2[%c0_160, %213, %c36, %c0_161] : memref<1x52x52x4xf32, #tpu.memory_space<vmem>>, vector<1x8x16x4xf32>
    %215 = vector.shape_cast %214 : vector<1x8x16x4xf32> to vector<8x16x4xf32>
    %216 = vector.shape_cast %215 : vector<8x16x4xf32> to vector<128x4xf32>
    %c21 = arith.constant 21 : index
    %c0_162 = arith.constant 0 : index
    %c0_163 = arith.constant 0 : index
    %217 = vector.load %arg3[%c21, %c0_162, %c0_163] : memref<28x4x128xf32, #tpu.memory_space<vmem>>, vector<1x4x128xf32>
    %218 = vector.shape_cast %217 : vector<1x4x128xf32> to vector<4x128xf32>
    %cst_164 = arith.constant dense<0.000000e+00> : vector<128x128xf32>
    %219 = tpu.matmul %216, %218, %cst_164 {dimension_numbers = #tpu.dot_dimension_numbers<[1], [0], [0], [1], [0, 0, 1, 1], [], []>} : vector<128x4xf32>, vector<4x128xf32>, vector<128x128xf32> -> vector<128x128xf32>
    %220 = arith.addf %210, %219 : vector<128x128xf32>
    %c18_i32_165 = arith.constant 18 : i32
    %221 = arith.addi %c18_i32_165, %1 : i32
    %c0_i32_166 = arith.constant 0 : i32
    %222 = arith.addi %221, %c0_i32_166 : i32
    %c0_167 = arith.constant 0 : index
    %223 = arith.index_cast %222 : i32 to index
    %c0_168 = arith.constant 0 : index
    %c0_169 = arith.constant 0 : index
    %224 = vector.load %arg2[%c0_167, %223, %c0_168, %c0_169] : memref<1x52x52x4xf32, #tpu.memory_space<vmem>>, vector<1x8x16x4xf32>
    %225 = vector.shape_cast %224 : vector<1x8x16x4xf32> to vector<8x16x4xf32>
    %226 = vector.shape_cast %225 : vector<8x16x4xf32> to vector<128x4xf32>
    %c22 = arith.constant 22 : index
    %c0_170 = arith.constant 0 : index
    %c0_171 = arith.constant 0 : index
    %227 = vector.load %arg3[%c22, %c0_170, %c0_171] : memref<28x4x128xf32, #tpu.memory_space<vmem>>, vector<1x4x128xf32>
    %228 = vector.shape_cast %227 : vector<1x4x128xf32> to vector<4x128xf32>
    %cst_172 = arith.constant dense<0.000000e+00> : vector<128x128xf32>
    %229 = tpu.matmul %226, %228, %cst_172 {dimension_numbers = #tpu.dot_dimension_numbers<[1], [0], [0], [1], [0, 0, 1, 1], [], []>} : vector<128x4xf32>, vector<4x128xf32>, vector<128x128xf32> -> vector<128x128xf32>
    %230 = arith.addf %220, %229 : vector<128x128xf32>
    %c18_i32_173 = arith.constant 18 : i32
    %231 = arith.addi %c18_i32_173, %1 : i32
    %c0_i32_174 = arith.constant 0 : i32
    %232 = arith.addi %231, %c0_i32_174 : i32
    %c0_175 = arith.constant 0 : index
    %233 = arith.index_cast %232 : i32 to index
    %c18_176 = arith.constant 18 : index
    %c0_177 = arith.constant 0 : index
    %234 = vector.load %arg2[%c0_175, %233, %c18_176, %c0_177] : memref<1x52x52x4xf32, #tpu.memory_space<vmem>>, vector<1x8x16x4xf32>
    %235 = vector.shape_cast %234 : vector<1x8x16x4xf32> to vector<8x16x4xf32>
    %236 = vector.shape_cast %235 : vector<8x16x4xf32> to vector<128x4xf32>
    %c23 = arith.constant 23 : index
    %c0_178 = arith.constant 0 : index
    %c0_179 = arith.constant 0 : index
    %237 = vector.load %arg3[%c23, %c0_178, %c0_179] : memref<28x4x128xf32, #tpu.memory_space<vmem>>, vector<1x4x128xf32>
    %238 = vector.shape_cast %237 : vector<1x4x128xf32> to vector<4x128xf32>
    %cst_180 = arith.constant dense<0.000000e+00> : vector<128x128xf32>
    %239 = tpu.matmul %236, %238, %cst_180 {dimension_numbers = #tpu.dot_dimension_numbers<[1], [0], [0], [1], [0, 0, 1, 1], [], []>} : vector<128x4xf32>, vector<4x128xf32>, vector<128x128xf32> -> vector<128x128xf32>
    %240 = arith.addf %230, %239 : vector<128x128xf32>
    %c18_i32_181 = arith.constant 18 : i32
    %241 = arith.addi %c18_i32_181, %1 : i32
    %c0_i32_182 = arith.constant 0 : i32
    %242 = arith.addi %241, %c0_i32_182 : i32
    %c0_183 = arith.constant 0 : index
    %243 = arith.index_cast %242 : i32 to index
    %c36_184 = arith.constant 36 : index
    %c0_185 = arith.constant 0 : index
    %244 = vector.load %arg2[%c0_183, %243, %c36_184, %c0_185] : memref<1x52x52x4xf32, #tpu.memory_space<vmem>>, vector<1x8x16x4xf32>
    %245 = vector.shape_cast %244 : vector<1x8x16x4xf32> to vector<8x16x4xf32>
    %246 = vector.shape_cast %245 : vector<8x16x4xf32> to vector<128x4xf32>
    %c24_186 = arith.constant 24 : index
    %c0_187 = arith.constant 0 : index
    %c0_188 = arith.constant 0 : index
    %247 = vector.load %arg3[%c24_186, %c0_187, %c0_188] : memref<28x4x128xf32, #tpu.memory_space<vmem>>, vector<1x4x128xf32>
    %248 = vector.shape_cast %247 : vector<1x4x128xf32> to vector<4x128xf32>
    %cst_189 = arith.constant dense<0.000000e+00> : vector<128x128xf32>
    %249 = tpu.matmul %246, %248, %cst_189 {dimension_numbers = #tpu.dot_dimension_numbers<[1], [0], [0], [1], [0, 0, 1, 1], [], []>} : vector<128x4xf32>, vector<4x128xf32>, vector<128x128xf32> -> vector<128x128xf32>
    %250 = arith.addf %240, %249 : vector<128x128xf32>
    %c18_i32_190 = arith.constant 18 : i32
    %251 = arith.addi %c18_i32_190, %1 : i32
    %c18_i32_191 = arith.constant 18 : i32
    %252 = arith.addi %251, %c18_i32_191 : i32
    %c0_192 = arith.constant 0 : index
    %253 = arith.index_cast %252 : i32 to index
    %c0_193 = arith.constant 0 : index
    %c0_194 = arith.constant 0 : index
    %254 = vector.load %arg2[%c0_192, %253, %c0_193, %c0_194] : memref<1x52x52x4xf32, #tpu.memory_space<vmem>>, vector<1x8x16x4xf32>
    %255 = vector.shape_cast %254 : vector<1x8x16x4xf32> to vector<8x16x4xf32>
    %256 = vector.shape_cast %255 : vector<8x16x4xf32> to vector<128x4xf32>
    %c25 = arith.constant 25 : index
    %c0_195 = arith.constant 0 : index
    %c0_196 = arith.constant 0 : index
    %257 = vector.load %arg3[%c25, %c0_195, %c0_196] : memref<28x4x128xf32, #tpu.memory_space<vmem>>, vector<1x4x128xf32>
    %258 = vector.shape_cast %257 : vector<1x4x128xf32> to vector<4x128xf32>
    %cst_197 = arith.constant dense<0.000000e+00> : vector<128x128xf32>
    %259 = tpu.matmul %256, %258, %cst_197 {dimension_numbers = #tpu.dot_dimension_numbers<[1], [0], [0], [1], [0, 0, 1, 1], [], []>} : vector<128x4xf32>, vector<4x128xf32>, vector<128x128xf32> -> vector<128x128xf32>
    %260 = arith.addf %250, %259 : vector<128x128xf32>
    %c18_i32_198 = arith.constant 18 : i32
    %261 = arith.addi %c18_i32_198, %1 : i32
    %c18_i32_199 = arith.constant 18 : i32
    %262 = arith.addi %261, %c18_i32_199 : i32
    %c0_200 = arith.constant 0 : index
    %263 = arith.index_cast %262 : i32 to index
    %c18_201 = arith.constant 18 : index
    %c0_202 = arith.constant 0 : index
    %264 = vector.load %arg2[%c0_200, %263, %c18_201, %c0_202] : memref<1x52x52x4xf32, #tpu.memory_space<vmem>>, vector<1x8x16x4xf32>
    %265 = vector.shape_cast %264 : vector<1x8x16x4xf32> to vector<8x16x4xf32>
    %266 = vector.shape_cast %265 : vector<8x16x4xf32> to vector<128x4xf32>
    %c26 = arith.constant 26 : index
    %c0_203 = arith.constant 0 : index
    %c0_204 = arith.constant 0 : index
    %267 = vector.load %arg3[%c26, %c0_203, %c0_204] : memref<28x4x128xf32, #tpu.memory_space<vmem>>, vector<1x4x128xf32>
    %268 = vector.shape_cast %267 : vector<1x4x128xf32> to vector<4x128xf32>
    %cst_205 = arith.constant dense<0.000000e+00> : vector<128x128xf32>
    %269 = tpu.matmul %266, %268, %cst_205 {dimension_numbers = #tpu.dot_dimension_numbers<[1], [0], [0], [1], [0, 0, 1, 1], [], []>} : vector<128x4xf32>, vector<4x128xf32>, vector<128x128xf32> -> vector<128x128xf32>
    %270 = arith.addf %260, %269 : vector<128x128xf32>
    %c18_i32_206 = arith.constant 18 : i32
    %271 = arith.addi %c18_i32_206, %1 : i32
    %c18_i32_207 = arith.constant 18 : i32
    %272 = arith.addi %271, %c18_i32_207 : i32
    %c0_208 = arith.constant 0 : index
    %273 = arith.index_cast %272 : i32 to index
    %c36_209 = arith.constant 36 : index
    %c0_210 = arith.constant 0 : index
    %274 = vector.load %arg2[%c0_208, %273, %c36_209, %c0_210] : memref<1x52x52x4xf32, #tpu.memory_space<vmem>>, vector<1x8x16x4xf32>
    %275 = vector.shape_cast %274 : vector<1x8x16x4xf32> to vector<8x16x4xf32>
    %276 = vector.shape_cast %275 : vector<8x16x4xf32> to vector<128x4xf32>
    %c27 = arith.constant 27 : index
    %c0_211 = arith.constant 0 : index
    %c0_212 = arith.constant 0 : index
    %277 = vector.load %arg3[%c27, %c0_211, %c0_212] : memref<28x4x128xf32, #tpu.memory_space<vmem>>, vector<1x4x128xf32>
    %278 = vector.shape_cast %277 : vector<1x4x128xf32> to vector<4x128xf32>
    %cst_213 = arith.constant dense<0.000000e+00> : vector<128x128xf32>
    %279 = tpu.matmul %276, %278, %cst_213 {dimension_numbers = #tpu.dot_dimension_numbers<[1], [0], [0], [1], [0, 0, 1, 1], [], []>} : vector<128x4xf32>, vector<4x128xf32>, vector<128x128xf32> -> vector<128x128xf32>
    %280 = arith.addf %270, %279 : vector<128x128xf32>
    %c0_214 = arith.constant 0 : index
    %c0_215 = arith.constant 0 : index
    %c0_216 = arith.constant 0 : index
    %281 = vector.load %arg4[%c0_214, %c0_215, %c0_216] : memref<1x1x128xf32, #tpu.memory_space<vmem>>, vector<1x1x128xf32>
    %282 = vector.shape_cast %281 : vector<1x1x128xf32> to vector<1x128xf32>
    %283 = vector.broadcast %282 : vector<1x128xf32> to vector<128x128xf32>
    %284 = arith.addf %280, %283 : vector<128x128xf32>
    %285 = vector.shape_cast %284 : vector<128x128xf32> to vector<8x16x128xf32>
    %c0_217 = arith.constant 0 : index
    %c0_218 = arith.constant 0 : index
    %c0_219 = arith.constant 0 : index
    %c0_220 = arith.constant 0 : index
    %286 = vector.load %arg5[%c0_217, %c0_218, %c0_219, %c0_220] : memref<1x8x16x128xf32, #tpu.memory_space<vmem>>, vector<1x8x16x128xf32>
    %287 = vector.shape_cast %286 : vector<1x8x16x128xf32> to vector<8x16x128xf32>
    %288 = vector.shape_cast %285 : vector<8x16x128xf32> to vector<1x8x16x128xf32>
    tpu.vector_store %arg5[%c0_217, %c0_218, %c0_219, %c0_220], %288 {strides = array<i32>} : memref<1x8x16x128xf32, #tpu.memory_space<vmem>>, vector<1x8x16x128xf32>,
    return
  }
  func.func @transform_0(%arg0: i32, %arg1: i32) -> (i32, i32, i32, i32) {
    %c0_i32 = arith.constant 0 : i32
    %c0_i32_0 = arith.constant 0 : i32
    %c0_i32_1 = arith.constant 0 : i32
    %c0_i32_2 = arith.constant 0 : i32
    return %arg0, %c0_i32, %c0_i32_0, %c0_i32_1 : i32, i32, i32, i32
  }
  func.func @transform_1(%arg0: i32, %arg1: i32) -> (i32, i32, i32) {
    %c0_i32 = arith.constant 0 : i32
    %c0_i32_0 = arith.constant 0 : i32
    %c0_i32_1 = arith.constant 0 : i32
    %c0_i32_2 = arith.constant 0 : i32
    return %c0_i32, %c0_i32_0, %c0_i32_1 : i32, i32, i32
  }
  func.func @transform_2(%arg0: i32, %arg1: i32) -> (i32, i32, i32) {
    %c0_i32 = arith.constant 0 : i32
    %c0_i32_0 = arith.constant 0 : i32
    %c0_i32_1 = arith.constant 0 : i32
    return %arg0, %c0_i32, %c0_i32_0 : i32, i32, i32
  }
  func.func @transform_3(%arg0: i32, %arg1: i32) -> (i32, i32, i32, i32) {
    %c0_i32 = arith.constant 0 : i32
    %c0_i32_0 = arith.constant 0 : i32
    %c0_i32_1 = arith.constant 0 : i32
    return %arg0, %arg1, %c0_i32, %c0_i32_0 : i32, i32, i32, i32
  }
}

</mosaic_0001>

<bundles_post_ra>
// kernel: tpu_custom_call.1
= control target key start
LH: loop header
LB: loop body
LE: loop exit
PB: predicated region body
PF: predicated region fallthrough
CT: control target
= control target key end

     0   :  { %8 = vsyncpa [#allocation3], 0  ;;  %s10860_s0 = inlined_call_operand.vmem [shape: f32[2,52,52,4], index: 0, kind: input, shape index: {}]   ;;  %s10861_s1 = inlined_call_operand.vmem [shape: f32[28,4,128], index: 1, kind: input, shape index: {}]   ;;  %s10862_s2 = inlined_call_operand.vmem [shape: f32[2,1,128], index: 2, kind: input, shape index: {}]   ;;  %s10863_s3 = inlined_call_operand.hbm [shape: f32[2,16,16,128], index: 3, kind: output, shape index: {}]  }
   0x1   :  { %10 = vsyncpa [#allocation3 + $0x1], 0  ;;  %s8908_s12 = smov 0   ;;  %s8910_s13 = smov 0  }
   0x2   :  { %s8912_s14 = smov 0   ;;  %s8914_s15 = smov 0  }
   0x3   :  { %s8916_s16 = smov 0   ;;  %s8918_s17 = smov 0  }
   0x4   :  { %s8920_s18 = smov 0   ;;  %s8922_s19 = smov 0  }
   0x5 LB: > { %s6603_s20 = sadd.s32 4294967295, %s8883_s19   ;;  %s6604_s21 = sadd.s32 4294967294, %s8883_s19   ;;  %s8883_s19 = sphi %s8922_s19, %s16_s19   ;;  %s8879_s18 = sphi %s8920_s18, %s10910_s18   ;;  %s8875_s17 = sphi %s8918_s17, %s10909_s17   ;;  %s8871_s16 = sphi %s8916_s16, %s10908_s16   ;;  %s8867_s15 = sphi %s8914_s15, %s10907_s15   ;;  %s8863_s14 = sphi %s8912_s14, %s10906_s14   ;;  %s8859_s13 = sphi %s8910_s13, %s10905_s13   ;;  %s8855_s12 = sphi %s8908_s12, %s10904_s12  }
   0x6   : > { %s25_s22 = sadd.s32 1, %s8875_s17  ;;  %s28_s23 = sadd.s32 1, %s8879_s18 }
   0x7   : > { %p26_p0 = scmp.ge.s32.totalorder %s25_s22, 2  ;;  %p120_p1 = scmp.ne.s32.totalorder %s8863_s14, %s8859_s13 }
   0x8   : > { %p121_p2 = scmp.eq.s32.totalorder %s6603_s20, 3  ;;  %p126_p5 = scmp.ne.s32.totalorder %s8859_s13, %s8855_s12 }
   0x9   : > { %s10912_s22 = smov (%p26_p0, %s25_s22), 0  ;;  %s10914_s23 = smov (!%p26_p0, %s28_s23), %s8879_s18 }
   0xa   : > { %s106_s24 = ssub.s32 %s8875_s17, %s10912_s22  ;;  %p8959_p3 = por %p121_p2, %p120_p1 }
   0xb   : > { %p30_p4 = scmp.ge.s32.totalorder %s10914_s23, 2  ;;  %p127_p6 = scmp.eq.s32.totalorder %s6604_s21, 3 }
   0xc   : > { %p6607_p7 = scmp.ge.s32.totalorder %s8883_s19, 1  ;;  %p162_p9 = scmp.lt.s32.totalorder %s8883_s19, 5 }
   0xd   : > { %s10916_s23 = smov (%p30_p4, %s10914_s23), 0  ;;  %p8968_p8 = por %p127_p6, %p126_p5 }
   0xe   : > { %s105_s27 = ssub.s32 %s8879_s18, %s10916_s23  ;;  %s110_s28 = sadd.s32 1, %s8863_s14 }
   0xf   : > { %s107_s29 = sor.u32 %s106_s24, %s105_s27  ;;  %p163_p10 = pnand %p6607_p7, %p162_p9 }
  0x10   : > { %p108_p11 = scmp.eq.s32.totalorder %s107_s29, 0 }
  0x11   : > { %166 = sbr.rel (%p163_p10) target bundleno = 691 (0x2b3), region = 32 }
  0x12   : > { %s8977_s30 = scalar_select %p108_p11, %s8863_s14, %s110_s28  }
  0x16   : > { %v6647_v0 = vld [vmem:[%s10861_s1 + $0x4] sm:$0xf]  ;;  %vm289_vm0 = vcmask 1043456   ;;  %v218_v1 = vld [vmem:[%s10861_s1] sm:$0xf]  ;;  %p189_p12 = scmp.lt.s32.totalorder %s8871_s16, 1 }
  0x17   : > { %7964 = vmatprep.subr.msk.mxu0 %vm289_vm0, %v6647_v0  ;;  %7990 = vmatprep.subr.msk.mxu1 %vm289_vm0, %v218_v1  ;;  %v6698_v2 = vld [vmem:[%s10861_s1 + $0x8] sm:$0xf]  ;;  %v6732_v3 = vld [vmem:[%s10861_s1 + $0xc] sm:$0xf]  ;;  %s6612_s21 = smul.u32 448, %s8867_s15  ;;  %vm240_vm1 = vcmask 31744  }
  0x18   : > { %7965 = vmatpush3.msk.msra.mxu0 %vm289_vm0, %v6647_v0  ;;  %s8996_s20 = scalar_select %p189_p12, %s8871_s16, 1  ;;  %7991 = vmatpush3.msk.msra.mxu1 %vm289_vm0, %v218_v1  ;;  %v9029_v10 = vld [vmem:[%s10861_s1 + $0x10] sm:$0xf]  ;;  %v9034_v11 = vld [vmem:[%s10861_s1 + $0x14] sm:$0xf] }
  0x19   : > { %8016 = vmatprep.subr.msk.mxu0 %vm289_vm0, %v6698_v2  ;;  %8042 = vmatprep.subr.msk.mxu1 %vm289_vm0, %v6732_v3  ;;  %v6818_v44 = vld [vmem:[%s10861_s1 + $0x18] sm:$0xf]  ;;  %v6854_v45 = vld [vmem:[%s10861_s1 + $0x1c] sm:$0xf]  ;;  %s7487_s9 = sshll.u32 %s8867_s15, 4  ;;  %s7483_s10 = sshll.u32 %s8871_s16, 5 }
  0x1a   : > { %s8692_s24 = smul.u32 2912, %s8996_s20  ;;  %s196_s7 = scalar_lea.vmem %s10862_s2, %s8996_s20 }
  0x1b   : > { %s6489_s11 = sadd.s32 %s7487_s9, %s7483_s10  ;;  %s8885_s5 = smov [#allocation2]  }
  0x1c   : > { %s193_s29 = scalar_lea.vmem %s10860_s0, %s8692_s24  ;;  %s7484_s15 = sshll.u32 %s6489_s11, 7 }
  0x1d   : > { %s9006_s4 = scalar_lea.vmem %s193_s29, %s6612_s21  ;;  %s10800_s27 = scalar_lea.hbm %s10863_s3, %s7484_s15 }
  0x1e   : > { %v6631_v4 = vld [vmem:[%s9006_s4 + $0x2ac] sm:$0xff]  ;;  %v9010_v5 = vld [vmem:[%s9006_s4 + $0x402] sm:$0xff]  ;;  %v6632_v6 = vld [vmem:[%s9006_s4 + $0x2b4] sm:$0xff]  ;;  %s8795_s6 = sshll.u32 %s8885_s5, 4  ;;  %s8796_s6 = int_to_ptr.vmem [resolvable:$false] %s8795_s6 }
  0x1f   : > { %7966 = vmatprep.mubr.msk.f32.mxu0 %vm240_vm1, %v6631_v4  ;;  %7992 = vmatprep.mubr.msk.f32.mxu1 %vm240_vm1, %v9010_v5  ;;  %v9017_v7 = vld [vmem:[%s9006_s4 + $0x40a] sm:$0xff]  ;;  %v9021_v9 = vld [vmem:[%s9006_s4 + $0x43a] sm:$0xff]  ;;  %v9040_v13 = vld [vmem:[%s9006_s4 + $0x442] sm:$0xff] }
  0x20   : > { %v6633_v8 = vld [vmem:[%s9006_s4 + $0x2e4] sm:$0xff]  ;;  %7967 = vmatmul.mubr.msk.f32.vlgmr.msra.gmra.mxu0 %vm240_vm1, %v6632_v6  ;;  %7993 = vmatmul.mubr.msk.f32.vlgmr.msra.gmra.mxu1 %vm240_vm1, %v9017_v7  ;;  %v6634_v12 = vld [vmem:[%s9006_s4 + $0x2ec] sm:$0xff]  ;;  %v6635_v14 = vld [vmem:[%s9006_s4 + $0x31c] sm:$0xff] }
  0x21   : > { %8017 = vmatpush3.msk.msra.mxu0 %vm289_vm0, %v6698_v2  ;;  %8043 = vmatpush3.msk.msra.mxu1 %vm289_vm0, %v6732_v3  ;;  %v9047_v15 = vld [vmem:[%s9006_s4 + $0x472] sm:$0xff]  ;;  %v6636_v16 = vld [vmem:[%s9006_s4 + $0x324] sm:$0xff]  ;;  %v9061_v17 = vld [vmem:[%s9006_s4 + $0x47a] sm:$0xff] }
  0x22   : > { %7969 = vmatprep.mubr.msk.f32.mxu0 %vm240_vm1, %v6633_v8  ;;  %7995 = vmatprep.mubr.msk.f32.mxu1 %vm240_vm1, %v9021_v9  ;;  %v6637_v18 = vld [vmem:[%s9006_s4 + $0x354] sm:$0xff]  ;;  %v9065_v19 = vld [vmem:[%s9006_s4 + $0x4aa] sm:$0xff]  ;;  %v6638_v20 = vld [vmem:[%s9006_s4 + $0x35c] sm:$0xff] }
  0x23   : > { %8068 = vmatprep.subr.msk.mxu0 %vm289_vm0, %v9029_v10  ;;  %8094 = vmatprep.subr.msk.mxu1 %vm289_vm0, %v9034_v11  ;;  %v9075_v21 = vld [vmem:[%s9006_s4 + $0x4b2] sm:$0xff]  ;;  %v9079_v23 = vld [vmem:[%s9006_s4 + $0x4e2] sm:$0xff]  ;;  %v9089_v25 = vld [vmem:[%s9006_s4 + $0x4ea] sm:$0xff] }
  0x24   : > { %7970 = vmatmul.mubr.msk.f32.gmra.mxu0 %vm240_vm1, %v6634_v12  ;;  %7996 = vmatmul.mubr.msk.f32.gmra.mxu1 %vm240_vm1, %v9040_v13  ;;  %v6639_v22 = vld [vmem:[%s9006_s4 + $0x38c] sm:$0xff]  ;;  %v6640_v24 = vld [vmem:[%s9006_s4 + $0x394] sm:$0xff]  ;;  %v6641_v26 = vld [vmem:[%s9006_s4 + $0x3c4] sm:$0xff] }
  0x25   : > { %7972 = vmatprep.mubr.msk.f32.mxu0 %vm240_vm1, %v6635_v14  ;;  %7998 = vmatprep.mubr.msk.f32.mxu1 %vm240_vm1, %v9047_v15  ;;  %v9093_v27 = vld [vmem:[%s9006_s4 + $0x51a] sm:$0xff]  ;;  %v6642_v28 = vld [vmem:[%s9006_s4 + $0x3cc] sm:$0xff]  ;;  %v9103_v29 = vld [vmem:[%s9006_s4 + $0x522] sm:$0xff] }
  0x26   : > { %v9106_v30 = vld [vmem:[%s9006_s4 + $0x3fc] sm:$0xff]  ;;  %v9109_v31 = vld [vmem:[%s9006_s4 + $0x552] sm:$0xff]  ;;  %v9119_v32 = vld [vmem:[%s9006_s4 + $0x404] sm:$0xff] }
  0x27   : > { %v9122_v33 = vld [vmem:[%s9006_s4 + $0x55a] sm:$0xff]  ;;  %v9128_v35 = vld [vmem:[%s9006_s4 + $0x58a] sm:$0xff]  ;;  %v9142_v37 = vld [vmem:[%s9006_s4 + $0x592] sm:$0xff] }
  0x28   : > { %7973 = vmatmul.mubr.msk.f32.gmra.mxu0 %vm240_vm1, %v6636_v16  ;;  %7999 = vmatmul.mubr.msk.f32.gmra.mxu1 %vm240_vm1, %v9061_v17  ;;  %v9125_v34 = vld [vmem:[%s9006_s4 + $0x434] sm:$0xff]  ;;  %v9139_v36 = vld [vmem:[%s9006_s4 + $0x43c] sm:$0xff]  ;;  %v9160_v42 = vld [vmem:[%s9006_s4 + $0x2ea] sm:$0xff] }
  0x29   : > { %7975 = vmatprep.mubr.msk.f32.mxu0 %vm240_vm1, %v6637_v18  ;;  %8001 = vmatprep.mubr.msk.f32.mxu1 %vm240_vm1, %v9065_v19  ;;  %v9145_v38 = vld [vmem:[%s9006_s4 + $0x2b2] sm:$0xff]  ;;  %v9156_v40 = vld [vmem:[%s9006_s4 + $0x2ba] sm:$0xff]  ;;  %v6686_v48 = vld [vmem:[%s9006_s4 + $0x322] sm:$0xff] }
  0x2a   : > { %v6716_v39 = vld [vmem:[%s9006_s4 + $0x2b8] sm:$0xff]  ;;  %v6717_v41 = vld [vmem:[%s9006_s4 + $0x2c0] sm:$0xff]  ;;  %v6718_v43 = vld [vmem:[%s9006_s4 + $0x2f0] sm:$0xff] }
  0x2b   : > { %v9177_v46 = vld [vmem:[%s9006_s4 + $0x2f2] sm:$0xff]  ;;  %v6720_v49 = vld [vmem:[%s9006_s4 + $0x328] sm:$0xff]  ;;  %v6688_v52 = vld [vmem:[%s9006_s4 + $0x35a] sm:$0xff] }
  0x2c   : > { %7976 = vmatmul.mubr.msk.f32.gmra.mxu0 %vm240_vm1, %v6638_v20  ;;  %8002 = vmatmul.mubr.msk.f32.gmra.mxu1 %vm240_vm1, %v9075_v21  ;;  %v6719_v47 = vld [vmem:[%s9006_s4 + $0x2f8] sm:$0xff]  ;;  %v6687_v50 = vld [vmem:[%s9006_s4 + $0x32a] sm:$0xff]  ;;  %v6722_v53 = vld [vmem:[%s9006_s4 + $0x360] sm:$0xff] }
  0x2d   : > { %7978 = vmatprep.mubr.msk.f32.mxu0 %vm240_vm1, %v6639_v22  ;;  %8004 = vmatprep.mubr.msk.f32.mxu1 %vm240_vm1, %v9079_v23  ;;  %v6721_v51 = vld [vmem:[%s9006_s4 + $0x330] sm:$0xff]  ;;  %v6689_v54 = vld [vmem:[%s9006_s4 + $0x362] sm:$0xff]  ;;  %v6724_v57 = vld [vmem:[%s9006_s4 + $0x398] sm:$0xff] }
  0x2e   : > { %v6723_v55 = vld [vmem:[%s9006_s4 + $0x368] sm:$0xff]  ;;  %v6690_v56 = vld [vmem:[%s9006_s4 + $0x392] sm:$0xff]  ;;  %v6691_v58 = vld [vmem:[%s9006_s4 + $0x39a] sm:$0xff] }
  0x2f   : > { %v6725_v59 = vld [vmem:[%s9006_s4 + $0x3a0] sm:$0xff]  ;;  %v6692_v60 = vld [vmem:[%s9006_s4 + $0x3ca] sm:$0xff]  ;;  %v6693_v62 = vld [vmem:[%s9006_s4 + $0x3d2] sm:$0xff] }
  0x30   : > { %7979 = vmatmul.mubr.msk.f32.gmra.mxu0 %vm240_vm1, %v6640_v24  ;;  %8005 = vmatmul.mubr.msk.f32.gmra.mxu1 %vm240_vm1, %v9089_v25  ;;  %v6726_v61 = vld [vmem:[%s9006_s4 + $0x3d0] sm:$0xff]  ;;  %v6727_v63 = vld [vmem:[%s9006_s4 + $0x3d8] sm:$0xff]  ;;  %v9219_v0 = vld [vmem:[%s9006_s4 + $0x408] sm:$0xff] }
  0x31   : > { %7981 = vmatprep.mubr.msk.f32.mxu0 %vm240_vm1, %v6641_v26  ;;  %8007 = vmatprep.mubr.msk.f32.mxu1 %vm240_vm1, %v9093_v27  ;;  %v6729_v1 = vld [vmem:[%s9006_s4 + $0x410] sm:$0xff]  ;;  %v9229_v2 = vld [vmem:[%s9006_s4 + $0x440] sm:$0xff]  ;;  %v9239_v3 = vld [vmem:[%s9006_s4 + $0x448] sm:$0xff] }
  0x32   : > { %v6888_v4 = vld [vmem:[%s10861_s1 + $0x20] sm:$0xf]  ;;  %v6922_v6 = vld [vmem:[%s10861_s1 + $0x24] sm:$0xf]  ;;  %v6754_v8 = vld [vmem:[%s9006_s4 + $0x46c] sm:$0xff] }
  0x33   : > { %v6757_v12 = vld [vmem:[%s9006_s4 + $0x4ac] sm:$0xff]  ;;  %v6758_v14 = vld [vmem:[%s9006_s4 + $0x4dc] sm:$0xff]  ;;  %v6759_v16 = vld [vmem:[%s9006_s4 + $0x4e4] sm:$0xff] }
  0x34   : > { %7982 = vmatmul.mubr.msk.f32.gmra.mxu0 %vm240_vm1, %v6642_v28  ;;  %8008 = vmatmul.mubr.msk.f32.gmra.mxu1 %vm240_vm1, %v9103_v29  ;;  %v6760_v18 = vld [vmem:[%s9006_s4 + $0x514] sm:$0xff]  ;;  %v6761_v20 = vld [vmem:[%s9006_s4 + $0x51c] sm:$0xff]  ;;  %v6765_v24 = vld [vmem:[%s9006_s4 + $0x58c] sm:$0xff] }
  0x35   : > { %7984 = vmatprep.mubr.msk.f32.mxu0 %vm240_vm1, %v9106_v30  ;;  %8010 = vmatprep.mubr.msk.f32.mxu1 %vm240_vm1, %v9109_v31  ;;  %v6763_v22 = vld [vmem:[%s9006_s4 + $0x554] sm:$0xff]  ;;  %v9332_v26 = vld [vmem:[%s10861_s1 + $0x2c] sm:$0xf]  ;;  %v6842_v28 = vld [vmem:[%s9006_s4 + $0x5bc] sm:$0xff] }
  0x38   : > { %7985 = vmatmul.mubr.msk.f32.gmra.mxu0 %vm240_vm1, %v9119_v32  ;;  %8011 = vmatmul.mubr.msk.f32.gmra.mxu1 %vm240_vm1, %v9122_v33 }
  0x39   : > { %7987 = vmatprep.mubr.msk.f32.mxu0 %vm240_vm1, %v9125_v34  ;;  %8013 = vmatprep.mubr.msk.f32.mxu1 %vm240_vm1, %v9128_v35 }
  0x3c   : > { %7988 = vmatmul.mubr.msk.f32.gmra.mxu0 %vm240_vm1, %v9139_v36  ;;  %8014 = vmatmul.mubr.msk.f32.gmra.mxu1 %vm240_vm1, %v9142_v37 }
  0x3d   : > { %8018 = vmatprep.mubr.msk.f32.mxu0 %vm240_vm1, %v9145_v38  ;;  %8044 = vmatprep.mubr.msk.f32.mxu1 %vm240_vm1, %v6716_v39  ;;  %v6845_v39 = vld [vmem:[%s9006_s4 + $0x5fc] sm:$0xff] }
  0x40   : > { %8019 = vmatmul.mubr.msk.f32.vlgmr.msra.gmra.mxu0 %vm240_vm1, %v9156_v40  ;;  %8045 = vmatmul.mubr.msk.f32.vlgmr.msra.gmra.mxu1 %vm240_vm1, %v6717_v41  ;;  %v6810_v41 = vld [vmem:[%s9006_s4 + $0x4e8] sm:$0xff] }
  0x41   : > { %8069 = vmatpush3.msk.msra.mxu0 %vm289_vm0, %v9029_v10  ;;  %8095 = vmatpush3.msk.msra.mxu1 %vm289_vm0, %v9034_v11  ;;  %v6755_v10 = vld [vmem:[%s9006_s4 + $0x474] sm:$0xff]  ;;  %v6756_v11 = vld [vmem:[%s9006_s4 + $0x4a4] sm:$0xff] }
  0x42   : > { %8021 = vmatprep.mubr.msk.f32.mxu0 %vm240_vm1, %v9160_v42  ;;  %8047 = vmatprep.mubr.msk.f32.mxu1 %vm240_vm1, %v6718_v43  ;;  %v6846_v43 = vld [vmem:[%s9006_s4 + $0x62c] sm:$0xff] }
  0x43   : > { %8120 = vmatprep.subr.msk.mxu0 %vm289_vm0, %v6818_v44  ;;  %8146 = vmatprep.subr.msk.mxu1 %vm289_vm0, %v6854_v45 }
  0x44   : > { %8022 = vmatmul.mubr.msk.f32.gmra.mxu0 %vm240_vm1, %v9177_v46  ;;  %8048 = vmatmul.mubr.msk.f32.gmra.mxu1 %vm240_vm1, %v6719_v47  ;;  %v6812_v47 = vld [vmem:[%s9006_s4 + $0x520] sm:$0xff] }
  0x45   : > { %8024 = vmatprep.mubr.msk.f32.mxu0 %vm240_vm1, %v6686_v48  ;;  %8050 = vmatprep.mubr.msk.f32.mxu1 %vm240_vm1, %v6720_v49  ;;  %v6848_v48 = vld [vmem:[%s9006_s4 + $0x664] sm:$0xff] }
  0x46   : > { %v6813_v49 = vld [vmem:[%s9006_s4 + $0x528] sm:$0xff] }
  0x48   : > { %8025 = vmatmul.mubr.msk.f32.gmra.mxu0 %vm240_vm1, %v6687_v50  ;;  %8051 = vmatmul.mubr.msk.f32.gmra.mxu1 %vm240_vm1, %v6721_v51  ;;  %v6849_v50 = vld [vmem:[%s9006_s4 + $0x66c] sm:$0xff]  ;;  %v6814_v51 = vld [vmem:[%s9006_s4 + $0x558] sm:$0xff] }
  0x49   : > { %8027 = vmatprep.mubr.msk.f32.mxu0 %vm240_vm1, %v6688_v52  ;;  %8053 = vmatprep.mubr.msk.f32.mxu1 %vm240_vm1, %v6722_v53  ;;  %v6850_v52 = vld [vmem:[%s9006_s4 + $0x69c] sm:$0xff] }
  0x4a   : > { %v6815_v53 = vld [vmem:[%s9006_s4 + $0x560] sm:$0xff] }
  0x4c   : > { %8028 = vmatmul.mubr.msk.f32.gmra.mxu0 %vm240_vm1, %v6689_v54  ;;  %8054 = vmatmul.mubr.msk.f32.gmra.mxu1 %vm240_vm1, %v6723_v55  ;;  %v6851_v54 = vld [vmem:[%s9006_s4 + $0x6a4] sm:$0xff]  ;;  %v6816_v55 = vld [vmem:[%s9006_s4 + $0x590] sm:$0xff] }
  0x4d   : > { %8030 = vmatprep.mubr.msk.f32.mxu0 %vm240_vm1, %v6690_v56  ;;  %8056 = vmatprep.mubr.msk.f32.mxu1 %vm240_vm1, %v6724_v57  ;;  %v6852_v56 = vld [vmem:[%s9006_s4 + $0x6d4] sm:$0xff] }
  0x4e   : > { %v6817_v57 = vld [vmem:[%s9006_s4 + $0x598] sm:$0xff] }
  0x50   : > { %8031 = vmatmul.mubr.msk.f32.gmra.mxu0 %vm240_vm1, %v6691_v58  ;;  %8057 = vmatmul.mubr.msk.f32.gmra.mxu1 %vm240_vm1, %v6725_v59  ;;  %v6853_v58 = vld [vmem:[%s9006_s4 + $0x6dc] sm:$0xff]  ;;  %v9403_v59 = vld [vmem:[%s10861_s1 + $0x30] sm:$0xf] }
  0x51   : > { %8033 = vmatprep.mubr.msk.f32.mxu0 %vm240_vm1, %v6692_v60  ;;  %8059 = vmatprep.mubr.msk.f32.mxu1 %vm240_vm1, %v6726_v61  ;;  %v9408_v60 = vld [vmem:[%s10861_s1 + $0x34] sm:$0xf] }
  0x52   : > { %v6911_v61 = vld [vmem:[%s9006_s4 + $0x5d0] sm:$0xff] }
  0x54   : > { %8034 = vmatmul.mubr.msk.f32.gmra.mxu0 %vm240_vm1, %v6693_v62  ;;  %8060 = vmatmul.mubr.msk.f32.gmra.mxu1 %vm240_vm1, %v6727_v63  ;;  %v6878_v62 = vld [vmem:[%s9006_s4 + $0x5fa] sm:$0xff] }
  0x55   : > { %8036 = vmatprep.mubr.msk.f32.mxu0 %vm240_vm1, %v9010_v5  ;;  %8062 = vmatprep.mubr.msk.f32.mxu1 %vm240_vm1, %v9219_v0  ;;  %v6912_v63 = vld [vmem:[%s9006_s4 + $0x600] sm:$0xff] }
  0x58   : > { %8037 = vmatmul.mubr.msk.f32.gmra.mxu0 %vm240_vm1, %v9017_v7  ;;  %8063 = vmatmul.mubr.msk.f32.gmra.mxu1 %vm240_vm1, %v6729_v1 }
  0x59   : > { %8039 = vmatprep.mubr.msk.f32.mxu0 %vm240_vm1, %v9021_v9  ;;  %8065 = vmatprep.mubr.msk.f32.mxu1 %vm240_vm1, %v9229_v2 }
  0x5c   : > { %8040 = vmatmul.mubr.msk.f32.gmra.mxu0 %vm240_vm1, %v9040_v13  ;;  %8066 = vmatmul.mubr.msk.f32.gmra.mxu1 %vm240_vm1, %v9239_v3 }
  0x5d   : > { %8070 = vmatprep.mubr.msk.f32.mxu0 %vm240_vm1, %v9106_v30  ;;  %8096 = vmatprep.mubr.msk.f32.mxu1 %vm240_vm1, %v9010_v5  ;;  %v6843_v30 = vld [vmem:[%s9006_s4 + $0x5c4] sm:$0xff] }
  0x60   : > { %8071 = vmatmul.mubr.msk.f32.vlgmr.msra.gmra.mxu0 %vm240_vm1, %v9119_v32  ;;  %8097 = vmatmul.mubr.msk.f32.vlgmr.msra.gmra.mxu1 %vm240_vm1, %v9017_v7  ;;  %v6808_v32 = vld [vmem:[%s9006_s4 + $0x4b0] sm:$0xff] }
  0x61   : > { %8121 = vmatpush3.msk.msra.mxu0 %vm289_vm0, %v6818_v44  ;;  %8147 = vmatpush3.msk.msra.mxu1 %vm289_vm0, %v6854_v45  ;;  %v6811_v44 = vld [vmem:[%s9006_s4 + $0x4f0] sm:$0xff] }
  0x62   : > { %8073 = vmatprep.mubr.msk.f32.mxu0 %vm240_vm1, %v9125_v34  ;;  %8099 = vmatprep.mubr.msk.f32.mxu1 %vm240_vm1, %v9021_v9  ;;  %v6844_v34 = vld [vmem:[%s9006_s4 + $0x5f4] sm:$0xff] }
  0x63   : > { %8172 = vmatprep.subr.msk.mxu0 %vm289_vm0, %v6888_v4  ;;  %8198 = vmatprep.subr.msk.mxu1 %vm289_vm0, %v6922_v6  ;;  %v6847_v45 = vld [vmem:[%s9006_s4 + $0x634] sm:$0xff] }
  0x64   : > { %8074 = vmatmul.mubr.msk.f32.gmra.mxu0 %vm240_vm1, %v9139_v36  ;;  %8100 = vmatmul.mubr.msk.f32.gmra.mxu1 %vm240_vm1, %v9040_v13  ;;  %v6809_v36 = vld [vmem:[%s9006_s4 + $0x4b8] sm:$0xff] }
  0x65   : > { %8076 = vmatprep.mubr.msk.f32.mxu0 %vm240_vm1, %v6754_v8  ;;  %8102 = vmatprep.mubr.msk.f32.mxu1 %vm240_vm1, %v9047_v15  ;;  %v6916_v8 = vld [vmem:[%s9006_s4 + $0x670] sm:$0xff] }
  0x68   : > { %8077 = vmatmul.mubr.msk.f32.gmra.mxu0 %vm240_vm1, %v6755_v10  ;;  %8103 = vmatmul.mubr.msk.f32.gmra.mxu1 %vm240_vm1, %v9061_v17  ;;  %v6883_v10 = vld [vmem:[%s9006_s4 + $0x672] sm:$0xff] }
  0x69   : > { %8079 = vmatprep.mubr.msk.f32.mxu0 %vm240_vm1, %v6756_v11  ;;  %8105 = vmatprep.mubr.msk.f32.mxu1 %vm240_vm1, %v9065_v19  ;;  %v6917_v11 = vld [vmem:[%s9006_s4 + $0x678] sm:$0xff] }
  0x6c   : > { %8080 = vmatmul.mubr.msk.f32.gmra.mxu0 %vm240_vm1, %v6757_v12  ;;  %8106 = vmatmul.mubr.msk.f32.gmra.mxu1 %vm240_vm1, %v9075_v21  ;;  %v6762_v21 = vld [vmem:[%s9006_s4 + $0x54c] sm:$0xff]  ;;  %v9455_v12 = vld [vmem:[%s9006_s4 + $0x6a2] sm:$0xff] }
  0x6d   : > { %8082 = vmatprep.mubr.msk.f32.mxu0 %vm240_vm1, %v6758_v14  ;;  %8108 = vmatprep.mubr.msk.f32.mxu1 %vm240_vm1, %v9079_v23  ;;  %v6764_v23 = vld [vmem:[%s9006_s4 + $0x584] sm:$0xff] }
  0x6e   : > { %v6918_v14 = vld [vmem:[%s9006_s4 + $0x6a8] sm:$0xff] }
  0x70   : > { %8083 = vmatmul.mubr.msk.f32.gmra.mxu0 %vm240_vm1, %v6759_v16  ;;  %8109 = vmatmul.mubr.msk.f32.gmra.mxu1 %vm240_vm1, %v9089_v25  ;;  %v9327_v25 = vld [vmem:[%s10861_s1 + $0x28] sm:$0xf] }
  0x71   : > { %8085 = vmatprep.mubr.msk.f32.mxu0 %vm240_vm1, %v6760_v18  ;;  %8111 = vmatprep.mubr.msk.f32.mxu1 %vm240_vm1, %v9093_v27  ;;  %v6806_v27 = vld [vmem:[%s9006_s4 + $0x478] sm:$0xff]  ;;  %v9464_v16 = vld [vmem:[%s9006_s4 + $0x6aa] sm:$0xff] }
  0x72   : > { %v6919_v18 = vld [vmem:[%s9006_s4 + $0x6b0] sm:$0xff] }
  0x74   : > { %8086 = vmatmul.mubr.msk.f32.gmra.mxu0 %vm240_vm1, %v6761_v20  ;;  %8112 = vmatmul.mubr.msk.f32.gmra.mxu1 %vm240_vm1, %v9103_v29  ;;  %v6807_v29 = vld [vmem:[%s9006_s4 + $0x480] sm:$0xff] }
  0x75   : > { %8088 = vmatprep.mubr.msk.f32.mxu0 %vm240_vm1, %v6762_v21  ;;  %8114 = vmatprep.mubr.msk.f32.mxu1 %vm240_vm1, %v9109_v31  ;;  %v9468_v20 = vld [vmem:[%s9006_s4 + $0x6da] sm:$0xff] }
  0x78   : > { %8089 = vmatmul.mubr.msk.f32.gmra.mxu0 %vm240_vm1, %v6763_v22  ;;  %8115 = vmatmul.mubr.msk.f32.gmra.mxu1 %vm240_vm1, %v9122_v33 }
  0x79   : > { %8091 = vmatprep.mubr.msk.f32.mxu0 %vm240_vm1, %v6764_v23  ;;  %8117 = vmatprep.mubr.msk.f32.mxu1 %vm240_vm1, %v9128_v35 }
  0x7c   : > { %8092 = vmatmul.mubr.msk.f32.gmra.mxu0 %vm240_vm1, %v6765_v24  ;;  %8118 = vmatmul.mubr.msk.f32.gmra.mxu1 %vm240_vm1, %v9142_v37 }
  0x7d   : > { %8122 = vmatprep.mubr.msk.f32.mxu0 %vm240_vm1, %v9219_v0  ;;  %8148 = vmatprep.mubr.msk.f32.mxu1 %vm240_vm1, %v6762_v21  ;;  %v6913_v0 = vld [vmem:[%s9006_s4 + $0x608] sm:$0xff]  ;;  %v6920_v21 = vld [vmem:[%s9006_s4 + $0x6e0] sm:$0xff] }
  0x80   : > { %8123 = vmatmul.mubr.msk.f32.vlgmr.msra.gmra.mxu0 %vm240_vm1, %v6729_v1  ;;  %8149 = vmatmul.mubr.msk.f32.vlgmr.msra.gmra.mxu1 %vm240_vm1, %v6763_v22  ;;  %v6880_v1 = vld [vmem:[%s9006_s4 + $0x632] sm:$0xff]  ;;  %v9478_v22 = vld [vmem:[%s9006_s4 + $0x6e2] sm:$0xff] }
  0x81   : > { %8173 = vmatpush3.msk.msra.mxu0 %vm289_vm0, %v6888_v4  ;;  %8199 = vmatpush3.msk.msra.mxu1 %vm289_vm0, %v6922_v6  ;;  %v6915_v4 = vld [vmem:[%s9006_s4 + $0x640] sm:$0xff]  ;;  %v6882_v6 = vld [vmem:[%s9006_s4 + $0x66a] sm:$0xff] }
  0x82   : > { %8125 = vmatprep.mubr.msk.f32.mxu0 %vm240_vm1, %v9229_v2  ;;  %8151 = vmatprep.mubr.msk.f32.mxu1 %vm240_vm1, %v6764_v23  ;;  %v6914_v2 = vld [vmem:[%s9006_s4 + $0x638] sm:$0xff]  ;;  %v6921_v23 = vld [vmem:[%s9006_s4 + $0x6e8] sm:$0xff] }
  0x83   : > { %8224 = vmatprep.subr.msk.mxu0 %vm289_vm0, %v9327_v25  ;;  %8250 = vmatprep.subr.msk.mxu1 %vm289_vm0, %v9332_v26 }
  0x84   : > { %8126 = vmatmul.mubr.msk.f32.gmra.mxu0 %vm240_vm1, %v9239_v3  ;;  %8152 = vmatmul.mubr.msk.f32.gmra.mxu1 %vm240_vm1, %v6765_v24  ;;  %v6881_v3 = vld [vmem:[%s9006_s4 + $0x63a] sm:$0xff] }
  0x85   : > { %8128 = vmatprep.mubr.msk.f32.mxu0 %vm240_vm1, %v6806_v27  ;;  %8154 = vmatprep.mubr.msk.f32.mxu1 %vm240_vm1, %v6842_v28  ;;  %v6942_v24 = vld [vmem:[%s9006_s4 + $0x156] sm:$0xff]  ;;  %v6977_v27 = vld [vmem:[%s9006_s4 + $0x16a] sm:$0xff] }
  0x86   : > { %v6944_v28 = vld [vmem:[%s9006_s4 + $0x18e] sm:$0xff] }
  0x88   : > { %8129 = vmatmul.mubr.msk.f32.gmra.mxu0 %vm240_vm1, %v6807_v29  ;;  %8155 = vmatmul.mubr.msk.f32.gmra.mxu1 %vm240_vm1, %v6843_v30  ;;  %v6978_v29 = vld [vmem:[%s9006_s4 + $0x19a] sm:$0xff] }
  0x89   : > { %8131 = vmatprep.mubr.msk.f32.mxu0 %vm240_vm1, %v6808_v32  ;;  %8157 = vmatprep.mubr.msk.f32.mxu1 %vm240_vm1, %v6844_v34  ;;  %v9497_v30 = vld [vmem:[%s10861_s1 + $0x38] sm:$0xf]  ;;  %v9502_v32 = vld [vmem:[%s10861_s1 + $0x3c] sm:$0xf] }
  0x8a   : > { %v6945_v34 = vld [vmem:[%s9006_s4 + $0x196] sm:$0xff] }
  0x8c   : > { %8132 = vmatmul.mubr.msk.f32.gmra.mxu0 %vm240_vm1, %v6809_v36  ;;  %8158 = vmatmul.mubr.msk.f32.gmra.mxu1 %vm240_vm1, %v6845_v39  ;;  %v6979_v36 = vld [vmem:[%s9006_s4 + $0x1a2] sm:$0xff] }
  0x8d   : > { %8134 = vmatprep.mubr.msk.f32.mxu0 %vm240_vm1, %v6810_v41  ;;  %8160 = vmatprep.mubr.msk.f32.mxu1 %vm240_vm1, %v6846_v43  ;;  %v6946_v39 = vld [vmem:[%s9006_s4 + $0x1c6] sm:$0xff]  ;;  %v6980_v41 = vld [vmem:[%s9006_s4 + $0x1d2] sm:$0xff] }
  0x8e   : > { %v6947_v43 = vld [vmem:[%s9006_s4 + $0x1ce] sm:$0xff] }
  0x90   : > { %8135 = vmatmul.mubr.msk.f32.gmra.mxu0 %vm240_vm1, %v6811_v44  ;;  %8161 = vmatmul.mubr.msk.f32.gmra.mxu1 %vm240_vm1, %v6847_v45  ;;  %v6981_v44 = vld [vmem:[%s9006_s4 + $0x1da] sm:$0xff] }
  0x91   : > { %8137 = vmatprep.mubr.msk.f32.mxu0 %vm240_vm1, %v6812_v47  ;;  %8163 = vmatprep.mubr.msk.f32.mxu1 %vm240_vm1, %v6848_v48  ;;  %v6948_v45 = vld [vmem:[%s9006_s4 + $0x1fe] sm:$0xff]  ;;  %v6982_v47 = vld [vmem:[%s9006_s4 + $0x20a] sm:$0xff] }
  0x92   : > { %v6949_v48 = vld [vmem:[%s9006_s4 + $0x206] sm:$0xff] }
  0x94   : > { %8138 = vmatmul.mubr.msk.f32.gmra.mxu0 %vm240_vm1, %v6813_v49  ;;  %8164 = vmatmul.mubr.msk.f32.gmra.mxu1 %vm240_vm1, %v6849_v50  ;;  %v6983_v49 = vld [vmem:[%s9006_s4 + $0x212] sm:$0xff] }
  0x95   : > { %8140 = vmatprep.mubr.msk.f32.mxu0 %vm240_vm1, %v6814_v51  ;;  %8166 = vmatprep.mubr.msk.f32.mxu1 %vm240_vm1, %v6850_v52  ;;  %v6950_v50 = vld [vmem:[%s9006_s4 + $0x236] sm:$0xff]  ;;  %v6951_v52 = vld [vmem:[%s9006_s4 + $0x23e] sm:$0xff] }
  0x98   : > { %8141 = vmatmul.mubr.msk.f32.gmra.mxu0 %vm240_vm1, %v6815_v53  ;;  %8167 = vmatmul.mubr.msk.f32.gmra.mxu1 %vm240_vm1, %v6851_v54  ;;  %v6952_v54 = vld [vmem:[%s9006_s4 + $0x26e] sm:$0xff] }
  0x99   : > { %8143 = vmatprep.mubr.msk.f32.mxu0 %vm240_vm1, %v6816_v55  ;;  %8169 = vmatprep.mubr.msk.f32.mxu1 %vm240_vm1, %v6852_v56  ;;  %v6953_v56 = vld [vmem:[%s9006_s4 + $0x276] sm:$0xff] }
  0x9c   : > { %8144 = vmatmul.mubr.msk.f32.gmra.mxu0 %vm240_vm1, %v6817_v57  ;;  %8170 = vmatmul.mubr.msk.f32.gmra.mxu1 %vm240_vm1, %v6853_v58  ;;  %v6954_v58 = vld [vmem:[%s9006_s4 + $0x2a6] sm:$0xff] }
  0x9d   : > { %8174 = vmatprep.mubr.msk.f32.mxu0 %vm240_vm1, %v9109_v31  ;;  %8200 = vmatprep.mubr.msk.f32.mxu1 %vm240_vm1, %v6814_v51  ;;  %v6876_v31 = vld [vmem:[%s9006_s4 + $0x5c2] sm:$0xff] }
  0x9e   : > { %v6984_v51 = vld [vmem:[%s9006_s4 + $0x242] sm:$0xff] }
  0xa0   : > { %8175 = vmatmul.mubr.msk.f32.vlgmr.msra.gmra.mxu0 %vm240_vm1, %v9122_v33  ;;  %8201 = vmatmul.mubr.msk.f32.vlgmr.msra.gmra.mxu1 %vm240_vm1, %v6815_v53  ;;  %v6910_v33 = vld [vmem:[%s9006_s4 + $0x5c8] sm:$0xff] }
  0xa1   : > { %8225 = vmatpush3.msk.msra.mxu0 %vm289_vm0, %v9327_v25  ;;  %8251 = vmatpush3.msk.msra.mxu1 %vm289_vm0, %v9332_v26  ;;  %v6976_v25 = vld [vmem:[%s9006_s4 + $0x162] sm:$0xff]  ;;  %v6985_v53 = vld [vmem:[%s9006_s4 + $0x24a] sm:$0xff] }
  0xa2   : > { %8177 = vmatprep.mubr.msk.f32.mxu0 %vm240_vm1, %v9128_v35  ;;  %8203 = vmatprep.mubr.msk.f32.mxu1 %vm240_vm1, %v6816_v55  ;;  %v6877_v35 = vld [vmem:[%s9006_s4 + $0x5ca] sm:$0xff]  ;;  %v6943_v26 = vld [vmem:[%s9006_s4 + $0x15e] sm:$0xff] }
  0xa3   : > { %8276 = vmatprep.subr.msk.mxu0 %vm289_vm0, %v9403_v59  ;;  %8302 = vmatprep.subr.msk.mxu1 %vm289_vm0, %v9408_v60  ;;  %v6986_v55 = vld [vmem:[%s9006_s4 + $0x27a] sm:$0xff] }
  0xa4   : > { %8178 = vmatmul.mubr.msk.f32.gmra.mxu0 %vm240_vm1, %v9142_v37  ;;  %8204 = vmatmul.mubr.msk.f32.gmra.mxu1 %vm240_vm1, %v6817_v57  ;;  %v6879_v37 = vld [vmem:[%s9006_s4 + $0x602] sm:$0xff] }
  0xa5   : > { %8180 = vmatprep.mubr.msk.f32.mxu0 %vm240_vm1, %v6876_v31  ;;  %8206 = vmatprep.mubr.msk.f32.mxu1 %vm240_vm1, %v6910_v33  ;;  %v6987_v57 = vld [vmem:[%s9006_s4 + $0x282] sm:$0xff]  ;;  %v7010_v33 = vld [vmem:[%s9006_s4 + $0x16e] sm:$0xff] }
  0xa6   : > { %v6957_v31 = vld [vmem:[%s9006_s4 + $0x2e6] sm:$0xff] }
  0xa8   : > { %8181 = vmatmul.mubr.msk.f32.gmra.mxu0 %vm240_vm1, %v6877_v35  ;;  %8207 = vmatmul.mubr.msk.f32.gmra.mxu1 %vm240_vm1, %v6911_v61  ;;  %v7044_v35 = vld [vmem:[%s9006_s4 + $0x3f6] sm:$0xff]  ;;  %v7012_v61 = vld [vmem:[%s9006_s4 + $0x1a6] sm:$0xff] }
  0xa9   : > { %8183 = vmatprep.mubr.msk.f32.mxu0 %vm240_vm1, %v6878_v62  ;;  %8209 = vmatprep.mubr.msk.f32.mxu1 %vm240_vm1, %v6912_v63  ;;  %v7046_v62 = vld [vmem:[%s9006_s4 + $0x42e] sm:$0xff] }
  0xac   : > { %8184 = vmatmul.mubr.msk.f32.gmra.mxu0 %vm240_vm1, %v6879_v37  ;;  %8210 = vmatmul.mubr.msk.f32.gmra.mxu1 %vm240_vm1, %v6913_v0  ;;  %v9584_v37 = vld [vmem:[%s10861_s1 + $0x44] sm:$0xf] }
  0xad   : > { %8186 = vmatprep.mubr.msk.f32.mxu0 %vm240_vm1, %v6880_v1  ;;  %8212 = vmatprep.mubr.msk.f32.mxu1 %vm240_vm1, %v6914_v2  ;;  %v7013_v1 = vld [vmem:[%s9006_s4 + $0x1ae] sm:$0xff]  ;;  %v7047_v2 = vld [vmem:[%s9006_s4 + $0x436] sm:$0xff] }
  0xb0   : > { %8187 = vmatmul.mubr.msk.f32.gmra.mxu0 %vm240_vm1, %v6881_v3  ;;  %8213 = vmatmul.mubr.msk.f32.gmra.mxu1 %vm240_vm1, %v6915_v4 }
  0xb1   : > { %8189 = vmatprep.mubr.msk.f32.mxu0 %vm240_vm1, %v6882_v6  ;;  %8215 = vmatprep.mubr.msk.f32.mxu1 %vm240_vm1, %v6916_v8  ;;  %v7014_v6 = vld [vmem:[%s9006_s4 + $0x1de] sm:$0xff]  ;;  %v7048_v8 = vld [vmem:[%s9006_s4 + $0x466] sm:$0xff] }
  0xb4   : > { %8190 = vmatmul.mubr.msk.f32.gmra.mxu0 %vm240_vm1, %v6883_v10  ;;  %8216 = vmatmul.mubr.msk.f32.gmra.mxu1 %vm240_vm1, %v6917_v11 }
  0xb5   : > { %8192 = vmatprep.mubr.msk.f32.mxu0 %vm240_vm1, %v9455_v12  ;;  %8218 = vmatprep.mubr.msk.f32.mxu1 %vm240_vm1, %v6918_v14 }
  0xb8   : > { %8193 = vmatmul.mubr.msk.f32.gmra.mxu0 %vm240_vm1, %v9464_v16  ;;  %8219 = vmatmul.mubr.msk.f32.gmra.mxu1 %vm240_vm1, %v6919_v18 }
  0xb9   : > { %8195 = vmatprep.mubr.msk.f32.mxu0 %vm240_vm1, %v9468_v20  ;;  %8221 = vmatprep.mubr.msk.f32.mxu1 %vm240_vm1, %v6920_v21  ;;  %v7015_v21 = vld [vmem:[%s9006_s4 + $0x1e6] sm:$0xff] }
  0xbc   : > { %8196 = vmatmul.mubr.msk.f32.gmra.mxu0 %vm240_vm1, %v9478_v22  ;;  %8222 = vmatmul.mubr.msk.f32.gmra.mxu1 %vm240_vm1, %v6921_v23  ;;  %v7049_v23 = vld [vmem:[%s9006_s4 + $0x46e] sm:$0xff] }
  0xbd   : > { %8226 = vmatprep.mubr.msk.f32.mxu0 %vm240_vm1, %v6942_v24  ;;  %8252 = vmatprep.mubr.msk.f32.mxu1 %vm240_vm1, %v6976_v25 }
  0xc0   : > { %8227 = vmatmul.mubr.msk.f32.vlgmr.msra.gmra.mxu0 %vm240_vm1, %v6943_v26  ;;  %8253 = vmatmul.mubr.msk.f32.vlgmr.msra.gmra.mxu1 %vm240_vm1, %v6977_v27  ;;  %v7016_v26 = vld [vmem:[%s9006_s4 + $0x216] sm:$0xff]  ;;  %v7050_v27 = vld [vmem:[%s9006_s4 + $0x49e] sm:$0xff] }
  0xc1   : > { %8277 = vmatpush3.msk.msra.mxu0 %vm289_vm0, %v9403_v59  ;;  %8303 = vmatpush3.msk.msra.mxu1 %vm289_vm0, %v9408_v60  ;;  %v6955_v59 = vld [vmem:[%s9006_s4 + $0x2ae] sm:$0xff]  ;;  %v6956_v60 = vld [vmem:[%s9006_s4 + $0x2de] sm:$0xff] }
  0xc2   : > { %8229 = vmatprep.mubr.msk.f32.mxu0 %vm240_vm1, %v6944_v28  ;;  %8255 = vmatprep.mubr.msk.f32.mxu1 %vm240_vm1, %v6978_v29 }
  0xc3   : > { %8328 = vmatprep.subr.msk.mxu0 %vm289_vm0, %v9497_v30  ;;  %8354 = vmatprep.subr.msk.mxu1 %vm289_vm0, %v9502_v32 }
  0xc4   : > { %8230 = vmatmul.mubr.msk.f32.gmra.mxu0 %vm240_vm1, %v6945_v34  ;;  %8256 = vmatmul.mubr.msk.f32.gmra.mxu1 %vm240_vm1, %v6979_v36  ;;  %v7017_v34 = vld [vmem:[%s9006_s4 + $0x21e] sm:$0xff]  ;;  %v7051_v36 = vld [vmem:[%s9006_s4 + $0x4a6] sm:$0xff] }
  0xc5   : > { %8232 = vmatprep.mubr.msk.f32.mxu0 %vm240_vm1, %v6946_v39  ;;  %8258 = vmatprep.mubr.msk.f32.mxu1 %vm240_vm1, %v6980_v41 }
  0xc8   : > { %8233 = vmatmul.mubr.msk.f32.gmra.mxu0 %vm240_vm1, %v6947_v43  ;;  %8259 = vmatmul.mubr.msk.f32.gmra.mxu1 %vm240_vm1, %v6981_v44  ;;  %v7018_v43 = vld [vmem:[%s9006_s4 + $0x24e] sm:$0xff]  ;;  %v7052_v44 = vld [vmem:[%s9006_s4 + $0x4d6] sm:$0xff] }
  0xc9   : > { %8235 = vmatprep.mubr.msk.f32.mxu0 %vm240_vm1, %v6948_v45  ;;  %8261 = vmatprep.mubr.msk.f32.mxu1 %vm240_vm1, %v6982_v47 }
  0xcc   : > { %8236 = vmatmul.mubr.msk.f32.gmra.mxu0 %vm240_vm1, %v6949_v48  ;;  %8262 = vmatmul.mubr.msk.f32.gmra.mxu1 %vm240_vm1, %v6983_v49 }
  0xcd   : > { %8238 = vmatprep.mubr.msk.f32.mxu0 %vm240_vm1, %v6950_v50  ;;  %8264 = vmatprep.mubr.msk.f32.mxu1 %vm240_vm1, %v6984_v51  ;;  %v7019_v50 = vld [vmem:[%s9006_s4 + $0x256] sm:$0xff]  ;;  %v7053_v51 = vld [vmem:[%s9006_s4 + $0x4de] sm:$0xff] }
  0xd0   : > { %8239 = vmatmul.mubr.msk.f32.gmra.mxu0 %vm240_vm1, %v6951_v52  ;;  %8265 = vmatmul.mubr.msk.f32.gmra.mxu1 %vm240_vm1, %v6985_v53 }
  0xd1   : > { %8241 = vmatprep.mubr.msk.f32.mxu0 %vm240_vm1, %v6952_v54  ;;  %8267 = vmatprep.mubr.msk.f32.mxu1 %vm240_vm1, %v6986_v55  ;;  %v7020_v54 = vld [vmem:[%s9006_s4 + $0x286] sm:$0xff]  ;;  %v7054_v55 = vld [vmem:[%s9006_s4 + $0x50e] sm:$0xff] }
  0xd4   : > { %8242 = vmatmul.mubr.msk.f32.gmra.mxu0 %vm240_vm1, %v6953_v56  ;;  %8268 = vmatmul.mubr.msk.f32.gmra.mxu1 %vm240_vm1, %v6987_v57 }
  0xd5   : > { %8244 = vmatprep.mubr.msk.f32.mxu0 %vm240_vm1, %v6954_v58  ;;  %8270 = vmatprep.mubr.msk.f32.mxu1 %vm240_vm1, %v9145_v38  ;;  %v7011_v38 = vld [vmem:[%s9006_s4 + $0x176] sm:$0xff] }
  0xd8   : > { %8245 = vmatmul.mubr.msk.f32.gmra.mxu0 %vm240_vm1, %v6955_v59  ;;  %8271 = vmatmul.mubr.msk.f32.gmra.mxu1 %vm240_vm1, %v9156_v40  ;;  %v7045_v40 = vld [vmem:[%s9006_s4 + $0x3fe] sm:$0xff] }
  0xd9   : > { %8247 = vmatprep.mubr.msk.f32.mxu0 %vm240_vm1, %v6956_v60  ;;  %8273 = vmatprep.mubr.msk.f32.mxu1 %vm240_vm1, %v9160_v42  ;;  %v7021_v60 = vld [vmem:[%s9006_s4 + $0x28e] sm:$0xff] }
  0xdc   : > { %8248 = vmatmul.mubr.msk.f32.gmra.mxu0 %vm240_vm1, %v6957_v31  ;;  %8274 = vmatmul.mubr.msk.f32.gmra.mxu1 %vm240_vm1, %v9177_v46  ;;  %v9579_v46 = vld [vmem:[%s10861_s1 + $0x40] sm:$0xf]  ;;  %v7055_v31 = vld [vmem:[%s9006_s4 + $0x516] sm:$0xff] }
  0xdd   : > { %8278 = vmatprep.mubr.msk.f32.mxu0 %vm240_vm1, %v7010_v33  ;;  %8304 = vmatprep.mubr.msk.f32.mxu1 %vm240_vm1, %v7044_v35 }
  0xe0   : > { %v7968_v42 = vpop.f32.mrf.mxu0  ;;  %v7994_v63 = vpop.f32.mrf.mxu1  ;;  %8279 = vmatmul.mubr.msk.f32.vlgmr.msra.gmra.mxu0 %vm240_vm1, %v7011_v38  ;;  %8305 = vmatmul.mubr.msk.f32.vlgmr.msra.gmra.mxu1 %vm240_vm1, %v7045_v40  ;;  %v7022_v38 = vld [vmem:[%s9006_s4 + $0x2be] sm:$0xff]  ;;  %v7056_v40 = vld [vmem:[%s9006_s4 + $0x546] sm:$0xff] }
  0xe1   : > { %v9586_v0 = vadd.f32 %v7994_v63, %v7968_v42  ;;  %8329 = vmatpush3.msk.msra.mxu0 %vm289_vm0, %v9497_v30  ;;  %8355 = vmatpush3.msk.msra.mxu1 %vm289_vm0, %v9502_v32 }
  0xe2   : > { %v359_v3 = vpop.f32.mrf.mxu0  ;;  %v555_v4 = vpop.f32.mrf.mxu1  ;;  %8281 = vmatprep.mubr.msk.f32.mxu0 %vm240_vm1, %v7012_v61  ;;  %8307 = vmatprep.mubr.msk.f32.mxu1 %vm240_vm1, %v7046_v62 }
  0xe3   : > { %v9598_v10 = vadd.f32 %v555_v4, %v359_v3  ;;  %8380 = vmatprep.subr.msk.mxu0 %vm289_vm0, %v9579_v46  ;;  %8406 = vmatprep.subr.msk.mxu1 %vm289_vm0, %v9584_v37 }
  0xe4   : > { %v7971_v11 = vpop.f32.mrf.mxu0  ;;  %v7997_v14 = vpop.f32.mrf.mxu1  ;;  %8282 = vmatmul.mubr.msk.f32.gmra.mxu0 %vm240_vm1, %v7013_v1  ;;  %8308 = vmatmul.mubr.msk.f32.gmra.mxu1 %vm240_vm1, %v7047_v2  ;;  %v7023_v1 = vld [vmem:[%s9006_s4 + $0x2c6] sm:$0xff]  ;;  %v7057_v2 = vld [vmem:[%s9006_s4 + $0x54e] sm:$0xff] }
  0xe5   : > { %v9606_v18 = vadd.f32 %v7997_v14, %v7971_v11  ;;  %8284 = vmatprep.mubr.msk.f32.mxu0 %vm240_vm1, %v7014_v6  ;;  %8310 = vmatprep.mubr.msk.f32.mxu1 %vm240_vm1, %v7048_v8  ;;  %v7024_v6 = vld [vmem:[%s9006_s4 + $0x2f6] sm:$0xff]  ;;  %v7058_v8 = vld [vmem:[%s9006_s4 + $0x57e] sm:$0xff] }
  0xe6   : > { %v369_v24 = vpop.f32.mrf.mxu0  ;;  %v565_v25 = vpop.f32.mrf.mxu1 }
  0xe7   : > { %v9614_v28 = vadd.f32 %v565_v25, %v369_v24  ;;  %v7025_v24 = vld [vmem:[%s9006_s4 + $0x2fe] sm:$0xff]  ;;  %v7059_v25 = vld [vmem:[%s9006_s4 + $0x586] sm:$0xff] }
  0xe8   : > { %v7974_v29 = vpop.f32.mrf.mxu0  ;;  %v8000_v30 = vpop.f32.mrf.mxu1  ;;  %8285 = vmatmul.mubr.msk.f32.gmra.mxu0 %vm240_vm1, %v7015_v21  ;;  %8311 = vmatmul.mubr.msk.f32.gmra.mxu1 %vm240_vm1, %v7049_v23 }
  0xe9   : > { %v9618_v32 = vadd.f32 %v8000_v30, %v7974_v29  ;;  %8287 = vmatprep.mubr.msk.f32.mxu0 %vm240_vm1, %v7016_v26  ;;  %8313 = vmatprep.mubr.msk.f32.mxu1 %vm240_vm1, %v7050_v27  ;;  %v7096_v29 = vld [vmem:[%s9006_s4 + $0x40e] sm:$0xff] }
  0xea   : > { %v379_v39 = vpop.f32.mrf.mxu0  ;;  %v575_v41 = vpop.f32.mrf.mxu1 }
  0xeb   : > { %v9626_v45 = vadd.f32 %v575_v41, %v379_v39  ;;  %v7097_v41 = vld [vmem:[%s9006_s4 + $0x416] sm:$0xff] }
  0xec   : > { %v7977_v47 = vpop.f32.mrf.mxu0  ;;  %v8003_v48 = vpop.f32.mrf.mxu1  ;;  %8288 = vmatmul.mubr.msk.f32.gmra.mxu0 %vm240_vm1, %v7017_v34  ;;  %8314 = vmatmul.mubr.msk.f32.gmra.mxu1 %vm240_vm1, %v7051_v36 }
  0xed   : > { %v9630_v49 = vadd.f32 %v8003_v48, %v7977_v47  ;;  %8290 = vmatprep.mubr.msk.f32.mxu0 %vm240_vm1, %v7018_v43  ;;  %8316 = vmatprep.mubr.msk.f32.mxu1 %vm240_vm1, %v7052_v44  ;;  %v7098_v48 = vld [vmem:[%s9006_s4 + $0x446] sm:$0xff] }
  0xee   : > { %v389_v52 = vpop.f32.mrf.mxu0  ;;  %v585_v53 = vpop.f32.mrf.mxu1 }
  0xef   : > { %v9638_v56 = vadd.f32 %v585_v53, %v389_v52  ;;  %v9697_v52 = vld [vmem:[%s10861_s1 + $0x4c] sm:$0xf] }
  0xf0   : > { %v7980_v57 = vpop.f32.mrf.mxu0  ;;  %v8006_v58 = vpop.f32.mrf.mxu1  ;;  %8291 = vmatmul.mubr.msk.f32.gmra.mxu0 %vm240_vm1, %v7019_v50  ;;  %8317 = vmatmul.mubr.msk.f32.gmra.mxu1 %vm240_vm1, %v7053_v51 }
  0xf1   : > { %v9642_v59 = vadd.f32 %v8006_v58, %v7980_v57  ;;  %8293 = vmatprep.mubr.msk.f32.mxu0 %vm240_vm1, %v7020_v54  ;;  %8319 = vmatprep.mubr.msk.f32.mxu1 %vm240_vm1, %v7054_v55  ;;  %v7100_v57 = vld [vmem:[%s9006_s4 + $0x47e] sm:$0xff] }
  0xf2   : > { %v399_v33 = vpop.f32.mrf.mxu0  ;;  %v595_v35 = vpop.f32.mrf.mxu1 }
  0xf3   : > { %v9650_v61 = vadd.f32 %v595_v35, %v399_v33  ;;  %v7102_v35 = vld [vmem:[%s9006_s4 + $0x4b6] sm:$0xff] }
  0xf4   : > { %v7983_v62 = vpop.f32.mrf.mxu0  ;;  %v8009_v42 = vpop.f32.mrf.mxu1  ;;  %8294 = vmatmul.mubr.msk.f32.gmra.mxu0 %vm240_vm1, %v7021_v60  ;;  %8320 = vmatmul.mubr.msk.f32.gmra.mxu1 %vm240_vm1, %v7055_v31 }
  0xf5   : > { %v9654_v63 = vadd.f32 %v8009_v42, %v7983_v62  ;;  %8296 = vmatprep.mubr.msk.f32.mxu0 %vm240_vm1, %v7022_v38  ;;  %8322 = vmatprep.mubr.msk.f32.mxu1 %vm240_vm1, %v7056_v40  ;;  %v7103_v42 = vld [vmem:[%s9006_s4 + $0x4be] sm:$0xff] }
  0xf6   : > { %v409_v3 = vpop.f32.mrf.mxu0  ;;  %v605_v4 = vpop.f32.mrf.mxu1 }
  0xf7   : > { %v9662_v11 = vadd.f32 %v605_v4, %v409_v3 }
  0xf8   : > { %v7986_v14 = vpop.f32.mrf.mxu0  ;;  %v8012_v21 = vpop.f32.mrf.mxu1  ;;  %8297 = vmatmul.mubr.msk.f32.gmra.mxu0 %vm240_vm1, %v7023_v1  ;;  %8323 = vmatmul.mubr.msk.f32.gmra.mxu1 %vm240_vm1, %v7057_v2  ;;  %v7104_v2 = vld [vmem:[%s9006_s4 + $0x4ee] sm:$0xff] }
  0xf9   : > { %v9666_v23 = vadd.f32 %v8012_v21, %v7986_v14  ;;  %8299 = vmatprep.mubr.msk.f32.mxu0 %vm240_vm1, %v7024_v6  ;;  %8325 = vmatprep.mubr.msk.f32.mxu1 %vm240_vm1, %v7058_v8  ;;  %v8766_v8 = vld [vmem:[%s9006_s4 + $0x4b2] sm:$0xff]  ;;  %v8767_v14 = vld [vmem:[%s9006_s4 + $0x4e2] sm:$0xff] }
  0xfa   : > { %v419_v26 = vpop.f32.mrf.mxu0  ;;  %v615_v27 = vpop.f32.mrf.mxu1  ;;  %v7105_v21 = vld [vmem:[%s9006_s4 + $0x4f6] sm:$0xff] }
  0xfb   : > { %v9673_v30 = vadd.f32 %v615_v27, %v419_v26 }
  0xfc   : > { %v7989_v34 = vpop.f32.mrf.mxu0  ;;  %v8015_v36 = vpop.f32.mrf.mxu1  ;;  %8300 = vmatmul.mubr.msk.f32.gmra.mxu0 %vm240_vm1, %v7025_v24  ;;  %8326 = vmatmul.mubr.msk.f32.gmra.mxu1 %vm240_vm1, %v7059_v25  ;;  %v7106_v25 = vld [vmem:[%s9006_s4 + $0x526] sm:$0xff] }
  0xfd   : > { %v9677_v39 = vadd.f32 %v8015_v36, %v7989_v34  ;;  %8330 = vmatprep.mubr.msk.f32.mxu0 %vm240_vm1, %v9010_v5  ;;  %8356 = vmatprep.mubr.msk.f32.mxu1 %vm240_vm1, %v7096_v29  ;;  %v9692_v5 = vld [vmem:[%s10861_s1 + $0x48] sm:$0xf] }
  0xfe   : > { %v429_v43 = vpop.f32.mrf.mxu0  ;;  %v625_v44 = vpop.f32.mrf.mxu1  ;;  %v8768_v36 = vld [vmem:[%s9006_s4 + $0x4ea] sm:$0xff] }
  0xff   : > { %v9683_v47 = vadd.f32 %v625_v44, %v429_v43  ;;  %v8769_v43 = vld [vmem:[%s9006_s4 + $0x51a] sm:$0xff]  ;;  %v7107_v44 = vld [vmem:[%s9006_s4 + $0x52e] sm:$0xff] }
 0x100   : > { %v8020_v50 = vpop.f32.mrf.mxu0  ;;  %v8046_v51 = vpop.f32.mrf.mxu1  ;;  %8331 = vmatmul.mubr.msk.f32.vlgmr.msra.gmra.mxu0 %vm240_vm1, %v9017_v7  ;;  %8357 = vmatmul.mubr.msk.f32.vlgmr.msra.gmra.mxu1 %vm240_vm1, %v7097_v41  ;;  %v7099_v7 = vld [vmem:[%s9006_s4 + $0x44e] sm:$0xff] }
 0x101   : > { %v849_v53 = vadd.f32 %v8020_v50, %v9586_v0  ;;  %8381 = vmatpush3.msk.msra.mxu0 %vm289_vm0, %v9579_v46  ;;  %8407 = vmatpush3.msk.msra.mxu1 %vm289_vm0, %v9584_v37  ;;  %v7108_v50 = vld [vmem:[%s9006_s4 + $0x55e] sm:$0xff] }
 0x102   : > { %v769_v54 = vpop.f32.mrf.mxu0  ;;  %v999_v55 = vpop.f32.mrf.mxu1  ;;  %8333 = vmatprep.mubr.msk.f32.mxu0 %vm240_vm1, %v9021_v9  ;;  %8359 = vmatprep.mubr.msk.f32.mxu1 %vm240_vm1, %v7098_v48 }
 0x103   : > { %v9709_v58 = vadd.f32 %v8046_v51, %v849_v53  ;;  %v848_v0 = vadd.f32 %v769_v54, %v9598_v10  ;;  %8432 = vmatprep.subr.msk.mxu0 %vm289_vm0, %v9692_v5  ;;  %8458 = vmatprep.subr.msk.mxu1 %vm289_vm0, %v9697_v52  ;;  %v7101_v10 = vld [vmem:[%s9006_s4 + $0x486] sm:$0xff] }
 0x104   : > { %v8023_v46 = vpop.f32.mrf.mxu0  ;;  %v8049_v37 = vpop.f32.mrf.mxu1  ;;  %8334 = vmatmul.mubr.msk.f32.gmra.mxu0 %vm240_vm1, %v9040_v13  ;;  %8360 = vmatmul.mubr.msk.f32.gmra.mxu1 %vm240_vm1, %v7099_v7 }
 0x105   : > { %v9719_v9 = vadd.f32 %v999_v55, %v848_v0  ;;  %v851_v60 = vadd.f32 %v8023_v46, %v9606_v18  ;;  %8336 = vmatprep.mubr.msk.f32.mxu0 %vm240_vm1, %v9047_v15  ;;  %8362 = vmatprep.mubr.msk.f32.mxu1 %vm240_vm1, %v7100_v57  ;;  %v8770_v55 = vld [vmem:[%s9006_s4 + $0x522] sm:$0xff]  ;;  %v8771_v0 = vld [vmem:[%s9006_s4 + $0x552] sm:$0xff] }
 0x106   : > { %v779_v31 = vpop.f32.mrf.mxu0  ;;  %v1009_v33 = vpop.f32.mrf.mxu1  ;;  %v7109_v46 = vld [vmem:[%s9006_s4 + $0x566] sm:$0xff] }
 0x107   : > { %v9727_v38 = vadd.f32 %v8049_v37, %v851_v60  ;;  %v850_v13 = vadd.f32 %v779_v31, %v9614_v28  ;;  %v7110_v60 = vld [vmem:[%s9006_s4 + $0x596] sm:$0xff] }
 0x108   : > { %v8026_v40 = vpop.f32.mrf.mxu0  ;;  %v8052_v62 = vpop.f32.mrf.mxu1  ;;  %8337 = vmatmul.mubr.msk.f32.gmra.mxu0 %vm240_vm1, %v9061_v17  ;;  %8363 = vmatmul.mubr.msk.f32.gmra.mxu1 %vm240_vm1, %v7101_v10 }
 0x109   : > { %v9733_v15 = vadd.f32 %v1009_v33, %v850_v13  ;;  %v853_v18 = vadd.f32 %v8026_v40, %v9618_v32  ;;  %8339 = vmatprep.mubr.msk.f32.mxu0 %vm240_vm1, %v9065_v19  ;;  %8365 = vmatprep.mubr.msk.f32.mxu1 %vm240_vm1, %v7102_v35  ;;  %v8772_v13 = vld [vmem:[%s9006_s4 + $0x55a] sm:$0xff] }
 0x10a   : > { %v789_v28 = vpop.f32.mrf.mxu0  ;;  %v1019_v1 = vpop.f32.mrf.mxu1 }
 0x10b   : > { %v9741_v3 = vadd.f32 %v8052_v62, %v853_v18  ;;  %v852_v17 = vadd.f32 %v789_v28, %v9626_v45  ;;  %v8773_v62 = vld [vmem:[%s9006_s4 + $0x58a] sm:$0xff]  ;;  %v7111_v18 = vld [vmem:[%s9006_s4 + $0x59e] sm:$0xff]  ;;  %v7132_v28 = vld [vmem:[%s9006_s4 + $0x696] sm:$0xff] }
 0x10c   : > { %v8029_v4 = vpop.f32.mrf.mxu0  ;;  %v8055_v6 = vpop.f32.mrf.mxu1  ;;  %8340 = vmatmul.mubr.msk.f32.gmra.mxu0 %vm240_vm1, %v8766_v8  ;;  %8366 = vmatmul.mubr.msk.f32.gmra.mxu1 %vm240_vm1, %v7103_v42 }
 0x10d   : > { %v9747_v19 = vadd.f32 %v1019_v1, %v852_v17  ;;  %v855_v32 = vadd.f32 %v8029_v4, %v9630_v49  ;;  %8342 = vmatprep.mubr.msk.f32.mxu0 %vm240_vm1, %v8767_v14  ;;  %8368 = vmatprep.mubr.msk.f32.mxu1 %vm240_vm1, %v7104_v2 }
 0x10e   : > { %v799_v45 = vpop.f32.mrf.mxu0  ;;  %v1029_v24 = vpop.f32.mrf.mxu1 }
 0x10f   : > { %v9755_v26 = vadd.f32 %v8055_v6, %v855_v32  ;;  %v854_v27 = vadd.f32 %v799_v45, %v9638_v56  ;;  %v8774_v6 = vld [vmem:[%s9006_s4 + $0x592] sm:$0xff]  ;;  %v7133_v32 = vld [vmem:[%s9006_s4 + $0x69e] sm:$0xff] }
 0x110   : > { %v8032_v29 = vpop.f32.mrf.mxu0  ;;  %v8058_v34 = vpop.f32.mrf.mxu1  ;;  %8343 = vmatmul.mubr.msk.f32.gmra.mxu0 %vm240_vm1, %v8768_v36  ;;  %8369 = vmatmul.mubr.msk.f32.gmra.mxu1 %vm240_vm1, %v7105_v21 }
 0x111   : > { %v9761_v49 = vadd.f32 %v1029_v24, %v854_v27  ;;  %v857_v41 = vadd.f32 %v8032_v29, %v9642_v59  ;;  %8345 = vmatprep.mubr.msk.f32.mxu0 %vm240_vm1, %v8769_v43  ;;  %8371 = vmatprep.mubr.msk.f32.mxu1 %vm240_vm1, %v7106_v25  ;;  %v7134_v24 = vld [vmem:[%s9006_s4 + $0x6ce] sm:$0xff] }
 0x112   : > { %v809_v56 = vpop.f32.mrf.mxu0  ;;  %v1039_v48 = vpop.f32.mrf.mxu1  ;;  %v7170_v43 = vld [vmem:[%s9006_s4 + $0x712] sm:$0xff] }
 0x113   : > { %v9769_v51 = vadd.f32 %v8058_v34, %v857_v41  ;;  %v856_v53 = vadd.f32 %v809_v56, %v9650_v61  ;;  %v7136_v41 = vld [vmem:[%s9006_s4 + $0x706] sm:$0xff] }
 0x114   : > { %v8035_v7 = vpop.f32.mrf.mxu0  ;;  %v8061_v54 = vpop.f32.mrf.mxu1  ;;  %8346 = vmatmul.mubr.msk.f32.gmra.mxu0 %vm240_vm1, %v8770_v55  ;;  %8372 = vmatmul.mubr.msk.f32.gmra.mxu1 %vm240_vm1, %v7107_v44 }
 0x115   : > { %v9775_v59 = vadd.f32 %v1039_v48, %v856_v53  ;;  %v859_v57 = vadd.f32 %v8035_v7, %v9654_v63  ;;  %8348 = vmatprep.mubr.msk.f32.mxu0 %vm240_vm1, %v8771_v0  ;;  %8374 = vmatprep.mubr.msk.f32.mxu1 %vm240_vm1, %v7108_v50  ;;  %v7171_v48 = vld [vmem:[%s9006_s4 + $0x71a] sm:$0xff] }
 0x116   : > { %v819_v61 = vpop.f32.mrf.mxu0  ;;  %v1049_v37 = vpop.f32.mrf.mxu1  ;;  %v7138_v7 = vld [vmem:[%s9006_s4 + $0x73e] sm:$0xff] }
 0x117   : > { %v9783_v10 = vadd.f32 %v8061_v54, %v859_v57  ;;  %v858_v31 = vadd.f32 %v819_v61, %v9662_v11  ;;  %v7172_v54 = vld [vmem:[%s9006_s4 + $0x74a] sm:$0xff] }
 0x118   : > { %v8038_v33 = vpop.f32.mrf.mxu0  ;;  %v8064_v35 = vpop.f32.mrf.mxu1  ;;  %8349 = vmatmul.mubr.msk.f32.gmra.mxu0 %vm240_vm1, %v8772_v13  ;;  %8375 = vmatmul.mubr.msk.f32.gmra.mxu1 %vm240_vm1, %v7109_v46  ;;  %v7139_v61 = vld [vmem:[%s9006_s4 + $0x746] sm:$0xff] }
 0x119   : > { %v9789_v63 = vadd.f32 %v1049_v37, %v858_v31  ;;  %v861_v40 = vadd.f32 %v8038_v33, %v9666_v23  ;;  %8351 = vmatprep.mubr.msk.f32.mxu0 %vm240_vm1, %v8773_v62  ;;  %8377 = vmatprep.mubr.msk.f32.mxu1 %vm240_vm1, %v7110_v60  ;;  %v7173_v37 = vld [vmem:[%s9006_s4 + $0x752] sm:$0xff]  ;;  %v7174_v33 = vld [vmem:[%s9006_s4 + $0x782] sm:$0xff] }
 0x11a   : > { %v829_v11 = vpop.f32.mrf.mxu0  ;;  %v1059_v42 = vpop.f32.mrf.mxu1  ;;  %v7140_v31 = vld [vmem:[%s9006_s4 + $0x776] sm:$0xff] }
 0x11b   : > { %v9797_v1 = vadd.f32 %v8064_v35, %v861_v40  ;;  %v860_v2 = vadd.f32 %v829_v11, %v9673_v30  ;;  %v7141_v11 = vld [vmem:[%s9006_s4 + $0x77e] sm:$0xff] }
 0x11c   : > { %v8041_v17 = vpop.f32.mrf.mxu0  ;;  %v8067_v4 = vpop.f32.mrf.mxu1  ;;  %8352 = vmatmul.mubr.msk.f32.gmra.mxu0 %vm240_vm1, %v8774_v6  ;;  %8378 = vmatmul.mubr.msk.f32.gmra.mxu1 %vm240_vm1, %v7111_v18 }
 0x11d   : > { %v9803_v23 = vadd.f32 %v1059_v42, %v860_v2  ;;  %v863_v8 = vadd.f32 %v8041_v17, %v9677_v39  ;;  %8382 = vmatprep.mubr.msk.f32.mxu0 %vm240_vm1, %v7132_v28  ;;  %8408 = vmatprep.mubr.msk.f32.mxu1 %vm240_vm1, %v9455_v12  ;;  %v9820_v12 = vld [vmem:[%s10861_s1 + $0x50] sm:$0xf]  ;;  %v9825_v39 = vld [vmem:[%s10861_s1 + $0x54] sm:$0xf]  ;;  %v7176_v17 = vld [vmem:[%s9006_s4 + $0x7ba] sm:$0xff] }
 0x11e   : > { %v839_v14 = vpop.f32.mrf.mxu0  ;;  %v1069_v30 = vpop.f32.mrf.mxu1  ;;  %v7175_v42 = vld [vmem:[%s9006_s4 + $0x78a] sm:$0xff] }
 0x11f   : > { %v9810_v21 = vadd.f32 %v8067_v4, %v863_v8  ;;  %v862_v45 = vadd.f32 %v839_v14, %v9683_v47  ;;  %v7142_v2 = vld [vmem:[%s9006_s4 + $0x7ae] sm:$0xff] }
 0x120   : > { %v8072_v25 = vpop.f32.mrf.mxu0  ;;  %v8098_v27 = vpop.f32.mrf.mxu1  ;;  %8383 = vmatmul.mubr.msk.f32.vlgmr.msra.gmra.mxu0 %vm240_vm1, %v7133_v32  ;;  %8409 = vmatmul.mubr.msk.f32.vlgmr.msra.gmra.mxu1 %vm240_vm1, %v9464_v16  ;;  %v7135_v16 = vld [vmem:[%s9006_s4 + $0x6d6] sm:$0xff] }
 0x121   : > { %v9827_v47 = vadd.f32 %v1069_v30, %v862_v45  ;;  %v1309_v29 = vadd.f32 %v8072_v25, %v9709_v58  ;;  %8433 = vmatpush3.msk.msra.mxu0 %vm289_vm0, %v9692_v5  ;;  %8459 = vmatpush3.msk.msra.mxu1 %vm289_vm0, %v9697_v52  ;;  %v7143_v30 = vld [vmem:[%s9006_s4 + $0x7b6] sm:$0xff]  ;;  %v7177_v45 = vld [vmem:[%s9006_s4 + $0x7c2] sm:$0xff] }
 0x122   : > { %v1229_v34 = vpop.f32.mrf.mxu0  ;;  %v1395_v36 = vpop.f32.mrf.mxu1  ;;  %8385 = vmatprep.mubr.msk.f32.mxu0 %vm240_vm1, %v7134_v24  ;;  %8411 = vmatprep.mubr.msk.f32.mxu1 %vm240_vm1, %v9468_v20  ;;  %v7144_v25 = vld [vmem:[%s9006_s4 + $0x7e6] sm:$0xff] }
 0x123   : > { %v9840_v44 = vadd.f32 %v8098_v27, %v1309_v29  ;;  %v1308_v5 = vadd.f32 %v1229_v34, %v9719_v9  ;;  %8484 = vmatprep.subr.msk.mxu0 %vm289_vm0, %v9820_v12  ;;  %8510 = vmatprep.subr.msk.mxu1 %vm289_vm0, %v9825_v39  ;;  %v7137_v9 = vld [vmem:[%s9006_s4 + $0x70e] sm:$0xff] }
 0x124   : > { %v8075_v52 = vpop.f32.mrf.mxu0  ;;  %v8101_v58 = vpop.f32.mrf.mxu1  ;;  %8386 = vmatmul.mubr.msk.f32.gmra.mxu0 %vm240_vm1, %v7135_v16  ;;  %8412 = vmatmul.mubr.msk.f32.gmra.mxu1 %vm240_vm1, %v9478_v22  ;;  %v7178_v27 = vld [vmem:[%s9006_s4 + $0x7f2] sm:$0xff] }
 0x125   : > { %v9850_v20 = vadd.f32 %v1395_v36, %v1308_v5  ;;  %v1311_v56 = vadd.f32 %v8075_v52, %v9727_v38  ;;  %8388 = vmatprep.mubr.msk.f32.mxu0 %vm240_vm1, %v7136_v41  ;;  %8414 = vmatprep.mubr.msk.f32.mxu1 %vm240_vm1, %v7170_v43  ;;  %v7145_v43 = vld [vmem:[%s9006_s4 + $0x7ee] sm:$0xff]  ;;  %v7179_v5 = vld [vmem:[%s9006_s4 + $0x7fa] sm:$0xff] }
 0x126   : > { %v1239_v50 = vpop.f32.mrf.mxu0  ;;  %v1405_v53 = vpop.f32.mrf.mxu1 }
 0x127   : > { %v9859_v55 = vadd.f32 %v8101_v58, %v1311_v56  ;;  %v1310_v22 = vadd.f32 %v1239_v50, %v9733_v15  ;;  %v7146_v58 = vld [vmem:[%s9006_s4 + $0x81e] sm:$0xff]  ;;  %v7180_v56 = vld [vmem:[%s9006_s4 + $0x82a] sm:$0xff] }
 0x128   : > { %v8078_v57 = vpop.f32.mrf.mxu0  ;;  %v8104_v38 = vpop.f32.mrf.mxu1  ;;  %8389 = vmatmul.mubr.msk.f32.gmra.mxu0 %vm240_vm1, %v7137_v9  ;;  %8415 = vmatmul.mubr.msk.f32.gmra.mxu1 %vm240_vm1, %v7171_v48 }
 0x129   : > { %v9864_v0 = vadd.f32 %v1405_v53, %v1310_v22  ;;  %v1313_v46 = vadd.f32 %v8078_v57, %v9741_v3  ;;  %8391 = vmatprep.mubr.msk.f32.mxu0 %vm240_vm1, %v7138_v7  ;;  %8417 = vmatprep.mubr.msk.f32.mxu1 %vm240_vm1, %v7172_v54  ;;  %v7147_v54 = vld [vmem:[%s9006_s4 + $0x826] sm:$0xff]  ;;  %v7181_v22 = vld [vmem:[%s9006_s4 + $0x832] sm:$0xff] }
 0x12a   : > { %v1249_v60 = vpop.f32.mrf.mxu0  ;;  %v1415_v15 = vpop.f32.mrf.mxu1 }
 0x12b   : > { %v9873_v35 = vadd.f32 %v8104_v38, %v1313_v46  ;;  %v1312_v13 = vadd.f32 %v1249_v60, %v9747_v19  ;;  %v7200_v38 = vld [vmem:[%s9006_s4 + $0x6ae] sm:$0xff]  ;;  %v4427_v46 = vld [vmem:[%s9006_s4] sm:$0xff] }
 0x12c   : > { %v8081_v40 = vpop.f32.mrf.mxu0  ;;  %v8107_v3 = vpop.f32.mrf.mxu1  ;;  %8392 = vmatmul.mubr.msk.f32.gmra.mxu0 %vm240_vm1, %v7139_v61  ;;  %8418 = vmatmul.mubr.msk.f32.gmra.mxu1 %vm240_vm1, %v7173_v37 }
 0x12d   : > { %v9878_v62 = vadd.f32 %v1415_v15, %v1312_v13  ;;  %v1315_v18 = vadd.f32 %v8081_v40, %v9755_v26  ;;  %8394 = vmatprep.mubr.msk.f32.mxu0 %vm240_vm1, %v7140_v31  ;;  %8420 = vmatprep.mubr.msk.f32.mxu1 %vm240_vm1, %v7174_v33  ;;  %v7201_v33 = vld [vmem:[%s9006_s4 + $0x6b6] sm:$0xff]  ;;  %v4428_v13 = vld [vmem:[%s9006_s4 + $0x8] sm:$0xff] }
 0x12e   : > { %v1259_v28 = vpop.f32.mrf.mxu0  ;;  %v1425_v19 = vpop.f32.mrf.mxu1 }
 0x12f   : > { %v9887_v4 = vadd.f32 %v8107_v3, %v1315_v18  ;;  %v1314_v6 = vadd.f32 %v1259_v28, %v9761_v49 }
 0x130   : > { %v8084_v8 = vpop.f32.mrf.mxu0  ;;  %v8110_v26 = vpop.f32.mrf.mxu1  ;;  %8395 = vmatmul.mubr.msk.f32.gmra.mxu0 %vm240_vm1, %v7141_v11  ;;  %8421 = vmatmul.mubr.msk.f32.gmra.mxu1 %vm240_vm1, %v7175_v42  ;;  %v7202_v11 = vld [vmem:[%s9006_s4 + $0x6e6] sm:$0xff]  ;;  %v4429_v42 = vld [vmem:[%s9006_s4 + $0x38] sm:$0xff] }
 0x131   : > { %v9892_v32 = vadd.f32 %v1425_v19, %v1314_v6  ;;  %v1317_v14 = vadd.f32 %v8084_v8, %v9769_v51  ;;  %8397 = vmatprep.mubr.msk.f32.mxu0 %vm240_vm1, %v7142_v2  ;;  %8423 = vmatprep.mubr.msk.f32.mxu1 %vm240_vm1, %v7176_v17  ;;  %v9956_v2 = vld [vmem:[%s10861_s1 + $0x5c] sm:$0xf]  ;;  %v7203_v6 = vld [vmem:[%s9006_s4 + $0x6ee] sm:$0xff]  ;;  %v4430_v8 = vld [vmem:[%s9006_s4 + $0x40] sm:$0xff] }
 0x132   : > { %v1269_v24 = vpop.f32.mrf.mxu0  ;;  %v1435_v49 = vpop.f32.mrf.mxu1 }
 0x133   : > { %v9901_v29 = vadd.f32 %v8110_v26, %v1317_v14  ;;  %v1316_v16 = vadd.f32 %v1269_v24, %v9775_v59 }
 0x134   : > { %v8087_v34 = vpop.f32.mrf.mxu0  ;;  %v8113_v51 = vpop.f32.mrf.mxu1  ;;  %8398 = vmatmul.mubr.msk.f32.gmra.mxu0 %vm240_vm1, %v7143_v30  ;;  %8424 = vmatmul.mubr.msk.f32.gmra.mxu1 %vm240_vm1, %v7177_v45  ;;  %v7204_v30 = vld [vmem:[%s9006_s4 + $0x71e] sm:$0xff]  ;;  %v4431_v45 = vld [vmem:[%s9006_s4 + $0x70] sm:$0xff] }
 0x135   : > { %v9906_v36 = vadd.f32 %v1435_v49, %v1316_v16  ;;  %v1319_v41 = vadd.f32 %v8087_v34, %v9783_v10  ;;  %8400 = vmatprep.mubr.msk.f32.mxu0 %vm240_vm1, %v7144_v25  ;;  %8426 = vmatprep.mubr.msk.f32.mxu1 %vm240_vm1, %v7178_v27  ;;  %v4432_v27 = vld [vmem:[%s9006_s4 + $0x78] sm:$0xff] }
 0x136   : > { %v1279_v52 = vpop.f32.mrf.mxu0  ;;  %v1445_v59 = vpop.f32.mrf.mxu1 }
 0x137   : > { %v9915_v9 = vadd.f32 %v8113_v51, %v1319_v41  ;;  %v1318_v48 = vadd.f32 %v1279_v52, %v9789_v63  ;;  %v7206_v51 = vld [vmem:[%s9006_s4 + $0x756] sm:$0xff]  ;;  %v4433_v41 = vld [vmem:[%s9006_s4 + $0xa8] sm:$0xff] }
 0x138   : > { %v8090_v50 = vpop.f32.mrf.mxu0  ;;  %v8116_v10 = vpop.f32.mrf.mxu1  ;;  %8401 = vmatmul.mubr.msk.f32.gmra.mxu0 %vm240_vm1, %v7145_v43  ;;  %8427 = vmatmul.mubr.msk.f32.gmra.mxu1 %vm240_vm1, %v7179_v5 }
 0x139   : > { %v9920_v53 = vadd.f32 %v1445_v59, %v1318_v48  ;;  %v1321_v7 = vadd.f32 %v8090_v50, %v9797_v1  ;;  %8403 = vmatprep.mubr.msk.f32.mxu0 %vm240_vm1, %v7146_v58  ;;  %8429 = vmatprep.mubr.msk.f32.mxu1 %vm240_vm1, %v7180_v56  ;;  %v7207_v56 = vld [vmem:[%s9006_s4 + $0x75e] sm:$0xff]  ;;  %v4434_v48 = vld [vmem:[%s9006_s4 + $0xb0] sm:$0xff] }
 0x13a   : > { %v1289_v57 = vpop.f32.mrf.mxu0  ;;  %v1455_v63 = vpop.f32.mrf.mxu1 }
 0x13b   : > { %v9929_v61 = vadd.f32 %v8116_v10, %v1321_v7  ;;  %v1320_v37 = vadd.f32 %v1289_v57, %v9803_v23  ;;  %v7208_v10 = vld [vmem:[%s9006_s4 + $0x78e] sm:$0xff]  ;;  %v4435_v7 = vld [vmem:[%s9006_s4 + $0xe0] sm:$0xff] }
 0x13c   : > { %v8093_v60 = vpop.f32.mrf.mxu0  ;;  %v8119_v1 = vpop.f32.mrf.mxu1  ;;  %8404 = vmatmul.mubr.msk.f32.gmra.mxu0 %vm240_vm1, %v7147_v54  ;;  %8430 = vmatmul.mubr.msk.f32.gmra.mxu1 %vm240_vm1, %v7181_v22 }
 0x13d   : > { %v9934_v15 = vadd.f32 %v1455_v63, %v1320_v37  ;;  %v1323_v31 = vadd.f32 %v8093_v60, %v9810_v21  ;;  %8434 = vmatprep.mubr.msk.f32.mxu0 %vm240_vm1, %v7200_v38  ;;  %8460 = vmatprep.mubr.msk.f32.mxu1 %vm240_vm1, %v4427_v46  ;;  %v9951_v21 = vld [vmem:[%s10861_s1 + $0x58] sm:$0xf]  ;;  %v4436_v37 = vld [vmem:[%s9006_s4 + $0xe8] sm:$0xff] }
 0x13e   : > { %v1299_v40 = vpop.f32.mrf.mxu0  ;;  %v1465_v23 = vpop.f32.mrf.mxu1  ;;  %v7209_v46 = vld [vmem:[%s9006_s4 + $0x796] sm:$0xff] }
 0x13f   : > { %v9941_v3 = vadd.f32 %v8119_v1, %v1323_v31  ;;  %v1322_v18 = vadd.f32 %v1299_v40, %v9827_v47  ;;  %v7210_v1 = vld [vmem:[%s9006_s4 + $0x7c6] sm:$0xff]  ;;  %v4437_v31 = vld [vmem:[%s9006_s4 + $0x118] sm:$0xff] }
 0x140   : > { %v8124_v28 = vpop.f32.mrf.mxu0  ;;  %v8150_v19 = vpop.f32.mrf.mxu1  ;;  %8435 = vmatmul.mubr.msk.f32.vlgmr.msra.gmra.mxu0 %vm240_vm1, %v7201_v33  ;;  %8461 = vmatmul.mubr.msk.f32.vlgmr.msra.gmra.mxu1 %vm240_vm1, %v4428_v13 }
 0x141   : > { %v9958_v47 = vadd.f32 %v1465_v23, %v1322_v18  ;;  %v1705_v17 = vadd.f32 %v8124_v28, %v9840_v44  ;;  %8485 = vmatpush3.msk.msra.mxu0 %vm289_vm0, %v9820_v12  ;;  %8511 = vmatpush3.msk.msra.mxu1 %vm289_vm0, %v9825_v39 }
 0x142   : > { %v1625_v26 = vpop.f32.mrf.mxu0  ;;  %v1858_v14 = vpop.f32.mrf.mxu1  ;;  %8437 = vmatprep.mubr.msk.f32.mxu0 %vm240_vm1, %v7202_v11  ;;  %8463 = vmatprep.mubr.msk.f32.mxu1 %vm240_vm1, %v4429_v42  ;;  %v7211_v11 = vld [vmem:[%s9006_s4 + $0x7ce] sm:$0xff]  ;;  %v4438_v42 = vld [vmem:[%s9006_s4 + $0x120] sm:$0xff] }
 0x143   : > { %v9971_v24 = vadd.f32 %v8150_v19, %v1705_v17  ;;  %v1704_v12 = vadd.f32 %v1625_v26, %v9850_v20  ;;  %8536 = vmatprep.subr.msk.mxu0 %vm289_vm0, %v9951_v21  ;;  %8562 = vmatprep.subr.msk.mxu1 %vm289_vm0, %v9956_v2  ;;  %v7205_v20 = vld [vmem:[%s9006_s4 + $0x726] sm:$0xff]  ;;  %v7212_v19 = vld [vmem:[%s9006_s4 + $0x7fe] sm:$0xff]  ;;  %v4439_v17 = vld [vmem:[%s9006_s4 + $0x150] sm:$0xff] }
 0x144   : > { %v8127_v39 = vpop.f32.mrf.mxu0  ;;  %v8153_v44 = vpop.f32.mrf.mxu1  ;;  %8438 = vmatmul.mubr.msk.f32.gmra.mxu0 %vm240_vm1, %v7203_v6  ;;  %8464 = vmatmul.mubr.msk.f32.gmra.mxu1 %vm240_vm1, %v4430_v8 }
 0x145   : > { %v9980_v49 = vadd.f32 %v1858_v14, %v1704_v12  ;;  %v1707_v25 = vadd.f32 %v8127_v39, %v9859_v55  ;;  %8440 = vmatprep.mubr.msk.f32.mxu0 %vm240_vm1, %v7204_v30  ;;  %8466 = vmatprep.mubr.msk.f32.mxu1 %vm240_vm1, %v4431_v45  ;;  %v7213_v45 = vld [vmem:[%s9006_s4 + $0x806] sm:$0xff]  ;;  %v4440_v12 = vld [vmem:[%s9006_s4 + $0x158] sm:$0xff] }
 0x146   : > { %v1635_v16 = vpop.f32.mrf.mxu0  ;;  %v1868_v34 = vpop.f32.mrf.mxu1 }
 0x147   : > { %v9989_v43 = vadd.f32 %v8153_v44, %v1707_v25  ;;  %v1706_v5 = vadd.f32 %v1635_v16, %v9864_v0  ;;  %v7214_v44 = vld [vmem:[%s9006_s4 + $0x836] sm:$0xff]  ;;  %v4441_v25 = vld [vmem:[%s9006_s4 + $0x188] sm:$0xff] }
 0x148   : > { %v8130_v52 = vpop.f32.mrf.mxu0  ;;  %v8156_v55 = vpop.f32.mrf.mxu1  ;;  %8441 = vmatmul.mubr.msk.f32.gmra.mxu0 %vm240_vm1, %v7205_v20  ;;  %8467 = vmatmul.mubr.msk.f32.gmra.mxu1 %vm240_vm1, %v4432_v27 }
 0x149   : > { %v9994_v59 = vadd.f32 %v1868_v34, %v1706_v5  ;;  %v1709_v58 = vadd.f32 %v8130_v52, %v9873_v35  ;;  %8443 = vmatprep.mubr.msk.f32.mxu0 %vm240_vm1, %v7206_v51  ;;  %8469 = vmatprep.mubr.msk.f32.mxu1 %vm240_vm1, %v4433_v41  ;;  %v7215_v41 = vld [vmem:[%s9006_s4 + $0x83e] sm:$0xff]  ;;  %v4442_v5 = vld [vmem:[%s9006_s4 + $0x190] sm:$0xff] }
 0x14a   : > { %v1645_v50 = vpop.f32.mrf.mxu0  ;;  %v1878_v0 = vpop.f32.mrf.mxu1 }
 0x14b   : > { %v10003_v54 = vadd.f32 %v8156_v55, %v1709_v58  ;;  %v1708_v22 = vadd.f32 %v1645_v50, %v9878_v62  ;;  %v4657_v55 = vld [vmem:[%s9006_s4 + $0x12] sm:$0xff]  ;;  %v4887_v58 = vld [vmem:[%s9006_s4 + $0x24] sm:$0xff] }
 0x14c   : > { %v8133_v57 = vpop.f32.mrf.mxu0  ;;  %v8159_v35 = vpop.f32.mrf.mxu1  ;;  %8444 = vmatmul.mubr.msk.f32.gmra.mxu0 %vm240_vm1, %v7207_v56  ;;  %8470 = vmatmul.mubr.msk.f32.gmra.mxu1 %vm240_vm1, %v4434_v48 }
 0x14d   : > { %v10008_v63 = vadd.f32 %v1878_v0, %v1708_v22  ;;  %v1711_v38 = vadd.f32 %v8133_v57, %v9887_v4  ;;  %8446 = vmatprep.mubr.msk.f32.mxu0 %vm240_vm1, %v7208_v10  ;;  %8472 = vmatprep.mubr.msk.f32.mxu1 %vm240_vm1, %v4435_v7  ;;  %v4658_v7 = vld [vmem:[%s9006_s4 + $0x1a] sm:$0xff]  ;;  %v4888_v22 = vld [vmem:[%s9006_s4 + $0x2c] sm:$0xff] }
 0x14e   : > { %v1655_v60 = vpop.f32.mrf.mxu0  ;;  %v1888_v62 = vpop.f32.mrf.mxu1 }
 0x14f   : > { %v10017_v33 = vadd.f32 %v8159_v35, %v1711_v38  ;;  %v1710_v13 = vadd.f32 %v1655_v60, %v9892_v32 }
 0x150   : > { %v8136_v40 = vpop.f32.mrf.mxu0  ;;  %v8162_v4 = vpop.f32.mrf.mxu1  ;;  %8447 = vmatmul.mubr.msk.f32.gmra.mxu0 %vm240_vm1, %v7209_v46  ;;  %8473 = vmatmul.mubr.msk.f32.gmra.mxu1 %vm240_vm1, %v4436_v37  ;;  %v4659_v46 = vld [vmem:[%s9006_s4 + $0x4a] sm:$0xff]  ;;  %v4889_v37 = vld [vmem:[%s9006_s4 + $0x5c] sm:$0xff] }
 0x151   : > { %v10022_v23 = vadd.f32 %v1888_v62, %v1710_v13  ;;  %v1713_v18 = vadd.f32 %v8136_v40, %v9901_v29  ;;  %8449 = vmatprep.mubr.msk.f32.mxu0 %vm240_vm1, %v7210_v1  ;;  %8475 = vmatprep.mubr.msk.f32.mxu1 %vm240_vm1, %v4437_v31  ;;  %v10086_v1 = vld [vmem:[%s10861_s1 + $0x64] sm:$0xf]  ;;  %v4660_v13 = vld [vmem:[%s9006_s4 + $0x52] sm:$0xff] }
 0x152   : > { %v1665_v28 = vpop.f32.mrf.mxu0  ;;  %v1898_v32 = vpop.f32.mrf.mxu1  ;;  %v4890_v40 = vld [vmem:[%s9006_s4 + $0x64] sm:$0xff] }
 0x153   : > { %v10031_v6 = vadd.f32 %v8162_v4, %v1713_v18  ;;  %v1712_v8 = vadd.f32 %v1665_v28, %v9906_v36 }
 0x154   : > { %v8139_v26 = vpop.f32.mrf.mxu0  ;;  %v8165_v29 = vpop.f32.mrf.mxu1  ;;  %8450 = vmatmul.mubr.msk.f32.gmra.mxu0 %vm240_vm1, %v7211_v11  ;;  %8476 = vmatmul.mubr.msk.f32.gmra.mxu1 %vm240_vm1, %v4438_v42  ;;  %v4661_v11 = vld [vmem:[%s9006_s4 + $0x82] sm:$0xff]  ;;  %v4891_v42 = vld [vmem:[%s9006_s4 + $0x94] sm:$0xff] }
 0x155   : > { %v10036_v14 = vadd.f32 %v1898_v32, %v1712_v8  ;;  %v1715_v30 = vadd.f32 %v8139_v26, %v9915_v9  ;;  %8452 = vmatprep.mubr.msk.f32.mxu0 %vm240_vm1, %v7212_v19  ;;  %8478 = vmatprep.mubr.msk.f32.mxu1 %vm240_vm1, %v4439_v17  ;;  %v4892_v17 = vld [vmem:[%s9006_s4 + $0x9c] sm:$0xff] }
 0x156   : > { %v1675_v39 = vpop.f32.mrf.mxu0  ;;  %v1908_v36 = vpop.f32.mrf.mxu1 }
 0x157   : > { %v10045_v20 = vadd.f32 %v8165_v29, %v1715_v30  ;;  %v1714_v27 = vadd.f32 %v1675_v39, %v9920_v53  ;;  %v4663_v29 = vld [vmem:[%s9006_s4 + $0xba] sm:$0xff]  ;;  %v4893_v30 = vld [vmem:[%s9006_s4 + $0xcc] sm:$0xff] }
 0x158   : > { %v8142_v16 = vpop.f32.mrf.mxu0  ;;  %v8168_v9 = vpop.f32.mrf.mxu1  ;;  %8453 = vmatmul.mubr.msk.f32.gmra.mxu0 %vm240_vm1, %v7213_v45  ;;  %8479 = vmatmul.mubr.msk.f32.gmra.mxu1 %vm240_vm1, %v4440_v12 }
 0x159   : > { %v10050_v34 = vadd.f32 %v1908_v36, %v1714_v27  ;;  %v1717_v51 = vadd.f32 %v8142_v16, %v9929_v61  ;;  %8455 = vmatprep.mubr.msk.f32.mxu0 %vm240_vm1, %v7214_v44  ;;  %8481 = vmatprep.mubr.msk.f32.mxu1 %vm240_vm1, %v4441_v25  ;;  %v4664_v25 = vld [vmem:[%s9006_s4 + $0xc2] sm:$0xff]  ;;  %v4894_v27 = vld [vmem:[%s9006_s4 + $0xd4] sm:$0xff] }
 0x15a   : > { %v1685_v52 = vpop.f32.mrf.mxu0  ;;  %v1918_v53 = vpop.f32.mrf.mxu1 }
 0x15b   : > { %v10059_v56 = vadd.f32 %v8168_v9, %v1717_v51  ;;  %v1716_v48 = vadd.f32 %v1685_v52, %v9934_v15  ;;  %v4665_v9 = vld [vmem:[%s9006_s4 + $0xf2] sm:$0xff]  ;;  %v4895_v51 = vld [vmem:[%s9006_s4 + $0x104] sm:$0xff] }
 0x15c   : > { %v8145_v50 = vpop.f32.mrf.mxu0  ;;  %v8171_v61 = vpop.f32.mrf.mxu1  ;;  %8456 = vmatmul.mubr.msk.f32.gmra.mxu0 %vm240_vm1, %v7215_v41  ;;  %8482 = vmatmul.mubr.msk.f32.gmra.mxu1 %vm240_vm1, %v4442_v5 }
 0x15d   : > { %v10064_v0 = vadd.f32 %v1918_v53, %v1716_v48  ;;  %v1719_v10 = vadd.f32 %v8145_v50, %v9941_v3  ;;  %8486 = vmatprep.mubr.msk.f32.mxu0 %vm240_vm1, %v4657_v55  ;;  %8512 = vmatprep.mubr.msk.f32.mxu1 %vm240_vm1, %v4887_v58  ;;  %v10081_v3 = vld [vmem:[%s10861_s1 + $0x60] sm:$0xf]  ;;  %v4896_v48 = vld [vmem:[%s9006_s4 + $0x10c] sm:$0xff] }
 0x15e   : > { %v1695_v57 = vpop.f32.mrf.mxu0  ;;  %v1928_v15 = vpop.f32.mrf.mxu1  ;;  %v4666_v58 = vld [vmem:[%s9006_s4 + $0xfa] sm:$0xff] }
 0x15f   : > { %v10071_v35 = vadd.f32 %v8171_v61, %v1719_v10  ;;  %v1718_v38 = vadd.f32 %v1695_v57, %v9958_v47  ;;  %v4667_v61 = vld [vmem:[%s9006_s4 + $0x12a] sm:$0xff]  ;;  %v4897_v10 = vld [vmem:[%s9006_s4 + $0x13c] sm:$0xff] }
 0x160   : > { %v8176_v60 = vpop.f32.mrf.mxu0  ;;  %v8202_v62 = vpop.f32.mrf.mxu1  ;;  %8487 = vmatmul.mubr.msk.f32.vlgmr.msra.gmra.mxu0 %vm240_vm1, %v4658_v7  ;;  %8513 = vmatmul.mubr.msk.f32.vlgmr.msra.gmra.mxu1 %vm240_vm1, %v4888_v22 }
 0x161   : > { %v10088_v47 = vadd.f32 %v1928_v15, %v1718_v38  ;;  %v2168_v31 = vadd.f32 %v8176_v60, %v9971_v24  ;;  %8537 = vmatpush3.msk.msra.mxu0 %vm289_vm0, %v9951_v21  ;;  %8563 = vmatpush3.msk.msra.mxu1 %vm289_vm0, %v9956_v2 }
 0x162   : > { %v2088_v4 = vpop.f32.mrf.mxu0  ;;  %v2318_v18 = vpop.f32.mrf.mxu1  ;;  %8489 = vmatprep.mubr.msk.f32.mxu0 %vm240_vm1, %v4659_v46  ;;  %8515 = vmatprep.mubr.msk.f32.mxu1 %vm240_vm1, %v4889_v37  ;;  %v4668_v46 = vld [vmem:[%s9006_s4 + $0x132] sm:$0xff]  ;;  %v4898_v37 = vld [vmem:[%s9006_s4 + $0x144] sm:$0xff] }
 0x163   : > { %v10101_v28 = vadd.f32 %v8202_v62, %v2168_v31  ;;  %v2167_v21 = vadd.f32 %v2088_v4, %v9980_v49  ;;  %8588 = vmatprep.subr.msk.mxu0 %vm289_vm0, %v10081_v3  ;;  %8614 = vmatprep.subr.msk.mxu1 %vm289_vm0, %v10086_v1  ;;  %v4662_v49 = vld [vmem:[%s9006_s4 + $0x8a] sm:$0xff]  ;;  %v4669_v62 = vld [vmem:[%s9006_s4 + $0x162] sm:$0xff]  ;;  %v4899_v31 = vld [vmem:[%s9006_s4 + $0x174] sm:$0xff] }
 0x164   : > { %v8179_v2 = vpop.f32.mrf.mxu0  ;;  %v8205_v24 = vpop.f32.mrf.mxu1  ;;  %8490 = vmatmul.mubr.msk.f32.gmra.mxu0 %vm240_vm1, %v4660_v13  ;;  %8516 = vmatmul.mubr.msk.f32.gmra.mxu1 %vm240_vm1, %v4890_v40 }
 0x165   : > { %v10110_v32 = vadd.f32 %v2318_v18, %v2167_v21  ;;  %v2170_v19 = vadd.f32 %v8179_v2, %v9989_v43  ;;  %8492 = vmatprep.mubr.msk.f32.mxu0 %vm240_vm1, %v4661_v11  ;;  %8518 = vmatprep.mubr.msk.f32.mxu1 %vm240_vm1, %v4891_v42  ;;  %v4670_v42 = vld [vmem:[%s9006_s4 + $0x16a] sm:$0xff]  ;;  %v4900_v21 = vld [vmem:[%s9006_s4 + $0x17c] sm:$0xff] }
 0x166   : > { %v2098_v8 = vpop.f32.mrf.mxu0  ;;  %v2328_v26 = vpop.f32.mrf.mxu1 }
 0x167   : > { %v10119_v45 = vadd.f32 %v8205_v24, %v2170_v19  ;;  %v2169_v12 = vadd.f32 %v2098_v8, %v9994_v59  ;;  %v4671_v24 = vld [vmem:[%s9006_s4 + $0x19a] sm:$0xff]  ;;  %v4901_v19 = vld [vmem:[%s9006_s4 + $0x1ac] sm:$0xff] }
 0x168   : > { %v8182_v39 = vpop.f32.mrf.mxu0  ;;  %v8208_v43 = vpop.f32.mrf.mxu1  ;;  %8493 = vmatmul.mubr.msk.f32.gmra.mxu0 %vm240_vm1, %v4662_v49  ;;  %8519 = vmatmul.mubr.msk.f32.gmra.mxu1 %vm240_vm1, %v4892_v17 }
 0x169   : > { %v10124_v36 = vadd.f32 %v2328_v26, %v2169_v12  ;;  %v2172_v44 = vadd.f32 %v8182_v39, %v10003_v54  ;;  %8495 = vmatprep.mubr.msk.f32.mxu0 %vm240_vm1, %v4663_v29  ;;  %8521 = vmatprep.mubr.msk.f32.mxu1 %vm240_vm1, %v4893_v30  ;;  %v4672_v30 = vld [vmem:[%s9006_s4 + $0x1a2] sm:$0xff]  ;;  %v4902_v12 = vld [vmem:[%s9006_s4 + $0x1b4] sm:$0xff] }
 0x16a   : > { %v2108_v16 = vpop.f32.mrf.mxu0  ;;  %v2338_v59 = vpop.f32.mrf.mxu1 }
 0x16b   : > { %v10133_v41 = vadd.f32 %v8208_v43, %v2172_v44  ;;  %v2171_v5 = vadd.f32 %v2108_v16, %v10008_v63  ;;  %v7289_v43 = vld [vmem:[%s9006_s4 + $0x3f0] sm:$0xff] }
 0x16c   : > { %v8185_v52 = vpop.f32.mrf.mxu0  ;;  %v8211_v54 = vpop.f32.mrf.mxu1  ;;  %8496 = vmatmul.mubr.msk.f32.gmra.mxu0 %vm240_vm1, %v4664_v25  ;;  %8522 = vmatmul.mubr.msk.f32.gmra.mxu1 %vm240_vm1, %v4894_v27 }
 0x16d   : > { %v10138_v53 = vadd.f32 %v2338_v59, %v2171_v5  ;;  %v2174_v55 = vadd.f32 %v8185_v52, %v10017_v33  ;;  %8498 = vmatprep.mubr.msk.f32.mxu0 %vm240_vm1, %v4665_v9  ;;  %8524 = vmatprep.mubr.msk.f32.mxu1 %vm240_vm1, %v4895_v51  ;;  %v8775_v9 = vld [vmem:[%s9006_s4 + $0x402] sm:$0xff]  ;;  %v7290_v51 = vld [vmem:[%s9006_s4 + $0x3f8] sm:$0xff] }
 0x16e   : > { %v2118_v50 = vpop.f32.mrf.mxu0  ;;  %v2348_v63 = vpop.f32.mrf.mxu1 }
 0x16f   : > { %v10147_v7 = vadd.f32 %v8211_v54, %v2174_v55  ;;  %v2173_v22 = vadd.f32 %v2118_v50, %v10022_v23  ;;  %v7291_v55 = vld [vmem:[%s9006_s4 + $0x428] sm:$0xff] }
 0x170   : > { %v8188_v57 = vpop.f32.mrf.mxu0  ;;  %v8214_v33 = vpop.f32.mrf.mxu1  ;;  %8499 = vmatmul.mubr.msk.f32.gmra.mxu0 %vm240_vm1, %v4666_v58  ;;  %8525 = vmatmul.mubr.msk.f32.gmra.mxu1 %vm240_vm1, %v4896_v48  ;;  %v10210_v50 = vld [vmem:[%s10861_s1 + $0x68] sm:$0xf] }
 0x171   : > { %v10152_v15 = vadd.f32 %v2348_v63, %v2173_v22  ;;  %v2176_v38 = vadd.f32 %v8188_v57, %v10031_v6  ;;  %8501 = vmatprep.mubr.msk.f32.mxu0 %vm240_vm1, %v4667_v61  ;;  %8527 = vmatprep.mubr.msk.f32.mxu1 %vm240_vm1, %v4897_v10  ;;  %v10215_v63 = vld [vmem:[%s10861_s1 + $0x6c] sm:$0xf]  ;;  %v7292_v10 = vld [vmem:[%s9006_s4 + $0x430] sm:$0xff] }
 0x172   : > { %v2128_v60 = vpop.f32.mrf.mxu0  ;;  %v2358_v23 = vpop.f32.mrf.mxu1 }
 0x173   : > { %v10161_v13 = vadd.f32 %v8214_v33, %v2176_v38  ;;  %v2175_v40 = vadd.f32 %v2128_v60, %v10036_v14  ;;  %v8777_v33 = vld [vmem:[%s9006_s4 + $0x43a] sm:$0xff] }
 0x174   : > { %v8191_v4 = vpop.f32.mrf.mxu0  ;;  %v8217_v6 = vpop.f32.mrf.mxu1  ;;  %8502 = vmatmul.mubr.msk.f32.gmra.mxu0 %vm240_vm1, %v4668_v46  ;;  %8528 = vmatmul.mubr.msk.f32.gmra.mxu1 %vm240_vm1, %v4898_v37  ;;  %v7293_v38 = vld [vmem:[%s9006_s4 + $0x460] sm:$0xff] }
 0x175   : > { %v10166_v18 = vadd.f32 %v2358_v23, %v2175_v40  ;;  %v2178_v11 = vadd.f32 %v8191_v4, %v10045_v20  ;;  %8504 = vmatprep.mubr.msk.f32.mxu0 %vm240_vm1, %v4669_v62  ;;  %8530 = vmatprep.mubr.msk.f32.mxu1 %vm240_vm1, %v4899_v31  ;;  %v8778_v37 = vld [vmem:[%s9006_s4 + $0x442] sm:$0xff]  ;;  %v7295_v4 = vld [vmem:[%s9006_s4 + $0x498] sm:$0xff] }
 0x176   : > { %v2138_v2 = vpop.f32.mrf.mxu0  ;;  %v2368_v14 = vpop.f32.mrf.mxu1  ;;  %v7294_v62 = vld [vmem:[%s9006_s4 + $0x468] sm:$0xff] }
 0x177   : > { %v10175_v49 = vadd.f32 %v8217_v6, %v2178_v11  ;;  %v2177_v17 = vadd.f32 %v2138_v2, %v10050_v34 }
 0x178   : > { %v8194_v8 = vpop.f32.mrf.mxu0  ;;  %v8220_v26 = vpop.f32.mrf.mxu1  ;;  %8505 = vmatmul.mubr.msk.f32.gmra.mxu0 %vm240_vm1, %v4670_v42  ;;  %8531 = vmatmul.mubr.msk.f32.gmra.mxu1 %vm240_vm1, %v4900_v21 }
 0x179   : > { %v10180_v20 = vadd.f32 %v2368_v14, %v2177_v17  ;;  %v2180_v29 = vadd.f32 %v8194_v8, %v10059_v56  ;;  %8507 = vmatprep.mubr.msk.f32.mxu0 %vm240_vm1, %v4671_v24  ;;  %8533 = vmatprep.mubr.msk.f32.mxu1 %vm240_vm1, %v4901_v19  ;;  %v8781_v24 = vld [vmem:[%s9006_s4 + $0x4aa] sm:$0xff]  ;;  %v7296_v19 = vld [vmem:[%s9006_s4 + $0x4a0] sm:$0xff] }
 0x17a   : > { %v2148_v39 = vpop.f32.mrf.mxu0  ;;  %v2378_v34 = vpop.f32.mrf.mxu1  ;;  %v7297_v8 = vld [vmem:[%s9006_s4 + $0x4d0] sm:$0xff] }
 0x17b   : > { %v10188_v44 = vadd.f32 %v8220_v26, %v2180_v29  ;;  %v2179_v25 = vadd.f32 %v2148_v39, %v10064_v0 }
 0x17c   : > { %v8197_v27 = vpop.f32.mrf.mxu0  ;;  %v8223_v16 = vpop.f32.mrf.mxu1  ;;  %8508 = vmatmul.mubr.msk.f32.gmra.mxu0 %vm240_vm1, %v4672_v30  ;;  %8534 = vmatmul.mubr.msk.f32.gmra.mxu1 %vm240_vm1, %v4902_v12 }
 0x17d   : > { %v10193_v56 = vadd.f32 %v2378_v34, %v2179_v25  ;;  %v2182_v59 = vadd.f32 %v8197_v27, %v10071_v35  ;;  %8538 = vmatprep.mubr.msk.f32.mxu0 %vm240_vm1, %v7289_v43  ;;  %8564 = vmatprep.mubr.msk.f32.mxu1 %vm240_vm1, %v8775_v9  ;;  %v8776_v35 = vld [vmem:[%s9006_s4 + $0x40a] sm:$0xff]  ;;  %v8783_v43 = vld [vmem:[%s9006_s4 + $0x4e2] sm:$0xff]  ;;  %v7298_v25 = vld [vmem:[%s9006_s4 + $0x4d8] sm:$0xff] }
 0x17e   : > { %v2158_v5 = vpop.f32.mrf.mxu0  ;;  %v2388_v0 = vpop.f32.mrf.mxu1 }
 0x17f   : > { %v10200_v52 = vadd.f32 %v8223_v16, %v2182_v59  ;;  %v2181_v54 = vadd.f32 %v2158_v5, %v10088_v47  ;;  %v7299_v16 = vld [vmem:[%s9006_s4 + $0x508] sm:$0xff] }
 0x180   : > { %v8228_v58 = vpop.f32.mrf.mxu0  ;;  %v8254_v48 = vpop.f32.mrf.mxu1  ;;  %8539 = vmatmul.mubr.msk.f32.vlgmr.msra.gmra.mxu0 %vm240_vm1, %v7290_v51  ;;  %8565 = vmatmul.mubr.msk.f32.vlgmr.msra.gmra.mxu1 %vm240_vm1, %v8776_v35  ;;  %v7301_v35 = vld [vmem:[%s9006_s4 + $0x540] sm:$0xff] }
 0x181   : > { %v10217_v47 = vadd.f32 %v2388_v0, %v2181_v54  ;;  %v2631_v61 = vadd.f32 %v8228_v58, %v10101_v28  ;;  %8589 = vmatpush3.msk.msra.mxu0 %vm289_vm0, %v10081_v3  ;;  %8615 = vmatpush3.msk.msra.mxu1 %vm289_vm0, %v10086_v1  ;;  %v7300_v58 = vld [vmem:[%s9006_s4 + $0x510] sm:$0xff] }
 0x182   : > { %v2551_v22 = vpop.f32.mrf.mxu0  ;;  %v2781_v57 = vpop.f32.mrf.mxu1  ;;  %8541 = vmatprep.mubr.msk.f32.mxu0 %vm240_vm1, %v7291_v55  ;;  %8567 = vmatprep.mubr.msk.f32.mxu1 %vm240_vm1, %v8777_v33  ;;  %v8785_v55 = vld [vmem:[%s9006_s4 + $0x51a] sm:$0xff] }
 0x183   : > { %v10229_v46 = vadd.f32 %v8254_v48, %v2631_v61  ;;  %v2630_v28 = vadd.f32 %v2551_v22, %v10110_v32  ;;  %8640 = vmatprep.subr.msk.mxu0 %vm289_vm0, %v10210_v50  ;;  %8666 = vmatprep.subr.msk.mxu1 %vm289_vm0, %v10215_v63  ;;  %v8779_v32 = vld [vmem:[%s9006_s4 + $0x472] sm:$0xff] }
 0x184   : > { %v8231_v3 = vpop.f32.mrf.mxu0  ;;  %v8257_v1 = vpop.f32.mrf.mxu1  ;;  %8542 = vmatmul.mubr.msk.f32.gmra.mxu0 %vm240_vm1, %v7292_v10  ;;  %8568 = vmatmul.mubr.msk.f32.gmra.mxu1 %vm240_vm1, %v8778_v37  ;;  %v7303_v37 = vld [vmem:[%s9006_s4 + $0x578] sm:$0xff] }
 0x185   : > { %v10239_v60 = vadd.f32 %v2781_v57, %v2630_v28  ;;  %v2633_v23 = vadd.f32 %v8231_v3, %v10119_v45  ;;  %8544 = vmatprep.mubr.msk.f32.mxu0 %vm240_vm1, %v7293_v38  ;;  %8570 = vmatprep.mubr.msk.f32.mxu1 %vm240_vm1, %v8779_v32  ;;  %v8780_v45 = vld [vmem:[%s9006_s4 + $0x47a] sm:$0xff]  ;;  %v8787_v28 = vld [vmem:[%s9006_s4 + $0x552] sm:$0xff]  ;;  %v7302_v3 = vld [vmem:[%s9006_s4 + $0x548] sm:$0xff] }
 0x186   : > { %v2561_v31 = vpop.f32.mrf.mxu0  ;;  %v2791_v40 = vpop.f32.mrf.mxu1 }
 0x187   : > { %v10247_v6 = vadd.f32 %v8257_v1, %v2633_v23  ;;  %v2632_v11 = vadd.f32 %v2561_v31, %v10124_v36 }
 0x188   : > { %v8234_v42 = vpop.f32.mrf.mxu0  ;;  %v8260_v21 = vpop.f32.mrf.mxu1  ;;  %8545 = vmatmul.mubr.msk.f32.gmra.mxu0 %vm240_vm1, %v7294_v62  ;;  %8571 = vmatmul.mubr.msk.f32.gmra.mxu1 %vm240_vm1, %v8780_v45  ;;  %v7341_v45 = vld [vmem:[%s9006_s4 + $0x414] sm:$0xff] }
 0x189   : > { %v10253_v2 = vadd.f32 %v2791_v40, %v2632_v11  ;;  %v2635_v14 = vadd.f32 %v8234_v42, %v10133_v41  ;;  %8547 = vmatprep.mubr.msk.f32.mxu0 %vm240_vm1, %v7295_v4  ;;  %8573 = vmatprep.mubr.msk.f32.mxu1 %vm240_vm1, %v8781_v24  ;;  %v8782_v41 = vld [vmem:[%s9006_s4 + $0x4b2] sm:$0xff]  ;;  %v8789_v11 = vld [vmem:[%s9006_s4 + $0x58a] sm:$0xff]  ;;  %v7304_v42 = vld [vmem:[%s9006_s4 + $0x580] sm:$0xff] }
 0x18a   : > { %v2571_v36 = vpop.f32.mrf.mxu0  ;;  %v2801_v17 = vpop.f32.mrf.mxu1 }
 0x18b   : > { %v10261_v26 = vadd.f32 %v8260_v21, %v2635_v14  ;;  %v2634_v29 = vadd.f32 %v2571_v36, %v10138_v53  ;;  %v7377_v14 = vld [vmem:[%s9006_s4 + $0x7e0] sm:$0xff] }
 0x18c   : > { %v8237_v30 = vpop.f32.mrf.mxu0  ;;  %v8263_v12 = vpop.f32.mrf.mxu1  ;;  %8548 = vmatmul.mubr.msk.f32.gmra.mxu0 %vm240_vm1, %v7296_v19  ;;  %8574 = vmatmul.mubr.msk.f32.gmra.mxu1 %vm240_vm1, %v8782_v41 }
 0x18d   : > { %v10267_v39 = vadd.f32 %v2801_v17, %v2634_v29  ;;  %v2637_v34 = vadd.f32 %v8237_v30, %v10147_v7  ;;  %8550 = vmatprep.mubr.msk.f32.mxu0 %vm240_vm1, %v7297_v8  ;;  %8576 = vmatprep.mubr.msk.f32.mxu1 %vm240_vm1, %v8783_v43  ;;  %v8784_v7 = vld [vmem:[%s9006_s4 + $0x4ea] sm:$0xff]  ;;  %v8790_v17 = vld [vmem:[%s9006_s4 + $0x592] sm:$0xff]  ;;  %v7342_v30 = vld [vmem:[%s9006_s4 + $0x41c] sm:$0xff] }
 0x18e   : > { %v2581_v53 = vpop.f32.mrf.mxu0  ;;  %v2811_v27 = vpop.f32.mrf.mxu1 }
 0x18f   : > { %v10275_v59 = vadd.f32 %v8263_v12, %v2637_v34  ;;  %v2636_v9 = vadd.f32 %v2581_v53, %v10152_v15  ;;  %v7379_v53 = vld [vmem:[%s9006_s4 + $0x818] sm:$0xff] }
 0x190   : > { %v8240_v51 = vpop.f32.mrf.mxu0  ;;  %v8266_v5 = vpop.f32.mrf.mxu1  ;;  %8551 = vmatmul.mubr.msk.f32.gmra.mxu0 %vm240_vm1, %v7298_v25  ;;  %8577 = vmatmul.mubr.msk.f32.gmra.mxu1 %vm240_vm1, %v8784_v7  ;;  %v7343_v25 = vld [vmem:[%s9006_s4 + $0x44c] sm:$0xff] }
 0x191   : > { %v10281_v0 = vadd.f32 %v2811_v27, %v2636_v9  ;;  %v2639_v54 = vadd.f32 %v8240_v51, %v10161_v13  ;;  %8553 = vmatprep.mubr.msk.f32.mxu0 %vm240_vm1, %v7299_v16  ;;  %8579 = vmatprep.mubr.msk.f32.mxu1 %vm240_vm1, %v8785_v55  ;;  %v8786_v13 = vld [vmem:[%s9006_s4 + $0x522] sm:$0xff]  ;;  %v7381_v55 = vld [vmem:[%s9006_s4 + $0x850] sm:$0xff] }
 0x192   : > { %v2591_v15 = vpop.f32.mrf.mxu0  ;;  %v2821_v48 = vpop.f32.mrf.mxu1  ;;  %v7380_v51 = vld [vmem:[%s9006_s4 + $0x820] sm:$0xff] }
 0x193   : > { %v10289_v61 = vadd.f32 %v8266_v5, %v2639_v54  ;;  %v2638_v10 = vadd.f32 %v2591_v15, %v10166_v18  ;;  %v7345_v54 = vld [vmem:[%s9006_s4 + $0x484] sm:$0xff] }
 0x194   : > { %v8243_v22 = vpop.f32.mrf.mxu0  ;;  %v8269_v57 = vpop.f32.mrf.mxu1  ;;  %8554 = vmatmul.mubr.msk.f32.gmra.mxu0 %vm240_vm1, %v7300_v58  ;;  %8580 = vmatmul.mubr.msk.f32.gmra.mxu1 %vm240_vm1, %v8786_v13  ;;  %v7383_v13 = vld [vmem:[%s9006_s4 + $0x888] sm:$0xff] }
 0x195   : > { %v10295_v33 = vadd.f32 %v2821_v48, %v2638_v10  ;;  %v2641_v38 = vadd.f32 %v8243_v22, %v10175_v49  ;;  %8556 = vmatprep.mubr.msk.f32.mxu0 %vm240_vm1, %v7301_v35  ;;  %8582 = vmatprep.mubr.msk.f32.mxu1 %vm240_vm1, %v8787_v28  ;;  %v8788_v49 = vld [vmem:[%s9006_s4 + $0x55a] sm:$0xff]  ;;  %v7346_v35 = vld [vmem:[%s9006_s4 + $0x48c] sm:$0xff] }
 0x196   : > { %v2601_v18 = vpop.f32.mrf.mxu0  ;;  %v2831_v1 = vpop.f32.mrf.mxu1  ;;  %v7382_v10 = vld [vmem:[%s9006_s4 + $0x858] sm:$0xff] }
 0x197   : > { %v10303_v23 = vadd.f32 %v8269_v57, %v2641_v38  ;;  %v2640_v32 = vadd.f32 %v2601_v18, %v10180_v20  ;;  %v7347_v57 = vld [vmem:[%s9006_s4 + $0x4bc] sm:$0xff] }
 0x198   : > { %v8246_v62 = vpop.f32.mrf.mxu0  ;;  %v8272_v31 = vpop.f32.mrf.mxu1  ;;  %8557 = vmatmul.mubr.msk.f32.gmra.mxu0 %vm240_vm1, %v7302_v3  ;;  %8583 = vmatmul.mubr.msk.f32.gmra.mxu1 %vm240_vm1, %v8788_v49  ;;  %v7385_v49 = vld [vmem:[%s9006_s4 + $0x8c0] sm:$0xff] }
 0x199   : > { %v10309_v40 = vadd.f32 %v2831_v1, %v2640_v32  ;;  %v2643_v4 = vadd.f32 %v8246_v62, %v10188_v44  ;;  %8559 = vmatprep.mubr.msk.f32.mxu0 %vm240_vm1, %v7303_v37  ;;  %8585 = vmatprep.mubr.msk.f32.mxu1 %vm240_vm1, %v8789_v11  ;;  %v7348_v37 = vld [vmem:[%s9006_s4 + $0x4c4] sm:$0xff]  ;;  %v7384_v32 = vld [vmem:[%s9006_s4 + $0x890] sm:$0xff] }
 0x19a   : > { %v2611_v20 = vpop.f32.mrf.mxu0  ;;  %v2841_v21 = vpop.f32.mrf.mxu1 }
 0x19b   : > { %v10318_v24 = vadd.f32 %v8272_v31, %v2643_v4  ;;  %v2642_v19 = vadd.f32 %v2611_v20, %v10193_v56  ;;  %v7378_v56 = vld [vmem:[%s9006_s4 + $0x7e8] sm:$0xff]  ;;  %v7349_v31 = vld [vmem:[%s9006_s4 + $0x4f4] sm:$0xff] }
 0x19c   : > { %v8249_v36 = vpop.f32.mrf.mxu0  ;;  %v8275_v44 = vpop.f32.mrf.mxu1  ;;  %8560 = vmatmul.mubr.msk.f32.gmra.mxu0 %vm240_vm1, %v7304_v42  ;;  %8586 = vmatmul.mubr.msk.f32.gmra.mxu1 %vm240_vm1, %v8790_v17 }
 0x19d   : > { %v10324_v8 = vadd.f32 %v2841_v21, %v2642_v19  ;;  %v2645_v29 = vadd.f32 %v8249_v36, %v10200_v52  ;;  %8590 = vmatprep.mubr.msk.f32.mxu0 %vm240_vm1, %v7341_v45  ;;  %8616 = vmatprep.mubr.msk.f32.mxu1 %vm240_vm1, %v7377_v14  ;;  %v7350_v45 = vld [vmem:[%s9006_s4 + $0x4fc] sm:$0xff]  ;;  %v7386_v14 = vld [vmem:[%s9006_s4 + $0x8c8] sm:$0xff] }
 0x19e   : > { %v2621_v12 = vpop.f32.mrf.mxu0  ;;  %v2851_v41 = vpop.f32.mrf.mxu1  ;;  %v7351_v36 = vld [vmem:[%s9006_s4 + $0x52c] sm:$0xff] }
 0x19f   : > { %v10331_v34 = vadd.f32 %v8275_v44, %v2645_v29  ;;  %v2644_v43 = vadd.f32 %v2621_v12, %v10217_v47  ;;  %v7344_v47 = vld [vmem:[%s9006_s4 + $0x454] sm:$0xff] }
 0x1a0   : > { %v8280_v27 = vpop.f32.mrf.mxu0  ;;  %v8306_v52 = vpop.f32.mrf.mxu1  ;;  %8591 = vmatmul.mubr.msk.f32.vlgmr.msra.gmra.mxu0 %vm240_vm1, %v7342_v30  ;;  %8617 = vmatmul.mubr.msk.f32.vlgmr.msra.gmra.mxu1 %vm240_vm1, %v7378_v56  ;;  %v7387_v44 = vld [vmem:[%s9006_s4 + $0x8f8] sm:$0xff] }
 0x1a1   : > { %v10338_v16 = vadd.f32 %v2851_v41, %v2644_v43  ;;  %v3091_v9 = vadd.f32 %v8280_v27, %v10229_v46  ;;  %8641 = vmatpush3.msk.msra.mxu0 %vm289_vm0, %v10210_v50  ;;  %8667 = vmatpush3.msk.msra.mxu1 %vm289_vm0, %v10215_v63  ;;  %v7352_v41 = vld [vmem:[%s9006_s4 + $0x534] sm:$0xff]  ;;  %v7388_v43 = vld [vmem:[%s9006_s4 + $0x900] sm:$0xff] }
 0x1a2   : > { %v3011_v5 = vpop.f32.mrf.mxu0  ;;  %v3241_v7 = vpop.f32.mrf.mxu1  ;;  %8593 = vmatprep.mubr.msk.f32.mxu0 %vm240_vm1, %v7343_v25  ;;  %8619 = vmatprep.mubr.msk.f32.mxu1 %vm240_vm1, %v7379_v53  ;;  %v7353_v53 = vld [vmem:[%s9006_s4 + $0x564] sm:$0xff]  ;;  %v7389_v27 = vld [vmem:[%s9006_s4 + $0x930] sm:$0xff] }
 0x1a3   : > { %v10351_v46 = vadd.f32 %v8306_v52, %v3091_v9  ;;  %v3090_v50 = vadd.f32 %v3011_v5, %v10239_v60 }
 0x1a4   : > { %v8283_v58 = vpop.f32.mrf.mxu0  ;;  %v8309_v63 = vpop.f32.mrf.mxu1  ;;  %8594 = vmatmul.mubr.msk.f32.gmra.mxu0 %vm240_vm1, %v7344_v47  ;;  %8620 = vmatmul.mubr.msk.f32.gmra.mxu1 %vm240_vm1, %v7380_v51 }
 0x1a5   : > { %v10356_v15 = vadd.f32 %v3241_v7, %v3090_v50  ;;  %v3093_v48 = vadd.f32 %v8283_v58, %v10247_v6  ;;  %8596 = vmatprep.mubr.msk.f32.mxu0 %vm240_vm1, %v7345_v54  ;;  %8622 = vmatprep.mubr.msk.f32.mxu1 %vm240_vm1, %v7381_v55  ;;  %v7354_v7 = vld [vmem:[%s9006_s4 + $0x56c] sm:$0xff]  ;;  %v7390_v54 = vld [vmem:[%s9006_s4 + $0x938] sm:$0xff] }
 0x1a6   : > { %v3021_v22 = vpop.f32.mrf.mxu0  ;;  %v3251_v60 = vpop.f32.mrf.mxu1  ;;  %v7355_v50 = vld [vmem:[%s9006_s4 + $0x59c] sm:$0xff]  ;;  %v7391_v58 = vld [vmem:[%s9006_s4 + $0x968] sm:$0xff] }
 0x1a7   : > { %v10365_v38 = vadd.f32 %v8309_v63, %v3093_v48  ;;  %v3092_v28 = vadd.f32 %v3021_v22, %v10253_v2 }
 0x1a8   : > { %v8286_v3 = vpop.f32.mrf.mxu0  ;;  %v8312_v6 = vpop.f32.mrf.mxu1  ;;  %8597 = vmatmul.mubr.msk.f32.gmra.mxu0 %vm240_vm1, %v7346_v35  ;;  %8623 = vmatmul.mubr.msk.f32.gmra.mxu1 %vm240_vm1, %v7382_v10 }
 0x1a9   : > { %v10370_v18 = vadd.f32 %v3251_v60, %v3092_v28  ;;  %v3095_v1 = vadd.f32 %v8286_v3, %v10261_v26  ;;  %8599 = vmatprep.mubr.msk.f32.mxu0 %vm240_vm1, %v7347_v57  ;;  %8625 = vmatprep.mubr.msk.f32.mxu1 %vm240_vm1, %v7383_v13  ;;  %v7356_v60 = vld [vmem:[%s9006_s4 + $0x5a4] sm:$0xff]  ;;  %v7392_v57 = vld [vmem:[%s9006_s4 + $0x970] sm:$0xff] }
 0x1aa   : > { %v3031_v62 = vpop.f32.mrf.mxu0  ;;  %v3261_v2 = vpop.f32.mrf.mxu1  ;;  %v7411_v28 = vld [vmem:[%s9006_s4 + $0x7f2] sm:$0xff]  ;;  %v7445_v3 = vld [vmem:[%s9006_s4 + $0x804] sm:$0xff] }
 0x1ab   : > { %v10379_v4 = vadd.f32 %v8312_v6, %v3095_v1  ;;  %v3094_v11 = vadd.f32 %v3031_v62, %v10267_v39 }
 0x1ac   : > { %v8289_v42 = vpop.f32.mrf.mxu0  ;;  %v8315_v26 = vpop.f32.mrf.mxu1  ;;  %8600 = vmatmul.mubr.msk.f32.gmra.mxu0 %vm240_vm1, %v7348_v37  ;;  %8626 = vmatmul.mubr.msk.f32.gmra.mxu1 %vm240_vm1, %v7384_v32 }
 0x1ad   : > { %v10384_v20 = vadd.f32 %v3261_v2, %v3094_v11  ;;  %v3097_v21 = vadd.f32 %v8289_v42, %v10275_v59  ;;  %8602 = vmatprep.mubr.msk.f32.mxu0 %vm240_vm1, %v7349_v31  ;;  %8628 = vmatprep.mubr.msk.f32.mxu1 %vm240_vm1, %v7385_v49  ;;  %v7412_v2 = vld [vmem:[%s9006_s4 + $0x7fa] sm:$0xff]  ;;  %v7446_v31 = vld [vmem:[%s9006_s4 + $0x80c] sm:$0xff] }
 0x1ae   : > { %v3041_v19 = vpop.f32.mrf.mxu0  ;;  %v3271_v39 = vpop.f32.mrf.mxu1  ;;  %v7413_v11 = vld [vmem:[%s9006_s4 + $0x82a] sm:$0xff]  ;;  %v7447_v42 = vld [vmem:[%s9006_s4 + $0x83c] sm:$0xff] }
 0x1af   : > { %v10393_v17 = vadd.f32 %v8315_v26, %v3097_v21  ;;  %v3096_v29 = vadd.f32 %v3041_v19, %v10281_v0 }
 0x1b0   : > { %v8292_v30 = vpop.f32.mrf.mxu0  ;;  %v8318_v59 = vpop.f32.mrf.mxu1  ;;  %8603 = vmatmul.mubr.msk.f32.gmra.mxu0 %vm240_vm1, %v7350_v45  ;;  %8629 = vmatmul.mubr.msk.f32.gmra.mxu1 %vm240_vm1, %v7386_v14 }
 0x1b1   : > { %v10398_v56 = vadd.f32 %v3271_v39, %v3096_v29  ;;  %v3099_v12 = vadd.f32 %v8292_v30, %v10289_v61  ;;  %8605 = vmatprep.mubr.msk.f32.mxu0 %vm240_vm1, %v7351_v36  ;;  %8631 = vmatprep.mubr.msk.f32.mxu1 %vm240_vm1, %v7387_v44  ;;  %v7414_v39 = vld [vmem:[%s9006_s4 + $0x832] sm:$0xff]  ;;  %v7448_v36 = vld [vmem:[%s9006_s4 + $0x844] sm:$0xff] }
 0x1b2   : > { %v3051_v25 = vpop.f32.mrf.mxu0  ;;  %v3281_v0 = vpop.f32.mrf.mxu1  ;;  %v7415_v29 = vld [vmem:[%s9006_s4 + $0x862] sm:$0xff]  ;;  %v7449_v30 = vld [vmem:[%s9006_s4 + $0x874] sm:$0xff] }
 0x1b3   : > { %v10407_v52 = vadd.f32 %v8318_v59, %v3099_v12  ;;  %v3098_v9 = vadd.f32 %v3051_v25, %v10295_v33 }
 0x1b4   : > { %v8295_v47 = vpop.f32.mrf.mxu0  ;;  %v8321_v61 = vpop.f32.mrf.mxu1  ;;  %8606 = vmatmul.mubr.msk.f32.gmra.mxu0 %vm240_vm1, %v7352_v41  ;;  %8632 = vmatmul.mubr.msk.f32.gmra.mxu1 %vm240_vm1, %v7388_v43 }
 0x1b5   : > { %v10412_v51 = vadd.f32 %v3281_v0, %v3098_v9  ;;  %v3101_v5 = vadd.f32 %v8295_v47, %v10303_v23  ;;  %8608 = vmatprep.mubr.msk.f32.mxu0 %vm240_vm1, %v7353_v53  ;;  %8634 = vmatprep.mubr.msk.f32.mxu1 %vm240_vm1, %v7389_v27  ;;  %v7416_v0 = vld [vmem:[%s9006_s4 + $0x86a] sm:$0xff]  ;;  %v7450_v53 = vld [vmem:[%s9006_s4 + $0x87c] sm:$0xff] }
 0x1b6   : > { %v3061_v55 = vpop.f32.mrf.mxu0  ;;  %v3291_v33 = vpop.f32.mrf.mxu1  ;;  %v7417_v9 = vld [vmem:[%s9006_s4 + $0x89a] sm:$0xff]  ;;  %v7451_v47 = vld [vmem:[%s9006_s4 + $0x8ac] sm:$0xff] }
 0x1b7   : > { %v10421_v63 = vadd.f32 %v8321_v61, %v3101_v5  ;;  %v3100_v48 = vadd.f32 %v3061_v55, %v10309_v40 }
 0x1b8   : > { %v8298_v35 = vpop.f32.mrf.mxu0  ;;  %v8324_v23 = vpop.f32.mrf.mxu1  ;;  %8609 = vmatmul.mubr.msk.f32.gmra.mxu0 %vm240_vm1, %v7354_v7  ;;  %8635 = vmatmul.mubr.msk.f32.gmra.mxu1 %vm240_vm1, %v7390_v54 }
 0x1b9   : > { %v10426_v10 = vadd.f32 %v3291_v33, %v3100_v48  ;;  %v3103_v22 = vadd.f32 %v8298_v35, %v10318_v24  ;;  %8611 = vmatprep.mubr.msk.f32.mxu0 %vm240_vm1, %v7355_v50  ;;  %8637 = vmatprep.mubr.msk.f32.mxu1 %vm240_vm1, %v7391_v58  ;;  %v7418_v33 = vld [vmem:[%s9006_s4 + $0x8a2] sm:$0xff]  ;;  %v7452_v50 = vld [vmem:[%s9006_s4 + $0x8b4] sm:$0xff] }
 0x1ba   : > { %v3071_v13 = vpop.f32.mrf.mxu0  ;;  %v3301_v40 = vpop.f32.mrf.mxu1  ;;  %v7419_v48 = vld [vmem:[%s9006_s4 + $0x8d2] sm:$0xff]  ;;  %v7453_v35 = vld [vmem:[%s9006_s4 + $0x8e4] sm:$0xff] }
 0x1bb   : > { %v10435_v6 = vadd.f32 %v8324_v23, %v3103_v22  ;;  %v3102_v1 = vadd.f32 %v3071_v13, %v10324_v8 }
 0x1bc   : > { %v8301_v37 = vpop.f32.mrf.mxu0  ;;  %v8327_v24 = vpop.f32.mrf.mxu1  ;;  %8612 = vmatmul.mubr.msk.f32.gmra.mxu0 %vm240_vm1, %v7356_v60  ;;  %8638 = vmatmul.mubr.msk.f32.gmra.mxu1 %vm240_vm1, %v7392_v57 }
 0x1bd   : > { %v10440_v32 = vadd.f32 %v3301_v40, %v3102_v1  ;;  %v3105_v62 = vadd.f32 %v8301_v37, %v10331_v34  ;;  %8642 = vmatprep.mubr.msk.f32.mxu0 %vm240_vm1, %v7411_v28  ;;  %8668 = vmatprep.mubr.msk.f32.mxu1 %vm240_vm1, %v7445_v3  ;;  %v7420_v40 = vld [vmem:[%s9006_s4 + $0x8da] sm:$0xff]  ;;  %v7454_v28 = vld [vmem:[%s9006_s4 + $0x8ec] sm:$0xff] }
 0x1be   : > { %v3081_v49 = vpop.f32.mrf.mxu0  ;;  %v3311_v8 = vpop.f32.mrf.mxu1  ;;  %v7421_v1 = vld [vmem:[%s9006_s4 + $0x90a] sm:$0xff]  ;;  %v7455_v37 = vld [vmem:[%s9006_s4 + $0x91c] sm:$0xff] }
 0x1bf   : > { %v10449_v26 = vadd.f32 %v8327_v24, %v3105_v62  ;;  %v3104_v21 = vadd.f32 %v3081_v49, %v10338_v16 }
 0x1c0   : > { %v8332_v45 = vpop.f32.mrf.mxu0  ;;  %v8358_v34 = vpop.f32.mrf.mxu1  ;;  %8643 = vmatmul.mubr.msk.f32.vlgmr.msra.gmra.mxu0 %vm240_vm1, %v7412_v2  ;;  %8669 = vmatmul.mubr.msk.f32.vlgmr.msra.gmra.mxu1 %vm240_vm1, %v7446_v31 }
 0x1c1   : > { %v10454_v14 = vadd.f32 %v3311_v8, %v3104_v21  ;;  %v3487_v19 = vadd.f32 %v8332_v45, %v10351_v46  ;;  %8645 = vmatprep.mubr.msk.f32.mxu0 %vm240_vm1, %v7413_v11  ;;  %8671 = vmatprep.mubr.msk.f32.mxu1 %vm240_vm1, %v7447_v42  ;;  %v7422_v8 = vld [vmem:[%s9006_s4 + $0x912] sm:$0xff]  ;;  %v7456_v11 = vld [vmem:[%s9006_s4 + $0x924] sm:$0xff] }
 0x1c2   : > { %v3407_v44 = vpop.f32.mrf.mxu0  ;;  %v3637_v16 = vpop.f32.mrf.mxu1  ;;  %v7423_v21 = vld [vmem:[%s9006_s4 + $0x942] sm:$0xff]  ;;  %v7457_v45 = vld [vmem:[%s9006_s4 + $0x954] sm:$0xff] }
 0x1c3   : > { %v10463_v59 = vadd.f32 %v8358_v34, %v3487_v19  ;;  %v3486_v12 = vadd.f32 %v3407_v44, %v10356_v15 }
 0x1c4   : > { %v8335_v41 = vpop.f32.mrf.mxu0  ;;  %v8361_v46 = vpop.f32.mrf.mxu1  ;;  %8646 = vmatmul.mubr.msk.f32.gmra.mxu0 %vm240_vm1, %v7414_v39  ;;  %8672 = vmatmul.mubr.msk.f32.gmra.mxu1 %vm240_vm1, %v7448_v36 }
 0x1c5   : > { %v10468_v43 = vadd.f32 %v3637_v16, %v3486_v12  ;;  %v3489_v25 = vadd.f32 %v8335_v41, %v10365_v38  ;;  %8648 = vmatprep.mubr.msk.f32.mxu0 %vm240_vm1, %v7415_v29  ;;  %8674 = vmatprep.mubr.msk.f32.mxu1 %vm240_vm1, %v7449_v30  ;;  %v7424_v16 = vld [vmem:[%s9006_s4 + $0x94a] sm:$0xff]  ;;  %v7458_v29 = vld [vmem:[%s9006_s4 + $0x95c] sm:$0xff] }
 0x1c6   : > { %v3417_v27 = vpop.f32.mrf.mxu0  ;;  %v3647_v15 = vpop.f32.mrf.mxu1  ;;  %v7425_v12 = vld [vmem:[%s9006_s4 + $0x97a] sm:$0xff]  ;;  %v7459_v41 = vld [vmem:[%s9006_s4 + $0x98c] sm:$0xff] }
 0x1c7   : > { %v10477_v61 = vadd.f32 %v8361_v46, %v3489_v25  ;;  %v3488_v5 = vadd.f32 %v3417_v27, %v10370_v18 }
 0x1c8   : > { %v8338_v7 = vpop.f32.mrf.mxu0  ;;  %v8364_v38 = vpop.f32.mrf.mxu1  ;;  %8649 = vmatmul.mubr.msk.f32.gmra.mxu0 %vm240_vm1, %v7416_v0  ;;  %8675 = vmatmul.mubr.msk.f32.gmra.mxu1 %vm240_vm1, %v7450_v53 }
 0x1c9   : > { %v10482_v54 = vadd.f32 %v3647_v15, %v3488_v5  ;;  %v3491_v55 = vadd.f32 %v8338_v7, %v10379_v4  ;;  %8651 = vmatprep.mubr.msk.f32.mxu0 %vm240_vm1, %v7417_v9  ;;  %8677 = vmatprep.mubr.msk.f32.mxu1 %vm240_vm1, %v7451_v47  ;;  %v7426_v15 = vld [vmem:[%s9006_s4 + $0x982] sm:$0xff]  ;;  %v7460_v9 = vld [vmem:[%s9006_s4 + $0x994] sm:$0xff]  ;;  %s186_s4 = sand.u32 1, %s8859_s13  }
 0x1ca   : > { %v3427_v58 = vpop.f32.mrf.mxu0  ;;  %v3657_v18 = vpop.f32.mrf.mxu1  ;;  %s6608_s8 = sshll.u32 %s186_s4, 7  ;;  %s10809_s28 = scalar_lea.sflag [#allocation3], %s186_s4 }
 0x1cb   : > { %v10491_v23 = vadd.f32 %v8364_v38, %v3491_v55  ;;  %v3490_v22 = vadd.f32 %v3427_v58, %v10384_v20  ;;  %s10724_s20 = scalar_lea.vmem [#allocation2], %s6608_s8 }
 0x1cc   : > { %v8341_v60 = vpop.f32.mrf.mxu0  ;;  %v8367_v4 = vpop.f32.mrf.mxu1  ;;  %8652 = vmatmul.mubr.msk.f32.gmra.mxu0 %vm240_vm1, %v7418_v33  ;;  %8678 = vmatmul.mubr.msk.f32.gmra.mxu1 %vm240_vm1, %v7452_v50  ;;  %s6492_s16 = sshll.u32 %s10724_s20, 4  ;;  %s10802_s16 = int_to_ptr.vmem [resolvable:$true] %s6492_s16 }
 0x1cd   : > { %v10496_v57 = vadd.f32 %v3657_v18, %v3490_v22  ;;  %v3493_v13 = vadd.f32 %v8341_v60, %v10393_v17  ;;  %8654 = vmatprep.mubr.msk.f32.mxu0 %vm240_vm1, %v7419_v48  ;;  %8680 = vmatprep.mubr.msk.f32.mxu1 %vm240_vm1, %v7453_v35  ;;  %s8791_s29 = scalar_lea.vmem %s10802_s16, 2048  ;;  %p8798_p2 = scmp.lt.s32.totalorder %s10802_s16, %s8796_s6 }
 0x1ce   : > { %v3437_v3 = vpop.f32.mrf.mxu0  ;;  %v3667_v20 = vpop.f32.mrf.mxu1  ;;  %p8792_p13 = scmp.ne.s32.totalorder %s10802_s16, %s8791_s29 }
 0x1cf   : > { %v10505_v24 = vadd.f32 %v8367_v4, %v3493_v13  ;;  %v3492_v62 = vadd.f32 %v3437_v3, %v10398_v56 }
 0x1d0   : > { %v8344_v2 = vpop.f32.mrf.mxu0  ;;  %v8370_v17 = vpop.f32.mrf.mxu1  ;;  %8655 = vmatmul.mubr.msk.f32.gmra.mxu0 %vm240_vm1, %v7420_v40  ;;  %8681 = vmatmul.mubr.msk.f32.gmra.mxu1 %vm240_vm1, %v7454_v28  ;;  %p8793_p0 = pnand %p8792_p13, %p8959_p3 }
 0x1d1   : > { %v10510_v31 = vadd.f32 %v3667_v20, %v3492_v62  ;;  %v3495_v49 = vadd.f32 %v8344_v2, %v10407_v52  ;;  %8657 = vmatprep.mubr.msk.f32.mxu0 %vm240_vm1, %v7421_v1  ;;  %8683 = vmatprep.mubr.msk.f32.mxu1 %vm240_vm1, %v7455_v37 }
 0x1d2   : > { %v3447_v42 = vpop.f32.mrf.mxu0  ;;  %v3677_v56 = vpop.f32.mrf.mxu1  ;;  %p8794_p1 = pneg %p8793_p0 }
 0x1d3   : > { %v10519_v34 = vadd.f32 %v8370_v17, %v3495_v49  ;;  %v3494_v19 = vadd.f32 %v3447_v42, %v10412_v51 }
 0x1d4   : > { %v8347_v39 = vpop.f32.mrf.mxu0  ;;  %v8373_v52 = vpop.f32.mrf.mxu1  ;;  %8658 = vmatmul.mubr.msk.f32.gmra.mxu0 %vm240_vm1, %v7422_v8  ;;  %8684 = vmatmul.mubr.msk.f32.gmra.mxu1 %vm240_vm1, %v7456_v11 }
 0x1d5   : > { %v10524_v36 = vadd.f32 %v3677_v56, %v3494_v19  ;;  %v3497_v44 = vadd.f32 %v8347_v39, %v10421_v63  ;;  %8660 = vmatprep.mubr.msk.f32.mxu0 %vm240_vm1, %v7423_v21  ;;  %8686 = vmatprep.mubr.msk.f32.mxu1 %vm240_vm1, %v7457_v45 }
 0x1d6   : > { %v3457_v30 = vpop.f32.mrf.mxu0  ;;  %v3687_v51 = vpop.f32.mrf.mxu1 }
 0x1d7   : > { %v10533_v46 = vadd.f32 %v8373_v52, %v3497_v44  ;;  %v3496_v25 = vadd.f32 %v3457_v30, %v10426_v10 }
 0x1d8   : > { %v8350_v0 = vpop.f32.mrf.mxu0  ;;  %v8376_v53 = vpop.f32.mrf.mxu1  ;;  %8661 = vmatmul.mubr.msk.f32.gmra.mxu0 %vm240_vm1, %v7424_v16  ;;  %8687 = vmatmul.mubr.msk.f32.gmra.mxu1 %vm240_vm1, %v7458_v29 }
 0x1d9   : > { %v10538_v63 = vadd.f32 %v3687_v51, %v3496_v25  ;;  %v3499_v27 = vadd.f32 %v8350_v0, %v10435_v6  ;;  %8663 = vmatprep.mubr.msk.f32.mxu0 %vm240_vm1, %v7425_v12  ;;  %8689 = vmatprep.mubr.msk.f32.mxu1 %vm240_vm1, %v7459_v41 }
 0x1da   : > { %v3467_v47 = vpop.f32.mrf.mxu0  ;;  %v3697_v5 = vpop.f32.mrf.mxu1 }
 0x1db   : > { %v10545_v7 = vadd.f32 %v8376_v53, %v3499_v27  ;;  %v3498_v10 = vadd.f32 %v3467_v47, %v10440_v32 }
 0x1dc   : > { %v8353_v38 = vpop.f32.mrf.mxu0  ;;  %v8379_v55 = vpop.f32.mrf.mxu1  ;;  %8664 = vmatmul.mubr.msk.f32.gmra.mxu0 %vm240_vm1, %v7426_v15  ;;  %8690 = vmatmul.mubr.msk.f32.gmra.mxu1 %vm240_vm1, %v7460_v9 }
 0x1dd   : > { %v3728_v33 = vadd.f32 %v3697_v5, %v3498_v10  ;;  %v3501_v6 = vadd.f32 %v8353_v38, %v10449_v26 }
 0x1de   : > { %v3477_v50 = vpop.f32.mrf.mxu0  ;;  %v3707_v58 = vpop.f32.mrf.mxu1 }
 0x1df   : > { %v3731_v18 = vadd.f32 %v8379_v55, %v3501_v6  ;;  %v3500_v48 = vadd.f32 %v3477_v50, %v10454_v14 }
 0x1e0   : > { %v8384_v35 = vpop.f32.mrf.mxu0  ;;  %v8410_v22 = vpop.f32.mrf.mxu1 }
 0x1e1   : > { %v3730_v60 = vadd.f32 %v3707_v58, %v3500_v48  ;;  %v3950_v4 = vadd.f32 %v8384_v35, %v10463_v59 }
 0x1e2   : > { %v3870_v32 = vpop.f32.mrf.mxu0  ;;  %v4100_v13 = vpop.f32.mrf.mxu1 }
 0x1e3   : > { %v4180_v40 = vadd.f32 %v8410_v22, %v3950_v4  ;;  %v3949_v28 = vadd.f32 %v3870_v32, %v10468_v43 }
 0x1e4   : > { %v8387_v3 = vpop.f32.mrf.mxu0  ;;  %v8413_v20 = vpop.f32.mrf.mxu1 }
 0x1e5   : > { %v4179_v1 = vadd.f32 %v4100_v13, %v3949_v28  ;;  %v3952_v26 = vadd.f32 %v8387_v3, %v10477_v61 }
 0x1e6   : > { %v3880_v37 = vpop.f32.mrf.mxu0  ;;  %v4110_v62 = vpop.f32.mrf.mxu1 }
 0x1e7   : > { %v4182_v2 = vadd.f32 %v8413_v20, %v3952_v26  ;;  %v3951_v14 = vadd.f32 %v3880_v37, %v10482_v54 }
 0x1e8   : > { %v8390_v17 = vpop.f32.mrf.mxu0  ;;  %v8416_v49 = vpop.f32.mrf.mxu1 }
 0x1e9   : > { %v4181_v8 = vadd.f32 %v4110_v62, %v3951_v14  ;;  %v3954_v59 = vadd.f32 %v8390_v17, %v10491_v23 }
 0x1ea   : > { %v3890_v11 = vpop.f32.mrf.mxu0  ;;  %v4120_v42 = vpop.f32.mrf.mxu1 }
 0x1eb   : > { %v4184_v56 = vadd.f32 %v8416_v49, %v3954_v59  ;;  %v3953_v43 = vadd.f32 %v3890_v11, %v10496_v57 }
 0x1ec   : > { %v8393_v21 = vpop.f32.mrf.mxu0  ;;  %v8419_v45 = vpop.f32.mrf.mxu1 }
 0x1ed   : > { %v4183_v19 = vadd.f32 %v4120_v42, %v3953_v43  ;;  %v3956_v61 = vadd.f32 %v8393_v21, %v10505_v24 }
 0x1ee   : > { %v3900_v39 = vpop.f32.mrf.mxu0  ;;  %v4130_v52 = vpop.f32.mrf.mxu1 }
 0x1ef   : > { %v4186_v44 = vadd.f32 %v8419_v45, %v3956_v61  ;;  %v3955_v54 = vadd.f32 %v3900_v39, %v10510_v31 }
 0x1f0   : > { %v8396_v16 = vpop.f32.mrf.mxu0  ;;  %v8422_v29 = vpop.f32.mrf.mxu1 }
 0x1f1   : > { %v4185_v30 = vadd.f32 %v4130_v52, %v3955_v54  ;;  %v3958_v23 = vadd.f32 %v8396_v16, %v10519_v34 }
 0x1f2   : > { %v3910_v51 = vpop.f32.mrf.mxu0  ;;  %v4140_v12 = vpop.f32.mrf.mxu1 }
 0x1f3   : > { %v4188_v41 = vadd.f32 %v8422_v29, %v3958_v23  ;;  %v3957_v57 = vadd.f32 %v3910_v51, %v10524_v36 }
 0x1f4   : > { %v8399_v25 = vpop.f32.mrf.mxu0  ;;  %v8425_v0 = vpop.f32.mrf.mxu1 }
 0x1f5   : > { %v4187_v53 = vadd.f32 %v4140_v12, %v3957_v57  ;;  %v3960_v24 = vadd.f32 %v8399_v25, %v10533_v46 }
 0x1f6   : > { %v3920_v27 = vpop.f32.mrf.mxu0  ;;  %v4150_v15 = vpop.f32.mrf.mxu1 }
 0x1f7   : > { %v4190_v9 = vadd.f32 %v8425_v0, %v3960_v24  ;;  %v3959_v31 = vadd.f32 %v3920_v27, %v10538_v63 }
 0x1f8   : > { %v8402_v47 = vpop.f32.mrf.mxu0  ;;  %v8428_v5 = vpop.f32.mrf.mxu1 }
 0x1f9   : > { %v4189_v10 = vadd.f32 %v4150_v15, %v3959_v31  ;;  %v3962_v34 = vadd.f32 %v8402_v47, %v10545_v7 }
 0x1fa   : > { %v3930_v38 = vpop.f32.mrf.mxu0  ;;  %v4160_v55 = vpop.f32.mrf.mxu1 }
 0x1fb   : > { %v4192_v6 = vadd.f32 %v8428_v5, %v3962_v34  ;;  %v3961_v50 = vadd.f32 %v3930_v38, %v3728_v33 }
 0x1fc   : > { %v8405_v36 = vpop.f32.mrf.mxu0  ;;  %v8431_v58 = vpop.f32.mrf.mxu1 }
 0x1fd   : > { %v4191_v48 = vadd.f32 %v4160_v55, %v3961_v50  ;;  %v3964_v35 = vadd.f32 %v8405_v36, %v3731_v18 }
 0x1fe   : > { %v3940_v22 = vpop.f32.mrf.mxu0  ;;  %v4170_v46 = vpop.f32.mrf.mxu1 }
 0x1ff   : > { %v4194_v4 = vadd.f32 %v8431_v58, %v3964_v35  ;;  %v3963_v32 = vadd.f32 %v3940_v22, %v3730_v60 }
 0x200   : > { %v8436_v13 = vpop.f32.mrf.mxu0  ;;  %v8462_v28 = vpop.f32.mrf.mxu1 }
 0x201   : > { %v4193_v63 = vadd.f32 %v4170_v46, %v3963_v32  ;;  %v4410_v3 = vadd.f32 %v8436_v13, %v4180_v40 }
 0x202   : > { %v4330_v20 = vpop.f32.mrf.mxu0  ;;  %v4562_v26 = vpop.f32.mrf.mxu1 }
 0x203   : > { %v4642_v37 = vadd.f32 %v8462_v28, %v4410_v3  ;;  %v4409_v7 = vadd.f32 %v4330_v20, %v4179_v1 }
 0x204   : > { %v8439_v62 = vpop.f32.mrf.mxu0  ;;  %v8465_v14 = vpop.f32.mrf.mxu1 }
 0x205   : > { %v4641_v17 = vadd.f32 %v4562_v26, %v4409_v7  ;;  %v4412_v33 = vadd.f32 %v8439_v62, %v4182_v2 }
 0x206   : > { %v4340_v49 = vpop.f32.mrf.mxu0  ;;  %v4572_v59 = vpop.f32.mrf.mxu1 }
 0x207   : > { %v4644_v11 = vadd.f32 %v8465_v14, %v4412_v33  ;;  %v4411_v18 = vadd.f32 %v4340_v49, %v4181_v8 }
 0x208   : > { %v8442_v42 = vpop.f32.mrf.mxu0  ;;  %v8468_v43 = vpop.f32.mrf.mxu1 }
 0x209   : > { %v4643_v21 = vadd.f32 %v4572_v59, %v4411_v18  ;;  %v4414_v60 = vadd.f32 %v8442_v42, %v4184_v56 }
 0x20a   : > { %v4350_v45 = vpop.f32.mrf.mxu0  ;;  %v4582_v61 = vpop.f32.mrf.mxu1 }
 0x20b   : > { %v4646_v39 = vadd.f32 %v8468_v43, %v4414_v60  ;;  %v4413_v40 = vadd.f32 %v4350_v45, %v4183_v19 }
 0x20c   : > { %v8445_v52 = vpop.f32.mrf.mxu0  ;;  %v8471_v54 = vpop.f32.mrf.mxu1 }
 0x20d   : > { %v4645_v16 = vadd.f32 %v4582_v61, %v4413_v40  ;;  %v4416_v1 = vadd.f32 %v8445_v52, %v4186_v44 }
 0x20e   : > { %v4360_v29 = vpop.f32.mrf.mxu0  ;;  %v4592_v23 = vpop.f32.mrf.mxu1 }
 0x20f   : > { %v4648_v51 = vadd.f32 %v8471_v54, %v4416_v1  ;;  %v4415_v2 = vadd.f32 %v4360_v29, %v4185_v30 }
 0x210   : > { %v8448_v12 = vpop.f32.mrf.mxu0  ;;  %v8474_v57 = vpop.f32.mrf.mxu1 }
 0x211   : > { %v4647_v25 = vadd.f32 %v4592_v23, %v4415_v2  ;;  %v4418_v8 = vadd.f32 %v8448_v12, %v4188_v41 }
 0x212   : > { %v4370_v0 = vpop.f32.mrf.mxu0  ;;  %v4602_v24 = vpop.f32.mrf.mxu1 }
 0x213   : > { %v4650_v27 = vadd.f32 %v8474_v57, %v4418_v8  ;;  %v4417_v56 = vadd.f32 %v4370_v0, %v4187_v53 }
 0x214   : > { %v8451_v15 = vpop.f32.mrf.mxu0  ;;  %v8477_v31 = vpop.f32.mrf.mxu1 }
 0x215   : > { %v4649_v47 = vadd.f32 %v4602_v24, %v4417_v56  ;;  %v4420_v19 = vadd.f32 %v8451_v15, %v4190_v9 }
 0x216   : > { %v4380_v5 = vpop.f32.mrf.mxu0  ;;  %v4612_v34 = vpop.f32.mrf.mxu1 }
 0x217   : > { %v4652_v38 = vadd.f32 %v8477_v31, %v4420_v19  ;;  %v4419_v44 = vadd.f32 %v4380_v5, %v4189_v10 }
 0x218   : > { %v8454_v55 = vpop.f32.mrf.mxu0  ;;  %v8480_v50 = vpop.f32.mrf.mxu1 }
 0x219   : > { %v4651_v36 = vadd.f32 %v4612_v34, %v4419_v44  ;;  %v4422_v30 = vadd.f32 %v8454_v55, %v4192_v6 }
 0x21a   : > { %v4390_v58 = vpop.f32.mrf.mxu0  ;;  %v4622_v35 = vpop.f32.mrf.mxu1 }
 0x21b   : > { %v4654_v22 = vadd.f32 %v8480_v50, %v4422_v30  ;;  %v4421_v41 = vadd.f32 %v4390_v58, %v4191_v48 }
 0x21c   : > { %v8457_v46 = vpop.f32.mrf.mxu0  ;;  %v8483_v32 = vpop.f32.mrf.mxu1 }
 0x21d   : > { %v4653_v13 = vadd.f32 %v4622_v35, %v4421_v41  ;;  %v4424_v53 = vadd.f32 %v8457_v46, %v4194_v4 }
 0x21e   : > { %v4400_v28 = vpop.f32.mrf.mxu0  ;;  %v4632_v3 = vpop.f32.mrf.mxu1 }
 0x21f   : > { %v4656_v20 = vadd.f32 %v8483_v32, %v4424_v53  ;;  %v4423_v9 = vadd.f32 %v4400_v28, %v4193_v63 }
 0x220   : > { %v8488_v26 = vpop.f32.mrf.mxu0  ;;  %v8514_v7 = vpop.f32.mrf.mxu1 }
 0x221   : > { %v4655_v62 = vadd.f32 %v4632_v3, %v4423_v9  ;;  %v4872_v10 = vadd.f32 %v8488_v26, %v4642_v37 }
 0x222   : > { %v4792_v14 = vpop.f32.mrf.mxu0  ;;  %v5022_v33 = vpop.f32.mrf.mxu1 }
 0x223   : > { %v10565_v49 = vadd.f32 %v8514_v7, %v4872_v10  ;;  %v4871_v6 = vadd.f32 %v4792_v14, %v4641_v17 }
 0x224   : > { %v8491_v59 = vpop.f32.mrf.mxu0  ;;  %v8517_v18 = vpop.f32.mrf.mxu1 }
 0x225   : > { %v10567_v48 = vadd.f32 %v5022_v33, %v4871_v6  ;;  %v4874_v42 = vadd.f32 %v8491_v59, %v4644_v11 }
 0x226   : > { %v4802_v43 = vpop.f32.mrf.mxu0  ;;  %v5032_v4 = vpop.f32.mrf.mxu1 }
 0x227   : > { %v10569_v60 = vadd.f32 %v8517_v18, %v4874_v42  ;;  %v4873_v45 = vadd.f32 %v4802_v43, %v4643_v21 }
 0x228   : > { %v8494_v63 = vpop.f32.mrf.mxu0  ;;  %v8520_v61 = vpop.f32.mrf.mxu1 }
 0x229   : > { %v10571_v40 = vadd.f32 %v5032_v4, %v4873_v45  ;;  %v4876_v37 = vadd.f32 %v8494_v63, %v4646_v39 }
 0x22a   : > { %v4812_v52 = vpop.f32.mrf.mxu0  ;;  %v5042_v54 = vpop.f32.mrf.mxu1 }
 0x22b   : > { %v10573_v1 = vadd.f32 %v8520_v61, %v4876_v37  ;;  %v4875_v17 = vadd.f32 %v4812_v52, %v4645_v16 }
 0x22c   : > { %v8497_v29 = vpop.f32.mrf.mxu0  ;;  %v8523_v23 = vpop.f32.mrf.mxu1 }
 0x22d   : > { %v10575_v2 = vadd.f32 %v5042_v54, %v4875_v17  ;;  %v4878_v11 = vadd.f32 %v8497_v29, %v4648_v51 }
 0x22e   : > { %v4822_v12 = vpop.f32.mrf.mxu0  ;;  %v5052_v57 = vpop.f32.mrf.mxu1 }
 0x22f   : > { %v10577_v8 = vadd.f32 %v8523_v23, %v4878_v11  ;;  %v4877_v21 = vadd.f32 %v4822_v12, %v4647_v25 }
 0x230   : > { %v8500_v0 = vpop.f32.mrf.mxu0  ;;  %v8526_v24 = vpop.f32.mrf.mxu1 }
 0x231   : > { %v10579_v56 = vadd.f32 %v5052_v57, %v4877_v21  ;;  %v4880_v39 = vadd.f32 %v8500_v0, %v4650_v27 }
 0x232   : > { %v4832_v15 = vpop.f32.mrf.mxu0  ;;  %v5062_v31 = vpop.f32.mrf.mxu1 }
 0x233   : > { %v10581_v19 = vadd.f32 %v8526_v24, %v4880_v39  ;;  %v4879_v16 = vadd.f32 %v4832_v15, %v4649_v47 }
 0x234   : > { %v8503_v5 = vpop.f32.mrf.mxu0  ;;  %v8529_v34 = vpop.f32.mrf.mxu1 }
 0x235   : > { %v10583_v44 = vadd.f32 %v5062_v31, %v4879_v16  ;;  %v4882_v51 = vadd.f32 %v8503_v5, %v4652_v38 }
 0x236   : > { %v4842_v55 = vpop.f32.mrf.mxu0  ;;  %v5072_v50 = vpop.f32.mrf.mxu1 }
 0x237   : > { %v10585_v30 = vadd.f32 %v8529_v34, %v4882_v51  ;;  %v4881_v25 = vadd.f32 %v4842_v55, %v4651_v36 }
 0x238   : > { %v8506_v58 = vpop.f32.mrf.mxu0  ;;  %v8532_v35 = vpop.f32.mrf.mxu1 }
 0x239   : > { %v10587_v41 = vadd.f32 %v5072_v50, %v4881_v25  ;;  %v4884_v27 = vadd.f32 %v8506_v58, %v4654_v22 }
 0x23a   : > { %v4852_v46 = vpop.f32.mrf.mxu0  ;;  %v5082_v32 = vpop.f32.mrf.mxu1 }
 0x23b   : > { %v10589_v53 = vadd.f32 %v8532_v35, %v4884_v27  ;;  %v4883_v47 = vadd.f32 %v4852_v46, %v4653_v13 }
 0x23c   : > { %v8509_v28 = vpop.f32.mrf.mxu0  ;;  %v8535_v3 = vpop.f32.mrf.mxu1 }
 0x23d   : > { %v10591_v9 = vadd.f32 %v5082_v32, %v4883_v47  ;;  %v4886_v38 = vadd.f32 %v8509_v28, %v4656_v20 }
 0x23e   : > { %v4862_v26 = vpop.f32.mrf.mxu0  ;;  %v5092_v7 = vpop.f32.mrf.mxu1 }
 0x23f   : > { %10866 = vst [vmem:[#allocation5_spill] sm:$0xff] %v10591_v9  ;;  %v10593_v10 = vadd.f32 %v8535_v3, %v4886_v38  ;;  %v4885_v36 = vadd.f32 %v4862_v26, %v4655_v62 }
 0x240   : > { %v8540_v14 = vpop.f32.mrf.mxu0  ;;  %v8566_v33 = vpop.f32.mrf.mxu1 }
 0x241   : > { %10867 = vst [vmem:[#allocation6_spill] sm:$0xff] %v10593_v10  ;;  %v10595_v6 = vadd.f32 %v5092_v7, %v4885_v36  ;;  %v5332_v10 = vadd.f32 %v8540_v14, %v10565_v49 }
 0x242   : > { %v5252_v22 = vpop.f32.mrf.mxu0  ;;  %v5418_v59 = vpop.f32.mrf.mxu1 }
 0x243   : > { %10868 = vst [vmem:[#allocation7_spill] sm:$0xff] %v10595_v6  ;;  %v5331_v9 = vadd.f32 %v5252_v22, %v10567_v48 }
 0x244   : > { %v8543_v18 = vpop.f32.mrf.mxu0  ;;  %v10597_v42 = vpop.f32.mrf.mxu1 }
 0x245   : > { %v5497_v49 = vadd.f32 %v5418_v59, %v5331_v9 }
 0x246   : > { %v5262_v13 = vpop.f32.mrf.mxu0  ;;  %v10599_v43 = vpop.f32.mrf.mxu1 }
 0x247   : > { %v5333_v14 = vadd.f32 %v5262_v13, %v10571_v40 }
 0x248   : > { %v8546_v4 = vpop.f32.mrf.mxu0  ;;  %v10601_v45 = vpop.f32.mrf.mxu1 }
 0x249   : > { %v5499_v40 = vadd.f32 %v10599_v43, %v5333_v14 }
 0x24a   : > { %v5272_v20 = vpop.f32.mrf.mxu0  ;;  %v10603_v63 = vpop.f32.mrf.mxu1 }
 0x24c   : > { %v10605_v61 = vpop.f32.mrf.mxu0  ;;  %v10607_v62 = vpop.f32.mrf.mxu1 }
 0x24e   : > { %v10609_v37 = vpop.f32.mrf.mxu0  ;;  %v10611_v52 = vpop.f32.mrf.mxu1 }
 0x250   : > { %v10613_v54 = vpop.f32.mrf.mxu0  ;;  %v10615_v17 = vpop.f32.mrf.mxu1 }
 0x252   : > { %v10617_v29 = vpop.f32.mrf.mxu0  ;;  %v10619_v23 = vpop.f32.mrf.mxu1 }
 0x254   : > { %v10621_v11 = vpop.f32.mrf.mxu0  ;;  %v10623_v12 = vpop.f32.mrf.mxu1 }
 0x256   : > { %v10625_v57 = vpop.f32.mrf.mxu0  ;;  %v10627_v21 = vpop.f32.mrf.mxu1 }
 0x257   : > { %10869 = vst [vmem:[#allocation8_spill] sm:$0xff] %v10627_v21 }
 0x258   : > { %v10629_v0 = vpop.f32.mrf.mxu0  ;;  %v10631_v24 = vpop.f32.mrf.mxu1 }
 0x259   : > { %10870 = vst [vmem:[#allocation9_spill] sm:$0xff] %v10631_v24 }
 0x25a   : > { %v10633_v39 = vpop.f32.mrf.mxu0  ;;  %v10635_v15 = vpop.f32.mrf.mxu1 }
 0x25b   : > { %10871 = vst [vmem:[#allocation10_spill] sm:$0xff] %v10633_v39  ;;  %10872 = vst [vmem:[#allocation11_spill] sm:$0xff] %v10635_v15 }
 0x25c   : > { %v10637_v31 = vpop.f32.mrf.mxu0  ;;  %v10639_v16 = vpop.f32.mrf.mxu1 }
 0x25d   : > { %10873 = vst [vmem:[#allocation12_spill] sm:$0xff] %v10637_v31  ;;  %10874 = vst [vmem:[#allocation13_spill] sm:$0xff] %v10639_v16 }
 0x25e   : > { %v10641_v5 = vpop.f32.mrf.mxu0  ;;  %v10643_v34 = vpop.f32.mrf.mxu1 }
 0x25f   : > { %10875 = vst [vmem:[#allocation14_spill] sm:$0xff] %v10641_v5  ;;  %10876 = vst [vmem:[#allocation15_spill] sm:$0xff] %v10643_v34 }
 0x260   : > { %v8592_v51 = vpop.f32.mrf.mxu0  ;;  %v8618_v55 = vpop.f32.mrf.mxu1 }
 0x262   : > { %v5648_v50 = vpop.f32.mrf.mxu0  ;;  %v5881_v25 = vpop.f32.mrf.mxu1 }
 0x264   : > { %v8595_v58 = vpop.f32.mrf.mxu0  ;;  %v8621_v35 = vpop.f32.mrf.mxu1 }
 0x266   : > { %v5658_v27 = vpop.f32.mrf.mxu0  ;;  %v10645_v46 = vpop.f32.mrf.mxu1 }
 0x268   : > { %v8598_v32 = vpop.f32.mrf.mxu0  ;;  %v10647_v47 = vpop.f32.mrf.mxu1 }
 0x26a   : > { %v5668_v28 = vpop.f32.mrf.mxu0  ;;  %v10649_v3 = vpop.f32.mrf.mxu1 }
 0x26c   : > { %v10651_v38 = vpop.f32.mrf.mxu0  ;;  %v10653_v26 = vpop.f32.mrf.mxu1 }
 0x26e   : > { %v10655_v7 = vpop.f32.mrf.mxu0  ;;  %v10657_v36 = vpop.f32.mrf.mxu1 }
 0x26f   : > { %10877 = vst [vmem:[#allocation16_spill] sm:$0xff] %v10657_v36 }
 0x270   : > { %v10659_v34 = vpop.f32.mrf.mxu0  ;;  %v10661_v16 = vpop.f32.mrf.mxu1 }
 0x271   : > { %10878 = vst [vmem:[#allocation17_spill] sm:$0xff] %v10661_v16  ;;  %v5498_v16 = vadd.f32 %v8566_v33, %v5332_v10  ;;  %v5727_v10 = vadd.f32 %v5648_v50, %v5497_v49 }
 0x272   : > { %v10663_v5 = vpop.f32.mrf.mxu0  ;;  %v10665_v6 = vpop.f32.mrf.mxu1 }
 0x273   : > { %10879 = vst [vmem:[#allocation18_spill] sm:$0xff] %v10663_v5  ;;  %10880 = vst [vmem:[#allocation19_spill] sm:$0xff] %v10665_v6  ;;  %v5334_v6 = vadd.f32 %v8543_v18, %v10569_v60  ;;  %v5335_v60 = vadd.f32 %v5272_v20, %v10575_v2  ;;  %v5960_v13 = vadd.f32 %v5881_v25, %v5727_v10 }
 0x274   : > { %v10667_v15 = vpop.f32.mrf.mxu0  ;;  %v10669_v31 = vpop.f32.mrf.mxu1  ;;  %v5340_v25 = vadd.f32 %v10613_v54, %v10581_v19 }
 0x275   : > { %10881 = vst [vmem:[#allocation20_spill] sm:$0xff] %v10667_v15  ;;  %10882 = vst [vmem:[#allocation21_spill] sm:$0xff] %v10669_v31  ;;  %v5728_v31 = vadd.f32 %v8592_v51, %v5498_v16  ;;  %v5501_v43 = vadd.f32 %v10603_v63, %v5335_v60  ;;  %v10712_v51 = vld [vmem:[%s196_s7] ss:$0 sm:$0xff]  ;;  %s8797_s7 = scalar_lea.vmem %s8796_s6, 4096 }
 0x276   : > { %v10672_v24 = vpop.f32.mrf.mxu0  ;;  %v10674_v39 = vpop.f32.mrf.mxu1  ;;  %p8799_p4 = scmp.lt.s32.totalorder %s8797_s7, %s8791_s29 }
 0x277   : > { %10883 = vst [vmem:[#allocation22_spill] sm:$0xff] %v10674_v39  ;;  %v5336_v39 = vadd.f32 %v8546_v4, %v10573_v1  ;;  %v5961_v9 = vadd.f32 %v8618_v55, %v5728_v31  ;;  %v5729_v4 = vadd.f32 %v5658_v27, %v5499_v40  ;;  %v5337_v31 = vadd.f32 %v10609_v37, %v10579_v56 }
 0x278   : > { %v10677_v21 = vpop.f32.mrf.mxu0  ;;  %v10679_v36 = vpop.f32.mrf.mxu1  ;;  %p8800_p5 = por %p8799_p4, %p8798_p2 }
 0x279   : > { %10884 = vst [vmem:[#allocation23_spill] sm:$0xff] %v10679_v36  ;;  %v5500_v36 = vadd.f32 %v10597_v42, %v5334_v6  ;;  %v5502_v1 = vadd.f32 %v10601_v45, %v5336_v39  ;;  %v5338_v6 = vadd.f32 %v10605_v61, %v10577_v8  ;;  %v5962_v63 = vadd.f32 %v10645_v46, %v5729_v4 }
 0x27a   : > { %v10682_v5 = vpop.f32.mrf.mxu0  ;;  %v10684_v15 = vpop.f32.mrf.mxu1  ;;  %v5503_v49 = vadd.f32 %v10611_v52, %v5337_v31  ;;  %v5506_v52 = vadd.f32 %v10615_v17, %v5340_v25  ;;  %v5341_v17 = vadd.f32 %v10625_v57, %v10587_v41  ;;  %v10885_v4 = vld [vmem:[#allocation18_spill] sm:$0xff]  ;;  %p8801_p6 = pnand %p8800_p5, %p8794_p1 }
 0x27b   : > { %v5730_v59 = vadd.f32 %v8595_v58, %v5500_v36  ;;  %v5732_v16 = vadd.f32 %v8598_v32, %v5502_v1  ;;  %v5504_v61 = vadd.f32 %v10607_v62, %v5338_v6  ;;  %v5731_v58 = vadd.f32 %v5668_v28, %v5501_v43 }
 0x27c   : > { %v10688_v48 = vpop.f32.mrf.mxu0  ;;  %v10690_v22 = vpop.f32.mrf.mxu1  ;;  %v5736_v6 = vadd.f32 %v10659_v34, %v5506_v52  ;;  %v10886_v34 = vld [vmem:[#allocation16_spill] sm:$0xff] }
 0x27d   : > { %v5963_v39 = vadd.f32 %v8621_v35, %v5730_v59  ;;  %v5339_v35 = vadd.f32 %v10617_v29, %v10583_v44  ;;  %v5965_v14 = vadd.f32 %v10647_v47, %v5732_v16  ;;  %v5734_v19 = vadd.f32 %v10651_v38, %v5504_v61  ;;  %v10891_v25 = vld [vmem:[#allocation20_spill] sm:$0xff] }
 0x27e   : > { %v10694_v33 = vpop.f32.mrf.mxu0  ;;  %v10696_v18 = vpop.f32.mrf.mxu1  ;;  %v5342_v44 = vadd.f32 %v10621_v11, %v10585_v30  ;;  %v5964_v29 = vadd.f32 %v10649_v3, %v5731_v58  ;;  %v5733_v38 = vadd.f32 %v10655_v7, %v5503_v49  ;;  %v10894_v49 = vld [vmem:[#allocation12_spill] sm:$0xff] }
 0x27f   : > { %v5505_v1 = vadd.f32 %v10619_v23, %v5339_v35  ;;  %v5967_v3 = vadd.f32 %v10653_v26, %v5734_v19  ;;  %v5344_v23 = vadd.f32 %v10629_v0, %v10589_v53 }
 0x280   : > { %v8644_v42 = vpop.f32.mrf.mxu0  ;;  %v8670_v2 = vpop.f32.mrf.mxu1  ;;  %v5966_v43 = vadd.f32 %v10886_v34, %v5733_v38  ;;  %v10903_v34 = vld [vmem:[#allocation23_spill] sm:$0xff] }
 0x281   : > { %v6191_v20 = vadd.f32 %v8644_v42, %v5961_v9 }
 0x282   : > { %v6111_v55 = vpop.f32.mrf.mxu0  ;;  %v6341_v45 = vpop.f32.mrf.mxu1 }
 0x283   : > { %v6421_v50 = vadd.f32 %v8670_v2, %v6191_v20  ;;  %v6190_v8 = vadd.f32 %v6111_v55, %v5960_v13  ;;  %v5508_v13 = vadd.f32 %v10623_v12, %v5342_v44  ;;  %v5735_v20 = vadd.f32 %v10885_v4, %v5505_v1  ;;  %v10887_v55 = vld [vmem:[#allocation8_spill] sm:$0xff]  ;;  %v10896_v44 = vld [vmem:[#allocation11_spill] sm:$0xff]  ;;  %v10899_v1 = vld [vmem:[#allocation21_spill] sm:$0xff] }
 0x284   : > { %v8647_v27 = vpop.f32.mrf.mxu0  ;;  %v8673_v36 = vpop.f32.mrf.mxu1 }
 0x285   : > { %v6444_v56 = vadd.f32 %v10712_v51, %v6421_v50  ;;  %v6420_v37 = vadd.f32 %v6341_v45, %v6190_v8  ;;  %v6193_v32 = vadd.f32 %v8647_v27, %v5963_v39  ;;  %v5507_v45 = vadd.f32 %v10887_v55, %v5341_v17  ;;  %v10888_v39 = vld [vmem:[#allocation5_spill] sm:$0xff]  ;;  %v10889_v50 = vld [vmem:[#allocation10_spill] sm:$0xff] }
 0x286   : > { %v6121_v62 = vpop.f32.mrf.mxu0  ;;  %v6351_v10 = vpop.f32.mrf.mxu1  ;;  %v5343_v12 = vadd.f32 %v10889_v50, %v10888_v39  ;;  %v10890_v8 = vld [vmem:[#allocation17_spill] sm:$0xff]  ;;  %v5738_v58 = vadd.f32 %v10891_v25, %v5508_v13  ;;  %v10901_v13 = vld [vmem:[#allocation22_spill] sm:$0xff] }
 0x287   : > { %6460 = vst [vmem:[%s10724_s20 + $0x8] sm:$0xff] %v6444_v56  ;;  %v6443_v54 = vadd.f32 %v10712_v51, %v6420_v37  ;;  %v6423_v46 = vadd.f32 %v8673_v36, %v6193_v32  ;;  %v6192_v28 = vadd.f32 %v6121_v62, %v5962_v63  ;;  %v5969_v61 = vadd.f32 %v10890_v8, %v5736_v6  ;;  %v10892_v56 = vld [vmem:[#allocation9_spill] sm:$0xff]  ;;  %v10893_v32 = vld [vmem:[#allocation6_spill] sm:$0xff] }
 0x288   : > { %v8650_v47 = vpop.f32.mrf.mxu0  ;;  %v8676_v60 = vpop.f32.mrf.mxu1  ;;  %v5510_v37 = vadd.f32 %v10892_v56, %v5344_v23  ;;  %v5346_v35 = vadd.f32 %v10894_v49, %v10893_v32  ;;  %v5971_v17 = vadd.f32 %v10899_v1, %v5738_v58 }
 0x289   : > { %6459 = vst [vmem:[%s10724_s20] sm:$0xff] %v6443_v54  ;;  %v6446_v40 = vadd.f32 %v10712_v51, %v6423_v46  ;;  %v6422_v9 = vadd.f32 %v6351_v10, %v6192_v28  ;;  %v6195_v59 = vadd.f32 %v8650_v47, %v5965_v14  ;;  %v10895_v14 = vld [vmem:[#allocation19_spill] sm:$0xff]  ;;  %v5737_v54 = vadd.f32 %v10672_v24, %v5507_v45 }
 0x28a   : > { %v6131_v30 = vpop.f32.mrf.mxu0  ;;  %v6361_v11 = vpop.f32.mrf.mxu1  ;;  %v5968_v62 = vadd.f32 %v10895_v14, %v5735_v20  ;;  %v10897_v47 = vld [vmem:[#allocation7_spill] sm:$0xff] }
 0x28b   : > { %6462 = vst [vmem:[%s10724_s20 + $0x18] sm:$0xff] %v6446_v40  ;;  %v6445_v7 = vadd.f32 %v10712_v51, %v6422_v9  ;;  %v6425_v42 = vadd.f32 %v8676_v60, %v6195_v59  ;;  %v6194_v2 = vadd.f32 %v6131_v30, %v5964_v29  ;;  %v5509_v29 = vadd.f32 %v10896_v44, %v5343_v12  ;;  %v10898_v60 = vld [vmem:[#allocation14_spill] sm:$0xff] }
 0x28c   : > { %v8653_v41 = vpop.f32.mrf.mxu0  ;;  %v8679_v57 = vpop.f32.mrf.mxu1  ;;  %v5345_v38 = vadd.f32 %v10898_v60, %v10897_v47  ;;  %v5740_v40 = vadd.f32 %v10677_v21, %v5510_v37  ;;  %v5970_v23 = vadd.f32 %v10901_v13, %v5737_v54 }
 0x28d   : > { %6461 = vst [vmem:[%s10724_s20 + $0x10] sm:$0xff] %v6445_v7  ;;  %v6448_v26 = vadd.f32 %v10712_v51, %v6425_v42  ;;  %v6424_v31 = vadd.f32 %v6361_v11, %v6194_v2  ;;  %v6197_v16 = vadd.f32 %v8653_v41, %v5967_v3  ;;  %v10900_v11 = vld [vmem:[#allocation13_spill] sm:$0xff]  ;;  %v5739_v7 = vadd.f32 %v10682_v5, %v5509_v29  ;;  %v10902_v41 = vld [vmem:[#allocation15_spill] sm:$0xff] }
 0x28e   : > { %v6141_v53 = vpop.f32.mrf.mxu0  ;;  %v6371_v0 = vpop.f32.mrf.mxu1  ;;  %v5512_v3 = vadd.f32 %v10900_v11, %v5346_v35 }
 0x28f   : > { %6464 = vst [vmem:[%s10724_s20 + $0x28] sm:$0xff] %v6448_v26  ;;  %v6447_v27 = vadd.f32 %v10712_v51, %v6424_v31  ;;  %v6427_v36 = vadd.f32 %v8679_v57, %v6197_v16  ;;  %v6196_v63 = vadd.f32 %v6141_v53, %v5966_v43  ;;  %v5511_v57 = vadd.f32 %v10902_v41, %v5345_v38 }
 0x290   : > { %v8656_v10 = vpop.f32.mrf.mxu0  ;;  %v8682_v19 = vpop.f32.mrf.mxu1  ;;  %v5973_v43 = vadd.f32 %v10903_v34, %v5740_v40  ;;  %v5742_v5 = vadd.f32 %v10688_v48, %v5512_v3  ;;  %v5972_v39 = vadd.f32 %v10684_v15, %v5739_v7 }
 0x291   : > { %6463 = vst [vmem:[%s10724_s20 + $0x20] sm:$0xff] %v6447_v27  ;;  %v6450_v46 = vadd.f32 %v10712_v51, %v6427_v36  ;;  %v6426_v28 = vadd.f32 %v6371_v0, %v6196_v63  ;;  %v6199_v52 = vadd.f32 %v8656_v10, %v5969_v61  ;;  %v5741_v8 = vadd.f32 %v10694_v33, %v5511_v57 }
 0x292   : > { %v6151_v9 = vpop.f32.mrf.mxu0  ;;  %v6381_v59 = vpop.f32.mrf.mxu1  ;;  %v5975_v58 = vadd.f32 %v10690_v22, %v5742_v5 }
 0x293   : > { %6466 = vst [vmem:[%s10724_s20 + $0x38] sm:$0xff] %v6450_v46  ;;  %v6449_v24 = vadd.f32 %v10712_v51, %v6426_v28  ;;  %v6429_v6 = vadd.f32 %v8682_v19, %v6199_v52  ;;  %v6198_v30 = vadd.f32 %v6151_v9, %v5968_v62  ;;  %v5974_v56 = vadd.f32 %v10696_v18, %v5741_v8 }
 0x294   : > { %v8659_v42 = vpop.f32.mrf.mxu0  ;;  %v8685_v2 = vpop.f32.mrf.mxu1 }
 0x295   : > { %6465 = vst [vmem:[%s10724_s20 + $0x30] sm:$0xff] %v6449_v24  ;;  %v6452_v21 = vadd.f32 %v10712_v51, %v6429_v6  ;;  %v6428_v4 = vadd.f32 %v6381_v59, %v6198_v30  ;;  %v6201_v20 = vadd.f32 %v8659_v42, %v5971_v17 }
 0x296   : > { %v6161_v26 = vpop.f32.mrf.mxu0  ;;  %v6391_v31 = vpop.f32.mrf.mxu1 }
 0x297   : > { %6468 = vst [vmem:[%s10724_s20 + $0x48] sm:$0xff] %v6452_v21  ;;  %v6451_v16 = vadd.f32 %v10712_v51, %v6428_v4  ;;  %v6431_v55 = vadd.f32 %v8685_v2, %v6201_v20  ;;  %v6200_v45 = vadd.f32 %v6161_v26, %v5970_v23 }
 0x298   : > { %v8662_v50 = vpop.f32.mrf.mxu0  ;;  %v8688_v12 = vpop.f32.mrf.mxu1 }
 0x299   : > { %6467 = vst [vmem:[%s10724_s20 + $0x40] sm:$0xff] %v6451_v16  ;;  %v6454_v61 = vadd.f32 %v10712_v51, %v6431_v55  ;;  %v6430_v53 = vadd.f32 %v6391_v31, %v6200_v45  ;;  %v6203_v0 = vadd.f32 %v8662_v50, %v5973_v43 }
 0x29a   : > { %v6171_v48 = vpop.f32.mrf.mxu0  ;;  %v6401_v25 = vpop.f32.mrf.mxu1 }
 0x29b   : > { %6470 = vst [vmem:[%s10724_s20 + $0x58] sm:$0xff] %v6454_v61  ;;  %v6453_v15 = vadd.f32 %v10712_v51, %v6430_v53  ;;  %v6433_v27 = vadd.f32 %v8688_v12, %v6203_v0  ;;  %v6202_v36 = vadd.f32 %v6171_v48, %v5972_v39 }
 0x29c   : > { %v8665_v33 = vpop.f32.mrf.mxu0  ;;  %v8691_v63 = vpop.f32.mrf.mxu1 }
 0x29d   : > { %6469 = vst [vmem:[%s10724_s20 + $0x50] sm:$0xff] %v6453_v15  ;;  %v6456_v37 = vadd.f32 %v10712_v51, %v6433_v27  ;;  %v6432_v32 = vadd.f32 %v6401_v25, %v6202_v36  ;;  %v6205_v49 = vadd.f32 %v8665_v33, %v5975_v58 }
 0x29e   : > { %v6181_v22 = vpop.f32.mrf.mxu0  ;;  %v6411_v10 = vpop.f32.mrf.mxu1 }
 0x29f   : > { %6472 = vst [vmem:[%s10724_s20 + $0x68] sm:$0xff] %v6456_v37  ;;  %v6455_v35 = vadd.f32 %v10712_v51, %v6432_v32  ;;  %v6435_v14 = vadd.f32 %v8691_v63, %v6205_v49  ;;  %v6204_v62 = vadd.f32 %v6181_v22, %v5974_v56 }
 0x2a1   : > { %6471 = vst [vmem:[%s10724_s20 + $0x60] sm:$0xff] %v6455_v35  ;;  %v6458_v18 = vadd.f32 %v10712_v51, %v6435_v14  ;;  %v6434_v19 = vadd.f32 %v6411_v10, %v6204_v62 }
 0x2a3   : > { %6474 = vst [vmem:[%s10724_s20 + $0x78] sm:$0xff] %v6458_v18  ;;  %v6457_v54 = vadd.f32 %v10712_v51, %v6434_v19 }
 0x2a5   : > { %6473 = vst [vmem:[%s10724_s20 + $0x70] sm:$0xff] %v6457_v54 }
 0x2a6   : > { %8804 = shalt.err (!%p8801_p6)
}
 0x2a7   : > { %s8805_s4 = scalar_lea.hbm %s10800_s27, 2048  ;;  %s8809_s9 = scalar_lea.hbm %s10863_s3, 8192 }
 0x2a8   : > { %p8806_p7 = scmp.ne.s32.totalorder %s10800_s27, %s8805_s4  ;;  %p8810_p11 = scmp.lt.s32.totalorder %s10800_s27, %s10863_s3 }
 0x2a9   : > { %p8811_p12 = scmp.lt.s32.totalorder %s8809_s9, %s8805_s4 }
 0x2aa   : > { %p8807_p9 = pnand %p8806_p7, %p8959_p3 }
 0x2ab   : > { %p8812_p13 = por %p8811_p12, %p8810_p11 }
 0x2ac   : > { %p8808_p10 = pneg %p8807_p9 }
 0x2ae   : > { %p8813_p0 = pnand %p8812_p13, %p8808_p10 }
 0x2b0   : > { %8816 = shalt.err (!%p8813_p0)
}
 0x2b1   : > { %s8886_s15 = smov 128   ;;  %s8887_s21 = smov 8  }
 0x2b2   : > { %8693 = dma.vmem_to_hbm [thread:$0]  (%p8959_p3), %s10802_s16, 2048, %s10800_s27, %s10809_s28, %s8886_s15, %s8886_s15, %s8887_s21  }
 0x2b3 PF: > { %p8699_p1 = scmp.ge.s32.totalorder %s8883_s19, 2  ;;  %s6507_s24 = sand.u32 1, %s8855_s12  }
 0x2b4   : > { %s6508_s29 = scalar_lea.sflag [#allocation3], %s6507_s24 }
 0x2b5   : > { %p8696_p2 = pnand %p8699_p1, %p8968_p8 }
 0x2b7   : > { %p8697_p4 = pneg %p8696_p2 }
 0x2b9   : > { %8850 = dma.done.wait (%p8697_p4), %s6508_s29, 2048  }
 0x2ba   : > { %8852 = vsyncadd (%p8697_p4), %s6508_s29, 4294965248  ;;  %s16_s19 = sadd.s32 1, %s8883_s19   ;;  %s10904_s12 = smov %s8859_s13 }
 0x2bb   : > { %p13_p5 = scmp.ge.s32.totalorder %s16_s19, 6   ;;  %s10905_s13 = smov %s8863_s14 }
 0x2bc   : > { %s10906_s14 = smov %s8977_s30  ;;  %s10907_s15 = smov %s8875_s17 }
 0x2bd   : > { %s10908_s16 = smov %s8879_s18  ;;  %s10909_s17 = smov %s10912_s22 }
 0x2be   : > { %s10910_s18 = smov %s10916_s23  ;;  %15 = sbr.rel (!%p13_p5) target bundleno = 5 (0x5), region = 104 }
 0x2c3   :  { %6513 = vsyncpa [#allocation3], 1 }
 0x2c4   :  { %6515 = vsyncpa [#allocation3 + $0x1], 1 }

</bundles_post_ra>
